<compile_context>
chip_gen: v7x
topology: tpu7x:2x2x1
jax: 0.10.0
libtpu: 0.0.40
codegen_flags: <defaults>
</compile_context>

<pallas_src>
import functools

import jax
import jax.numpy as jnp
from jax import lax
from jax.experimental import pallas as pl
from jax.experimental.pallas import tpu as pltpu


def _round_up(x, m):
    return (x + m - 1) // m * m


# --------------------------------------------------------------------------- #
# Kernel
# --------------------------------------------------------------------------- #
def _rnn_agent_seq_kernel(x_ref, h0_ref,
                          w1_ref, b1_ref,
                          wih_ref, bg_ref,
                          whh_ref, bhn_ref,
                          w2_ref, b2_ref,
                          q_ref, hout_ref,
                          gi_ref, hall_ref):
    """Full T-step GRU rollout for one batch tile.

    Shapes (bt = batch tile, DP/HP/AP = padded input/hidden/action dims):
      x_ref    (T, bt, DP)   f32   resident input slab for this batch tile
      h0_ref   (bt, HP)      f32   initial hidden
      w1_ref   (DP, HP)      bf16  fc1 weight              (resident)
      b1_ref   (1, HP)       f32
      wih_ref  (HP, 3HP)     bf16  GRU input weights [r|z|n]    (resident)
      bg_ref   (1, 3HP)      f32   [bih_r+bhh_r | bih_z+bhh_z | bih_n]
      whh_ref  (HP, 3HP)     bf16  GRU hidden weights [r|z|n]   (resident)
      bhn_ref  (1, HP)       f32   bhh_n (stays inside the r-gated term)
      w2_ref   (HP, AP)      bf16  fc2 weight              (resident)
      b2_ref   (1, AP)       f32
      q_ref    (T, bt, AP)   f32   lane-dense q output slab
      hout_ref (bt, HP)      f32   final hidden
      gi_ref   (T, bt, 3HP)  f32   VMEM scratch: precomputed input gates
      hall_ref (T, bt, HP)   f32   VMEM scratch: stacked h_t for fc2
    """
    T, bt, DP = x_ref.shape
    HP = h0_ref.shape[1]
    AP = q_ref.shape[2]

    # ---- Phase 1: input-side projections for ALL time steps (M = T*bt). ----
    x_flat = x_ref[...].reshape(T * bt, DP).astype(jnp.bfloat16)
    xg = jnp.maximum(
        jnp.dot(x_flat, w1_ref[...], preferred_element_type=jnp.float32)
        + b1_ref[...], 0.0)                                     # (T*bt, HP) f32
    gi = jnp.dot(xg.astype(jnp.bfloat16), wih_ref[...],
                 preferred_element_type=jnp.float32) + bg_ref[...]
    gi_ref[...] = gi.reshape(T, bt, 3 * HP)

    # ---- Phase 2: serial recurrence; one small MXU dot + gates per step. ----
    whh = whh_ref[...]                                   # hoisted weight read
    bhn_b = jnp.broadcast_to(bhn_ref[...], (bt, HP))     # hoisted broadcast

    def step(t, h):
        gh = jnp.dot(h.astype(jnp.bfloat16), whh,
                     preferred_element_type=jnp.float32)         # (bt, 3HP)
        gi_t = gi_ref[t]                                         # (bt, 3HP)
        r = jax.nn.sigmoid(gi_t[:, 0:HP] + gh[:, 0:HP])
        z = jax.nn.sigmoid(gi_t[:, HP:2 * HP] + gh[:, HP:2 * HP])
        n = jnp.tanh(gi_t[:, 2 * HP:] + r * (gh[:, 2 * HP:] + bhn_b))
        h_new = (1.0 - z) * n + z * h                            # f32
        hall_ref[t] = h_new
        return h_new

    h_final = lax.fori_loop(0, T, step, h0_ref[...], unroll=True)
    hout_ref[...] = h_final

    # ---- Phase 3: fc2 over all time steps in one matmul (M = T*bt). ----
    h_flat = hall_ref[...].reshape(T * bt, HP).astype(jnp.bfloat16)
    q = jnp.dot(h_flat, w2_ref[...],
                preferred_element_type=jnp.float32) + b2_ref[...]
    q_ref[...] = q.reshape(T, bt, AP)


# --------------------------------------------------------------------------- #
# Wrappers
# --------------------------------------------------------------------------- #
def rnn_agent_forward_seq(x_seq, hidden_state, kparams, hidden_dim, n_actions,
                          batch_tile=None, core_parallel=False):
    """Fused rollout.

    x_seq:        (T, B, input_dim) f32
    hidden_state: reshapable to (B, hidden_dim) (a (1, H) init_hidden() is
                  broadcast to B)
    batch_tile:   None -> bt = B (best on single-TC v5e/v6e).  For v7x set
                  batch_tile = B // 2 and core_parallel=True to shard the two
                  batch tiles across the two TensorCores.
    Returns: q_seq (T, B, n_actions) f32, h_final (B, hidden_dim) f32.
    """
    T, B, D = x_seq.shape
    DP = kparams["w1"].shape[0]
    HP = kparams["w1"].shape[1]
    AP = kparams["w2"].shape[1]

    bt = B if batch_tile is None else batch_tile
    if B % bt != 0:
        raise ValueError(f"batch_tile={bt} must divide batch={B}")

    # Lane-dense x stream: pad the feature dim to DP.
    x_pad = jnp.zeros((T, B, DP), jnp.float32).at[:, :, :D].set(
        x_seq.astype(jnp.float32))

    h0 = hidden_state.reshape(-1, hidden_dim).astype(jnp.float32)
    if h0.shape[0] == 1 and B > 1:
        h0 = jnp.broadcast_to(h0, (B, hidden_dim))
    if h0.shape[0] != B:
        raise ValueError(
            f"hidden_state batch {h0.shape[0]} != input batch {B}")
    h0p = jnp.zeros((B, HP), jnp.float32).at[:, :hidden_dim].set(h0)

    const2 = lambda b: (0, 0)                  # resident weights / biases
    semantics = (pltpu.CORE_PARALLEL,) if core_parallel else ("parallel",)

    q_pad, h_pad = pl.pallas_call(
        _rnn_agent_seq_kernel,
        out_shape=(
            jax.ShapeDtypeStruct((T, B, AP), jnp.float32),
            jax.ShapeDtypeStruct((B, HP), jnp.float32),
        ),
        grid_spec=pltpu.PrefetchScalarGridSpec(
            num_scalar_prefetch=0,
            grid=(B // bt,),
            in_specs=[
                pl.BlockSpec((T, bt, DP), lambda b: (0, b, 0)),   # x slab
                pl.BlockSpec((bt, HP), lambda b: (b, 0)),         # h0
                pl.BlockSpec((DP, HP), const2),                   # w1
                pl.BlockSpec((1, HP), const2),                    # b1
                pl.BlockSpec((HP, 3 * HP), const2),               # wih
                pl.BlockSpec((1, 3 * HP), const2),                # bg
                pl.BlockSpec((HP, 3 * HP), const2),               # whh
                pl.BlockSpec((1, HP), const2),                    # bhn
                pl.BlockSpec((HP, AP), const2),                   # w2
                pl.BlockSpec((1, AP), const2),                    # b2
            ],
            out_specs=(
                pl.BlockSpec((T, bt, AP), lambda b: (0, b, 0)),   # q slab
                pl.BlockSpec((bt, HP), lambda b: (b, 0)),         # h_out
            ),
            scratch_shapes=[
                pltpu.VMEM((T, bt, 3 * HP), jnp.float32),         # gi
                pltpu.VMEM((T, bt, HP), jnp.float32),             # stacked h_t
            ],
        ),
        compiler_params=pltpu.CompilerParams(
            dimension_semantics=semantics),
    )(x_pad, h0p,
      kparams["w1"], kparams["b1"],
      kparams["wih"], kparams["bg"],
      kparams["whh"], kparams["bhn"],
      kparams["w2"], kparams["b2"])

    return q_pad[:, :, :n_actions], h_pad[:, :hidden_dim]


def rnn_agent_forward(inputs, hidden_state, kparams, hidden_dim, n_actions):
    """Single-step forward, matching the PyTorch module's forward signature."""
    q_seq, h = rnn_agent_forward_seq(inputs[None], hidden_state, kparams,
                                     hidden_dim, n_actions)
    return q_seq[0], h


# --------------------------------------------------------------------------- #
# Parameter handling
# --------------------------------------------------------------------------- #
def init_params(key, input_dim, hidden_dim, n_actions):
    """Raw parameters, PyTorch-style init, stored transposed as (in, out)."""
    ks = jax.random.split(key, 8)

    def unif(k, shape, fan_in):
        bound = 1.0 / jnp.sqrt(jnp.float32(fan_in))
        return jax.random.uniform(k, shape, jnp.float32, -bound, bound)

    return {
        "w1": unif(ks[0], (input_dim, hidden_dim), input_dim),
        "b1": unif(ks[1], (1, hidden_dim), input_dim),
        "wih": unif(ks[2], (hidden_dim, 3 * hidden_dim), hidden_dim),
        "bih": unif(ks[3], (1, 3 * hidden_dim), hidden_dim),
        "whh": unif(ks[4], (hidden_dim, 3 * hidden_dim), hidden_dim),
        "bhh": unif(ks[5], (1, 3 * hidden_dim), hidden_dim),
        "w2": unif(ks[6], (hidden_dim, n_actions), hidden_dim),
        "b2": unif(ks[7], (1, n_actions), hidden_dim),
    }


def prepare_kernel_params(raw, input_dim, hidden_dim, n_actions):
    """Pad input/hidden/action dims to lane multiples, place r/z/n gate blocks
    at lane-aligned column offsets, precompute the r/z bias sums, and cast the
    matmul weights to bf16.  Pad lanes are exactly zero (required so padded
    hidden lanes stay zero through the recurrence)."""
    H = hidden_dim
    DP = _round_up(input_dim, 128)
    HP = _round_up(H, 128)
    AP = _round_up(n_actions, 128)

    w1, b1 = raw["w1"], raw["b1"]
    wih, bih = raw["wih"], raw["bih"]
    whh, bhh = raw["whh"], raw["bhh"]
    w2, b2 = raw["w2"], raw["b2"]

    w1p = jnp.zeros((DP, HP), jnp.float32).at[:input_dim, :H].set(w1)
    b1p = jnp.zeros((1, HP), jnp.float32).at[:, :H].set(b1)

    def place_gates(w):
        out = jnp.zeros((HP, 3 * HP), jnp.float32)
        out = out.at[:H, 0:H].set(w[:, 0:H])                     # r
        out = out.at[:H, HP:HP + H].set(w[:, H:2 * H])           # z
        out = out.at[:H, 2 * HP:2 * HP + H].set(w[:, 2 * H:])    # n
        return out

    wihp = place_gates(wih)
    whhp = place_gates(whh)

    bg = jnp.zeros((1, 3 * HP), jnp.float32)
    bg = bg.at[:, 0:H].set(bih[:, 0:H] + bhh[:, 0:H])
    bg = bg.at[:, HP:HP + H].set(bih[:, H:2 * H] + bhh[:, H:2 * H])
    bg = bg.at[:, 2 * HP:2 * HP + H].set(bih[:, 2 * H:3 * H])

    bhn = jnp.zeros((1, HP), jnp.float32).at[:, :H].set(bhh[:, 2 * H:3 * H])

    w2p = jnp.zeros((HP, AP), jnp.float32).at[:H, :n_actions].set(w2)
    b2p = jnp.zeros((1, AP), jnp.float32).at[:, :n_actions].set(b2)

    bf16 = lambda a: a.astype(jnp.bfloat16)
    return {
        "w1": bf16(w1p), "b1": b1p,
        "wih": bf16(wihp), "bg": bg,
        "whh": bf16(whhp), "bhn": bhn,
        "w2": bf16(w2p), "b2": b2p,
    }


# --------------------------------------------------------------------------- #
# Pure-JAX reference (PyTorch GRUCell semantics, same bf16-at-dot precision)
# --------------------------------------------------------------------------- #
def reference_forward_seq(x_seq, hidden_state, raw, hidden_dim):
    H = hidden_dim
    bf = lambda a: a.astype(jnp.bfloat16)
    dot = lambda a, b: jnp.dot(bf(a), bf(b), preferred_element_type=jnp.float32)

    h = hidden_state.reshape(-1, H).astype(jnp.float32)
    if h.shape[0] == 1 and x_seq.shape[1] > 1:
        h = jnp.broadcast_to(h, (x_seq.shape[1], H))

    def step(h, x):
        xg = jnp.maximum(dot(x, raw["w1"]) + raw["b1"], 0.0)
        gi = dot(xg, raw["wih"]) + raw["bih"]
        gh = dot(h, raw["whh"]) + raw["bhh"]
        r = jax.nn.sigmoid(gi[:, :H] + gh[:, :H])
        z = jax.nn.sigmoid(gi[:, H:2 * H] + gh[:, H:2 * H])
        n = jnp.tanh(gi[:, 2 * H:] + r * gh[:, 2 * H:])
        h_new = (1.0 - z) * n + z * h
        q = dot(h_new, raw["w2"]) + raw["b2"]
        return h_new, q

    h_final, q_seq = jax.lax.scan(step, h, x_seq)
    return q_seq, h_final


# --------------------------------------------------------------------------- #
# Test
# --------------------------------------------------------------------------- #
if __name__ == "__main__":
    T = 8            # rollout length (fused into one pallas_call)
    B = 32           # n_agents * env_batch
    input_dim = 48   # obs features
    hidden_dim = 64  # args.hidden_dim
    n_actions = 10   # args.n_actions

    key = jax.random.PRNGKey(0)
    k_x, k_h, k_p = jax.random.split(key, 3)

    x_seq = jax.random.normal(k_x, (T, B, input_dim), jnp.float32)
    hidden0 = 0.1 * jax.random.normal(k_h, (B, hidden_dim), jnp.float32)

    raw = init_params(k_p, input_dim, hidden_dim, n_actions)
    kparams = prepare_kernel_params(raw, input_dim, hidden_dim, n_actions)

    # Fused-sequence kernel (bt = B: one fat grid step on 1-TC v5e/v6e).
    q_seq, h_final = rnn_agent_forward_seq(
        x_seq, hidden0, kparams, hidden_dim, n_actions)
    q_seq = jax.block_until_ready(q_seq)
    h_final = jax.block_until_ready(h_final)

    assert q_seq.shape == (T, B, n_actions)
    assert h_final.shape == (B, hidden_dim)

    q_ref, h_ref = reference_forward_seq(x_seq, hidden0, raw, hidden_dim)
    assert jnp.allclose(q_seq, q_ref, atol=5e-3, rtol=5e-3), "q mismatch"
    assert jnp.allclose(h_final, h_ref, atol=5e-3, rtol=5e-3), "h mismatch"

    # Batch-tiled variant (the v7x-style 2-way split; plain 'parallel' here
    # so it also runs on 1-TC chips).
    q_seq2, h_final2 = rnn_agent_forward_seq(
        x_seq, hidden0, kparams, hidden_dim, n_actions, batch_tile=B // 2)
    q_seq2 = jax.block_until_ready(q_seq2)
    assert jnp.allclose(q_seq2, q_ref, atol=5e-3, rtol=5e-3), "q (tiled) mismatch"
    assert jnp.allclose(h_final2, h_ref, atol=5e-3, rtol=5e-3), "h (tiled) mismatch"

    # Single-step path (matches the PyTorch module forward signature).
    q1, h1 = rnn_agent_forward(x_seq[0], hidden0, kparams, hidden_dim, n_actions)
    q1 = jax.block_until_ready(q1)
    q1_ref, h1_ref = reference_forward_seq(x_seq[:1], hidden0, raw, hidden_dim)
    assert jnp.allclose(q1, q1_ref[0], atol=5e-3, rtol=5e-3), "q (1-step) mismatch"
    assert jnp.allclose(h1, h1_ref, atol=5e-3, rtol=5e-3), "h (1-step) mismatch"

    print("KERNEL_OK")
</pallas_src>

<mosaic_0001>
module attributes {stable_mosaic.version = 11 : i64} {
  func.func @_rnn_agent_seq_kernel(%arg0: i32, %arg1: memref<8x32x128xf32, #tpu.memory_space<vmem>>, %arg2: memref<32x128xf32, #tpu.memory_space<vmem>>, %arg3: memref<128x128xbf16, #tpu.memory_space<vmem>>, %arg4: memref<1x128xf32, #tpu.memory_space<vmem>>, %arg5: memref<128x384xbf16, #tpu.memory_space<vmem>>, %arg6: memref<1x384xf32, #tpu.memory_space<vmem>>, %arg7: memref<128x384xbf16, #tpu.memory_space<vmem>>, %arg8: memref<1x128xf32, #tpu.memory_space<vmem>>, %arg9: memref<128x128xbf16, #tpu.memory_space<vmem>>, %arg10: memref<1x128xf32, #tpu.memory_space<vmem>>, %arg11: memref<8x32x128xf32, #tpu.memory_space<vmem>>, %arg12: memref<32x128xf32, #tpu.memory_space<vmem>>, %arg13: memref<8x32x384xf32, #tpu.memory_space<vmem>>, %arg14: memref<8x32x128xf32, #tpu.memory_space<vmem>>) attributes {dimension_semantics = [#tpu.dimension_semantics<parallel>], iteration_bounds = array<i64: 1>, scalar_prefetch = 0 : i64, scratch_operands = 2 : i64, tpu.core_type = #tpu.core_type<tc>, window_params = [{transform_indices = @transform_0, window_bounds = array<i64: 8, 32, 128>}, {transform_indices = @transform_1, window_bounds = array<i64: 32, 128>}, {pipeline_mode = #tpu.pipeline_mode<synchronous>, transform_indices = @transform_2, window_bounds = array<i64: 128, 128>}, {pipeline_mode = #tpu.pipeline_mode<synchronous>, transform_indices = @transform_3, window_bounds = array<i64: 1, 128>}, {pipeline_mode = #tpu.pipeline_mode<synchronous>, transform_indices = @transform_4, window_bounds = array<i64: 128, 384>}, {pipeline_mode = #tpu.pipeline_mode<synchronous>, transform_indices = @transform_5, window_bounds = array<i64: 1, 384>}, {pipeline_mode = #tpu.pipeline_mode<synchronous>, transform_indices = @transform_6, window_bounds = array<i64: 128, 384>}, {pipeline_mode = #tpu.pipeline_mode<synchronous>, transform_indices = @transform_7, window_bounds = array<i64: 1, 128>}, {pipeline_mode = #tpu.pipeline_mode<synchronous>, transform_indices = @transform_8, window_bounds = array<i64: 128, 128>}, {pipeline_mode = #tpu.pipeline_mode<synchronous>, transform_indices = @transform_9, window_bounds = array<i64: 1, 128>}, {transform_indices = @transform_10, window_bounds = array<i64: 8, 32, 128>}, {transform_indices = @transform_11, window_bounds = array<i64: 32, 128>}]} {
    %c0 = arith.constant 0 : index
    %c0_0 = arith.constant 0 : index
    %c0_1 = arith.constant 0 : index
    %0 = vector.load %arg1[%c0, %c0_0, %c0_1] : memref<8x32x128xf32, #tpu.memory_space<vmem>>, vector<8x32x128xf32>
    %1 = vector.shape_cast %0 : vector<8x32x128xf32> to vector<256x128xf32>
    %2 = arith.truncf %1 : vector<256x128xf32> to vector<256x128xbf16>
    %c0_2 = arith.constant 0 : index
    %c0_3 = arith.constant 0 : index
    %3 = vector.load %arg3[%c0_2, %c0_3] : memref<128x128xbf16, #tpu.memory_space<vmem>>, vector<128x128xbf16>
    %cst = arith.constant dense<0.000000e+00> : vector<256x128xf32>
    %4 = tpu.matmul %2, %3, %cst {dimension_numbers = #tpu.dot_dimension_numbers<[1], [0], [0], [1], [0, 0, 1, 1], [], []>} : vector<256x128xbf16>, vector<128x128xbf16>, vector<256x128xf32> -> vector<256x128xf32>
    %c0_4 = arith.constant 0 : index
    %c0_5 = arith.constant 0 : index
    %5 = vector.load %arg4[%c0_4, %c0_5] : memref<1x128xf32, #tpu.memory_space<vmem>>, vector<1x128xf32>
    %6 = vector.broadcast %5 : vector<1x128xf32> to vector<256x128xf32>
    %7 = arith.addf %4, %6 : vector<256x128xf32>
    %cst_6 = arith.constant 0.000000e+00 : f32
    %8 = vector.broadcast %cst_6 : f32 to vector<256x128xf32>
    %9 = arith.maximumf %7, %8 : vector<256x128xf32>
    %10 = arith.truncf %9 : vector<256x128xf32> to vector<256x128xbf16>
    %c0_7 = arith.constant 0 : index
    %c0_8 = arith.constant 0 : index
    %11 = vector.load %arg5[%c0_7, %c0_8] : memref<128x384xbf16, #tpu.memory_space<vmem>>, vector<128x384xbf16>
    %cst_9 = arith.constant dense<0.000000e+00> : vector<256x384xf32>
    %12 = tpu.matmul %10, %11, %cst_9 {dimension_numbers = #tpu.dot_dimension_numbers<[1], [0], [0], [1], [0, 0, 1, 1], [], []>} : vector<256x128xbf16>, vector<128x384xbf16>, vector<256x384xf32> -> vector<256x384xf32>
    %c0_10 = arith.constant 0 : index
    %c0_11 = arith.constant 0 : index
    %13 = vector.load %arg6[%c0_10, %c0_11] : memref<1x384xf32, #tpu.memory_space<vmem>>, vector<1x384xf32>
    %14 = vector.broadcast %13 : vector<1x384xf32> to vector<256x384xf32>
    %15 = arith.addf %12, %14 : vector<256x384xf32>
    %16 = vector.shape_cast %15 : vector<256x384xf32> to vector<8x32x384xf32>
    %c0_12 = arith.constant 0 : index
    %c0_13 = arith.constant 0 : index
    %c0_14 = arith.constant 0 : index
    %17 = vector.load %arg13[%c0_12, %c0_13, %c0_14] : memref<8x32x384xf32, #tpu.memory_space<vmem>>, vector<8x32x384xf32>
    tpu.vector_store %arg13[%c0_12, %c0_13, %c0_14], %16 {strides = array<i32>} : memref<8x32x384xf32, #tpu.memory_space<vmem>>, vector<8x32x384xf32>,
    %c0_15 = arith.constant 0 : index
    %c0_16 = arith.constant 0 : index
    %18 = vector.load %arg7[%c0_15, %c0_16] : memref<128x384xbf16, #tpu.memory_space<vmem>>, vector<128x384xbf16>
    %c0_17 = arith.constant 0 : index
    %c0_18 = arith.constant 0 : index
    %19 = vector.load %arg8[%c0_17, %c0_18] : memref<1x128xf32, #tpu.memory_space<vmem>>, vector<1x128xf32>
    %20 = vector.shape_cast %19 : vector<1x128xf32> to vector<1x128xf32>
    %21 = vector.broadcast %20 : vector<1x128xf32> to vector<32x128xf32>
    %c0_19 = arith.constant 0 : index
    %c0_20 = arith.constant 0 : index
    %22 = vector.load %arg2[%c0_19, %c0_20] : memref<32x128xf32, #tpu.memory_space<vmem>>, vector<32x128xf32>
    %c0_i32 = arith.constant 0 : i32
    %23 = arith.truncf %22 : vector<32x128xf32> to vector<32x128xbf16>
    %cst_21 = arith.constant dense<0.000000e+00> : vector<32x384xf32>
    %24 = tpu.matmul %23, %18, %cst_21 {dimension_numbers = #tpu.dot_dimension_numbers<[1], [0], [0], [1], [0, 0, 1, 1], [], []>} : vector<32x128xbf16>, vector<128x384xbf16>, vector<32x384xf32> -> vector<32x384xf32>
    %25 = arith.index_cast %c0_i32 : i32 to index
    %c0_22 = arith.constant 0 : index
    %c0_23 = arith.constant 0 : index
    %26 = vector.load %arg13[%25, %c0_22, %c0_23] : memref<8x32x384xf32, #tpu.memory_space<vmem>>, vector<1x32x384xf32>
    %27 = vector.shape_cast %26 : vector<1x32x384xf32> to vector<32x384xf32>
    %28 = vector.extract_strided_slice %27 {offsets = [0, 0], sizes = [32, 128], strides = [1, 1]} : vector<32x384xf32> to vector<32x128xf32>
    %29 = vector.extract_strided_slice %24 {offsets = [0, 0], sizes = [32, 128], strides = [1, 1]} : vector<32x384xf32> to vector<32x128xf32>
    %30 = arith.addf %28, %29 : vector<32x128xf32>
    %31 = arith.negf %30 : vector<32x128xf32>
    %32 = math.exp %31 : vector<32x128xf32>
    %cst_24 = arith.constant 1.000000e+00 : f32
    %33 = vector.broadcast %cst_24 : f32 to vector<32x128xf32>
    %34 = arith.addf %33, %32 : vector<32x128xf32>
    %35 = arith.divf %33, %34 : vector<32x128xf32>
    %36 = vector.extract_strided_slice %27 {offsets = [0, 128], sizes = [32, 128], strides = [1, 1]} : vector<32x384xf32> to vector<32x128xf32>
    %37 = vector.extract_strided_slice %24 {offsets = [0, 128], sizes = [32, 128], strides = [1, 1]} : vector<32x384xf32> to vector<32x128xf32>
    %38 = arith.addf %36, %37 : vector<32x128xf32>
    %39 = arith.negf %38 : vector<32x128xf32>
    %40 = math.exp %39 : vector<32x128xf32>
    %cst_25 = arith.constant 1.000000e+00 : f32
    %41 = vector.broadcast %cst_25 : f32 to vector<32x128xf32>
    %42 = arith.addf %41, %40 : vector<32x128xf32>
    %43 = arith.divf %41, %42 : vector<32x128xf32>
    %44 = vector.extract_strided_slice %27 {offsets = [0, 256], sizes = [32, 128], strides = [1, 1]} : vector<32x384xf32> to vector<32x128xf32>
    %45 = vector.extract_strided_slice %24 {offsets = [0, 256], sizes = [32, 128], strides = [1, 1]} : vector<32x384xf32> to vector<32x128xf32>
    %46 = arith.addf %45, %21 : vector<32x128xf32>
    %47 = arith.mulf %35, %46 : vector<32x128xf32>
    %48 = arith.addf %44, %47 : vector<32x128xf32>
    %49 = math.tanh %48 : vector<32x128xf32>
    %cst_26 = arith.constant 1.000000e+00 : f32
    %50 = vector.broadcast %cst_26 : f32 to vector<32x128xf32>
    %51 = arith.subf %50, %43 : vector<32x128xf32>
    %52 = arith.mulf %51, %49 : vector<32x128xf32>
    %53 = arith.mulf %43, %22 : vector<32x128xf32>
    %54 = arith.addf %52, %53 : vector<32x128xf32>
    %55 = arith.index_cast %c0_i32 : i32 to index
    %c0_27 = arith.constant 0 : index
    %c0_28 = arith.constant 0 : index
    %56 = vector.load %arg14[%55, %c0_27, %c0_28] : memref<8x32x128xf32, #tpu.memory_space<vmem>>, vector<1x32x128xf32>
    %57 = vector.shape_cast %56 : vector<1x32x128xf32> to vector<32x128xf32>
    %58 = vector.shape_cast %54 : vector<32x128xf32> to vector<1x32x128xf32>
    tpu.vector_store %arg14[%55, %c0_27, %c0_28], %58 {strides = array<i32>} : memref<8x32x128xf32, #tpu.memory_space<vmem>>, vector<1x32x128xf32>,
    %c1_i32 = arith.constant 1 : i32
    %59 = arith.truncf %54 : vector<32x128xf32> to vector<32x128xbf16>
    %cst_29 = arith.constant dense<0.000000e+00> : vector<32x384xf32>
    %60 = tpu.matmul %59, %18, %cst_29 {dimension_numbers = #tpu.dot_dimension_numbers<[1], [0], [0], [1], [0, 0, 1, 1], [], []>} : vector<32x128xbf16>, vector<128x384xbf16>, vector<32x384xf32> -> vector<32x384xf32>
    %61 = arith.index_cast %c1_i32 : i32 to index
    %c0_30 = arith.constant 0 : index
    %c0_31 = arith.constant 0 : index
    %62 = vector.load %arg13[%61, %c0_30, %c0_31] : memref<8x32x384xf32, #tpu.memory_space<vmem>>, vector<1x32x384xf32>
    %63 = vector.shape_cast %62 : vector<1x32x384xf32> to vector<32x384xf32>
    %64 = vector.extract_strided_slice %63 {offsets = [0, 0], sizes = [32, 128], strides = [1, 1]} : vector<32x384xf32> to vector<32x128xf32>
    %65 = vector.extract_strided_slice %60 {offsets = [0, 0], sizes = [32, 128], strides = [1, 1]} : vector<32x384xf32> to vector<32x128xf32>
    %66 = arith.addf %64, %65 : vector<32x128xf32>
    %67 = arith.negf %66 : vector<32x128xf32>
    %68 = math.exp %67 : vector<32x128xf32>
    %cst_32 = arith.constant 1.000000e+00 : f32
    %69 = vector.broadcast %cst_32 : f32 to vector<32x128xf32>
    %70 = arith.addf %69, %68 : vector<32x128xf32>
    %71 = arith.divf %69, %70 : vector<32x128xf32>
    %72 = vector.extract_strided_slice %63 {offsets = [0, 128], sizes = [32, 128], strides = [1, 1]} : vector<32x384xf32> to vector<32x128xf32>
    %73 = vector.extract_strided_slice %60 {offsets = [0, 128], sizes = [32, 128], strides = [1, 1]} : vector<32x384xf32> to vector<32x128xf32>
    %74 = arith.addf %72, %73 : vector<32x128xf32>
    %75 = arith.negf %74 : vector<32x128xf32>
    %76 = math.exp %75 : vector<32x128xf32>
    %cst_33 = arith.constant 1.000000e+00 : f32
    %77 = vector.broadcast %cst_33 : f32 to vector<32x128xf32>
    %78 = arith.addf %77, %76 : vector<32x128xf32>
    %79 = arith.divf %77, %78 : vector<32x128xf32>
    %80 = vector.extract_strided_slice %63 {offsets = [0, 256], sizes = [32, 128], strides = [1, 1]} : vector<32x384xf32> to vector<32x128xf32>
    %81 = vector.extract_strided_slice %60 {offsets = [0, 256], sizes = [32, 128], strides = [1, 1]} : vector<32x384xf32> to vector<32x128xf32>
    %82 = arith.addf %81, %21 : vector<32x128xf32>
    %83 = arith.mulf %71, %82 : vector<32x128xf32>
    %84 = arith.addf %80, %83 : vector<32x128xf32>
    %85 = math.tanh %84 : vector<32x128xf32>
    %cst_34 = arith.constant 1.000000e+00 : f32
    %86 = vector.broadcast %cst_34 : f32 to vector<32x128xf32>
    %87 = arith.subf %86, %79 : vector<32x128xf32>
    %88 = arith.mulf %87, %85 : vector<32x128xf32>
    %89 = arith.mulf %79, %54 : vector<32x128xf32>
    %90 = arith.addf %88, %89 : vector<32x128xf32>
    %91 = arith.index_cast %c1_i32 : i32 to index
    %c0_35 = arith.constant 0 : index
    %c0_36 = arith.constant 0 : index
    %92 = vector.load %arg14[%91, %c0_35, %c0_36] : memref<8x32x128xf32, #tpu.memory_space<vmem>>, vector<1x32x128xf32>
    %93 = vector.shape_cast %92 : vector<1x32x128xf32> to vector<32x128xf32>
    %94 = vector.shape_cast %90 : vector<32x128xf32> to vector<1x32x128xf32>
    tpu.vector_store %arg14[%91, %c0_35, %c0_36], %94 {strides = array<i32>} : memref<8x32x128xf32, #tpu.memory_space<vmem>>, vector<1x32x128xf32>,
    %c2_i32 = arith.constant 2 : i32
    %95 = arith.truncf %90 : vector<32x128xf32> to vector<32x128xbf16>
    %cst_37 = arith.constant dense<0.000000e+00> : vector<32x384xf32>
    %96 = tpu.matmul %95, %18, %cst_37 {dimension_numbers = #tpu.dot_dimension_numbers<[1], [0], [0], [1], [0, 0, 1, 1], [], []>} : vector<32x128xbf16>, vector<128x384xbf16>, vector<32x384xf32> -> vector<32x384xf32>
    %97 = arith.index_cast %c2_i32 : i32 to index
    %c0_38 = arith.constant 0 : index
    %c0_39 = arith.constant 0 : index
    %98 = vector.load %arg13[%97, %c0_38, %c0_39] : memref<8x32x384xf32, #tpu.memory_space<vmem>>, vector<1x32x384xf32>
    %99 = vector.shape_cast %98 : vector<1x32x384xf32> to vector<32x384xf32>
    %100 = vector.extract_strided_slice %99 {offsets = [0, 0], sizes = [32, 128], strides = [1, 1]} : vector<32x384xf32> to vector<32x128xf32>
    %101 = vector.extract_strided_slice %96 {offsets = [0, 0], sizes = [32, 128], strides = [1, 1]} : vector<32x384xf32> to vector<32x128xf32>
    %102 = arith.addf %100, %101 : vector<32x128xf32>
    %103 = arith.negf %102 : vector<32x128xf32>
    %104 = math.exp %103 : vector<32x128xf32>
    %cst_40 = arith.constant 1.000000e+00 : f32
    %105 = vector.broadcast %cst_40 : f32 to vector<32x128xf32>
    %106 = arith.addf %105, %104 : vector<32x128xf32>
    %107 = arith.divf %105, %106 : vector<32x128xf32>
    %108 = vector.extract_strided_slice %99 {offsets = [0, 128], sizes = [32, 128], strides = [1, 1]} : vector<32x384xf32> to vector<32x128xf32>
    %109 = vector.extract_strided_slice %96 {offsets = [0, 128], sizes = [32, 128], strides = [1, 1]} : vector<32x384xf32> to vector<32x128xf32>
    %110 = arith.addf %108, %109 : vector<32x128xf32>
    %111 = arith.negf %110 : vector<32x128xf32>
    %112 = math.exp %111 : vector<32x128xf32>
    %cst_41 = arith.constant 1.000000e+00 : f32
    %113 = vector.broadcast %cst_41 : f32 to vector<32x128xf32>
    %114 = arith.addf %113, %112 : vector<32x128xf32>
    %115 = arith.divf %113, %114 : vector<32x128xf32>
    %116 = vector.extract_strided_slice %99 {offsets = [0, 256], sizes = [32, 128], strides = [1, 1]} : vector<32x384xf32> to vector<32x128xf32>
    %117 = vector.extract_strided_slice %96 {offsets = [0, 256], sizes = [32, 128], strides = [1, 1]} : vector<32x384xf32> to vector<32x128xf32>
    %118 = arith.addf %117, %21 : vector<32x128xf32>
    %119 = arith.mulf %107, %118 : vector<32x128xf32>
    %120 = arith.addf %116, %119 : vector<32x128xf32>
    %121 = math.tanh %120 : vector<32x128xf32>
    %cst_42 = arith.constant 1.000000e+00 : f32
    %122 = vector.broadcast %cst_42 : f32 to vector<32x128xf32>
    %123 = arith.subf %122, %115 : vector<32x128xf32>
    %124 = arith.mulf %123, %121 : vector<32x128xf32>
    %125 = arith.mulf %115, %90 : vector<32x128xf32>
    %126 = arith.addf %124, %125 : vector<32x128xf32>
    %127 = arith.index_cast %c2_i32 : i32 to index
    %c0_43 = arith.constant 0 : index
    %c0_44 = arith.constant 0 : index
    %128 = vector.load %arg14[%127, %c0_43, %c0_44] : memref<8x32x128xf32, #tpu.memory_space<vmem>>, vector<1x32x128xf32>
    %129 = vector.shape_cast %128 : vector<1x32x128xf32> to vector<32x128xf32>
    %130 = vector.shape_cast %126 : vector<32x128xf32> to vector<1x32x128xf32>
    tpu.vector_store %arg14[%127, %c0_43, %c0_44], %130 {strides = array<i32>} : memref<8x32x128xf32, #tpu.memory_space<vmem>>, vector<1x32x128xf32>,
    %c3_i32 = arith.constant 3 : i32
    %131 = arith.truncf %126 : vector<32x128xf32> to vector<32x128xbf16>
    %cst_45 = arith.constant dense<0.000000e+00> : vector<32x384xf32>
    %132 = tpu.matmul %131, %18, %cst_45 {dimension_numbers = #tpu.dot_dimension_numbers<[1], [0], [0], [1], [0, 0, 1, 1], [], []>} : vector<32x128xbf16>, vector<128x384xbf16>, vector<32x384xf32> -> vector<32x384xf32>
    %133 = arith.index_cast %c3_i32 : i32 to index
    %c0_46 = arith.constant 0 : index
    %c0_47 = arith.constant 0 : index
    %134 = vector.load %arg13[%133, %c0_46, %c0_47] : memref<8x32x384xf32, #tpu.memory_space<vmem>>, vector<1x32x384xf32>
    %135 = vector.shape_cast %134 : vector<1x32x384xf32> to vector<32x384xf32>
    %136 = vector.extract_strided_slice %135 {offsets = [0, 0], sizes = [32, 128], strides = [1, 1]} : vector<32x384xf32> to vector<32x128xf32>
    %137 = vector.extract_strided_slice %132 {offsets = [0, 0], sizes = [32, 128], strides = [1, 1]} : vector<32x384xf32> to vector<32x128xf32>
    %138 = arith.addf %136, %137 : vector<32x128xf32>
    %139 = arith.negf %138 : vector<32x128xf32>
    %140 = math.exp %139 : vector<32x128xf32>
    %cst_48 = arith.constant 1.000000e+00 : f32
    %141 = vector.broadcast %cst_48 : f32 to vector<32x128xf32>
    %142 = arith.addf %141, %140 : vector<32x128xf32>
    %143 = arith.divf %141, %142 : vector<32x128xf32>
    %144 = vector.extract_strided_slice %135 {offsets = [0, 128], sizes = [32, 128], strides = [1, 1]} : vector<32x384xf32> to vector<32x128xf32>
    %145 = vector.extract_strided_slice %132 {offsets = [0, 128], sizes = [32, 128], strides = [1, 1]} : vector<32x384xf32> to vector<32x128xf32>
    %146 = arith.addf %144, %145 : vector<32x128xf32>
    %147 = arith.negf %146 : vector<32x128xf32>
    %148 = math.exp %147 : vector<32x128xf32>
    %cst_49 = arith.constant 1.000000e+00 : f32
    %149 = vector.broadcast %cst_49 : f32 to vector<32x128xf32>
    %150 = arith.addf %149, %148 : vector<32x128xf32>
    %151 = arith.divf %149, %150 : vector<32x128xf32>
    %152 = vector.extract_strided_slice %135 {offsets = [0, 256], sizes = [32, 128], strides = [1, 1]} : vector<32x384xf32> to vector<32x128xf32>
    %153 = vector.extract_strided_slice %132 {offsets = [0, 256], sizes = [32, 128], strides = [1, 1]} : vector<32x384xf32> to vector<32x128xf32>
    %154 = arith.addf %153, %21 : vector<32x128xf32>
    %155 = arith.mulf %143, %154 : vector<32x128xf32>
    %156 = arith.addf %152, %155 : vector<32x128xf32>
    %157 = math.tanh %156 : vector<32x128xf32>
    %cst_50 = arith.constant 1.000000e+00 : f32
    %158 = vector.broadcast %cst_50 : f32 to vector<32x128xf32>
    %159 = arith.subf %158, %151 : vector<32x128xf32>
    %160 = arith.mulf %159, %157 : vector<32x128xf32>
    %161 = arith.mulf %151, %126 : vector<32x128xf32>
    %162 = arith.addf %160, %161 : vector<32x128xf32>
    %163 = arith.index_cast %c3_i32 : i32 to index
    %c0_51 = arith.constant 0 : index
    %c0_52 = arith.constant 0 : index
    %164 = vector.load %arg14[%163, %c0_51, %c0_52] : memref<8x32x128xf32, #tpu.memory_space<vmem>>, vector<1x32x128xf32>
    %165 = vector.shape_cast %164 : vector<1x32x128xf32> to vector<32x128xf32>
    %166 = vector.shape_cast %162 : vector<32x128xf32> to vector<1x32x128xf32>
    tpu.vector_store %arg14[%163, %c0_51, %c0_52], %166 {strides = array<i32>} : memref<8x32x128xf32, #tpu.memory_space<vmem>>, vector<1x32x128xf32>,
    %c4_i32 = arith.constant 4 : i32
    %167 = arith.truncf %162 : vector<32x128xf32> to vector<32x128xbf16>
    %cst_53 = arith.constant dense<0.000000e+00> : vector<32x384xf32>
    %168 = tpu.matmul %167, %18, %cst_53 {dimension_numbers = #tpu.dot_dimension_numbers<[1], [0], [0], [1], [0, 0, 1, 1], [], []>} : vector<32x128xbf16>, vector<128x384xbf16>, vector<32x384xf32> -> vector<32x384xf32>
    %169 = arith.index_cast %c4_i32 : i32 to index
    %c0_54 = arith.constant 0 : index
    %c0_55 = arith.constant 0 : index
    %170 = vector.load %arg13[%169, %c0_54, %c0_55] : memref<8x32x384xf32, #tpu.memory_space<vmem>>, vector<1x32x384xf32>
    %171 = vector.shape_cast %170 : vector<1x32x384xf32> to vector<32x384xf32>
    %172 = vector.extract_strided_slice %171 {offsets = [0, 0], sizes = [32, 128], strides = [1, 1]} : vector<32x384xf32> to vector<32x128xf32>
    %173 = vector.extract_strided_slice %168 {offsets = [0, 0], sizes = [32, 128], strides = [1, 1]} : vector<32x384xf32> to vector<32x128xf32>
    %174 = arith.addf %172, %173 : vector<32x128xf32>
    %175 = arith.negf %174 : vector<32x128xf32>
    %176 = math.exp %175 : vector<32x128xf32>
    %cst_56 = arith.constant 1.000000e+00 : f32
    %177 = vector.broadcast %cst_56 : f32 to vector<32x128xf32>
    %178 = arith.addf %177, %176 : vector<32x128xf32>
    %179 = arith.divf %177, %178 : vector<32x128xf32>
    %180 = vector.extract_strided_slice %171 {offsets = [0, 128], sizes = [32, 128], strides = [1, 1]} : vector<32x384xf32> to vector<32x128xf32>
    %181 = vector.extract_strided_slice %168 {offsets = [0, 128], sizes = [32, 128], strides = [1, 1]} : vector<32x384xf32> to vector<32x128xf32>
    %182 = arith.addf %180, %181 : vector<32x128xf32>
    %183 = arith.negf %182 : vector<32x128xf32>
    %184 = math.exp %183 : vector<32x128xf32>
    %cst_57 = arith.constant 1.000000e+00 : f32
    %185 = vector.broadcast %cst_57 : f32 to vector<32x128xf32>
    %186 = arith.addf %185, %184 : vector<32x128xf32>
    %187 = arith.divf %185, %186 : vector<32x128xf32>
    %188 = vector.extract_strided_slice %171 {offsets = [0, 256], sizes = [32, 128], strides = [1, 1]} : vector<32x384xf32> to vector<32x128xf32>
    %189 = vector.extract_strided_slice %168 {offsets = [0, 256], sizes = [32, 128], strides = [1, 1]} : vector<32x384xf32> to vector<32x128xf32>
    %190 = arith.addf %189, %21 : vector<32x128xf32>
    %191 = arith.mulf %179, %190 : vector<32x128xf32>
    %192 = arith.addf %188, %191 : vector<32x128xf32>
    %193 = math.tanh %192 : vector<32x128xf32>
    %cst_58 = arith.constant 1.000000e+00 : f32
    %194 = vector.broadcast %cst_58 : f32 to vector<32x128xf32>
    %195 = arith.subf %194, %187 : vector<32x128xf32>
    %196 = arith.mulf %195, %193 : vector<32x128xf32>
    %197 = arith.mulf %187, %162 : vector<32x128xf32>
    %198 = arith.addf %196, %197 : vector<32x128xf32>
    %199 = arith.index_cast %c4_i32 : i32 to index
    %c0_59 = arith.constant 0 : index
    %c0_60 = arith.constant 0 : index
    %200 = vector.load %arg14[%199, %c0_59, %c0_60] : memref<8x32x128xf32, #tpu.memory_space<vmem>>, vector<1x32x128xf32>
    %201 = vector.shape_cast %200 : vector<1x32x128xf32> to vector<32x128xf32>
    %202 = vector.shape_cast %198 : vector<32x128xf32> to vector<1x32x128xf32>
    tpu.vector_store %arg14[%199, %c0_59, %c0_60], %202 {strides = array<i32>} : memref<8x32x128xf32, #tpu.memory_space<vmem>>, vector<1x32x128xf32>,
    %c5_i32 = arith.constant 5 : i32
    %203 = arith.truncf %198 : vector<32x128xf32> to vector<32x128xbf16>
    %cst_61 = arith.constant dense<0.000000e+00> : vector<32x384xf32>
    %204 = tpu.matmul %203, %18, %cst_61 {dimension_numbers = #tpu.dot_dimension_numbers<[1], [0], [0], [1], [0, 0, 1, 1], [], []>} : vector<32x128xbf16>, vector<128x384xbf16>, vector<32x384xf32> -> vector<32x384xf32>
    %205 = arith.index_cast %c5_i32 : i32 to index
    %c0_62 = arith.constant 0 : index
    %c0_63 = arith.constant 0 : index
    %206 = vector.load %arg13[%205, %c0_62, %c0_63] : memref<8x32x384xf32, #tpu.memory_space<vmem>>, vector<1x32x384xf32>
    %207 = vector.shape_cast %206 : vector<1x32x384xf32> to vector<32x384xf32>
    %208 = vector.extract_strided_slice %207 {offsets = [0, 0], sizes = [32, 128], strides = [1, 1]} : vector<32x384xf32> to vector<32x128xf32>
    %209 = vector.extract_strided_slice %204 {offsets = [0, 0], sizes = [32, 128], strides = [1, 1]} : vector<32x384xf32> to vector<32x128xf32>
    %210 = arith.addf %208, %209 : vector<32x128xf32>
    %211 = arith.negf %210 : vector<32x128xf32>
    %212 = math.exp %211 : vector<32x128xf32>
    %cst_64 = arith.constant 1.000000e+00 : f32
    %213 = vector.broadcast %cst_64 : f32 to vector<32x128xf32>
    %214 = arith.addf %213, %212 : vector<32x128xf32>
    %215 = arith.divf %213, %214 : vector<32x128xf32>
    %216 = vector.extract_strided_slice %207 {offsets = [0, 128], sizes = [32, 128], strides = [1, 1]} : vector<32x384xf32> to vector<32x128xf32>
    %217 = vector.extract_strided_slice %204 {offsets = [0, 128], sizes = [32, 128], strides = [1, 1]} : vector<32x384xf32> to vector<32x128xf32>
    %218 = arith.addf %216, %217 : vector<32x128xf32>
    %219 = arith.negf %218 : vector<32x128xf32>
    %220 = math.exp %219 : vector<32x128xf32>
    %cst_65 = arith.constant 1.000000e+00 : f32
    %221 = vector.broadcast %cst_65 : f32 to vector<32x128xf32>
    %222 = arith.addf %221, %220 : vector<32x128xf32>
    %223 = arith.divf %221, %222 : vector<32x128xf32>
    %224 = vector.extract_strided_slice %207 {offsets = [0, 256], sizes = [32, 128], strides = [1, 1]} : vector<32x384xf32> to vector<32x128xf32>
    %225 = vector.extract_strided_slice %204 {offsets = [0, 256], sizes = [32, 128], strides = [1, 1]} : vector<32x384xf32> to vector<32x128xf32>
    %226 = arith.addf %225, %21 : vector<32x128xf32>
    %227 = arith.mulf %215, %226 : vector<32x128xf32>
    %228 = arith.addf %224, %227 : vector<32x128xf32>
    %229 = math.tanh %228 : vector<32x128xf32>
    %cst_66 = arith.constant 1.000000e+00 : f32
    %230 = vector.broadcast %cst_66 : f32 to vector<32x128xf32>
    %231 = arith.subf %230, %223 : vector<32x128xf32>
    %232 = arith.mulf %231, %229 : vector<32x128xf32>
    %233 = arith.mulf %223, %198 : vector<32x128xf32>
    %234 = arith.addf %232, %233 : vector<32x128xf32>
    %235 = arith.index_cast %c5_i32 : i32 to index
    %c0_67 = arith.constant 0 : index
    %c0_68 = arith.constant 0 : index
    %236 = vector.load %arg14[%235, %c0_67, %c0_68] : memref<8x32x128xf32, #tpu.memory_space<vmem>>, vector<1x32x128xf32>
    %237 = vector.shape_cast %236 : vector<1x32x128xf32> to vector<32x128xf32>
    %238 = vector.shape_cast %234 : vector<32x128xf32> to vector<1x32x128xf32>
    tpu.vector_store %arg14[%235, %c0_67, %c0_68], %238 {strides = array<i32>} : memref<8x32x128xf32, #tpu.memory_space<vmem>>, vector<1x32x128xf32>,
    %c6_i32 = arith.constant 6 : i32
    %239 = arith.truncf %234 : vector<32x128xf32> to vector<32x128xbf16>
    %cst_69 = arith.constant dense<0.000000e+00> : vector<32x384xf32>
    %240 = tpu.matmul %239, %18, %cst_69 {dimension_numbers = #tpu.dot_dimension_numbers<[1], [0], [0], [1], [0, 0, 1, 1], [], []>} : vector<32x128xbf16>, vector<128x384xbf16>, vector<32x384xf32> -> vector<32x384xf32>
    %241 = arith.index_cast %c6_i32 : i32 to index
    %c0_70 = arith.constant 0 : index
    %c0_71 = arith.constant 0 : index
    %242 = vector.load %arg13[%241, %c0_70, %c0_71] : memref<8x32x384xf32, #tpu.memory_space<vmem>>, vector<1x32x384xf32>
    %243 = vector.shape_cast %242 : vector<1x32x384xf32> to vector<32x384xf32>
    %244 = vector.extract_strided_slice %243 {offsets = [0, 0], sizes = [32, 128], strides = [1, 1]} : vector<32x384xf32> to vector<32x128xf32>
    %245 = vector.extract_strided_slice %240 {offsets = [0, 0], sizes = [32, 128], strides = [1, 1]} : vector<32x384xf32> to vector<32x128xf32>
    %246 = arith.addf %244, %245 : vector<32x128xf32>
    %247 = arith.negf %246 : vector<32x128xf32>
    %248 = math.exp %247 : vector<32x128xf32>
    %cst_72 = arith.constant 1.000000e+00 : f32
    %249 = vector.broadcast %cst_72 : f32 to vector<32x128xf32>
    %250 = arith.addf %249, %248 : vector<32x128xf32>
    %251 = arith.divf %249, %250 : vector<32x128xf32>
    %252 = vector.extract_strided_slice %243 {offsets = [0, 128], sizes = [32, 128], strides = [1, 1]} : vector<32x384xf32> to vector<32x128xf32>
    %253 = vector.extract_strided_slice %240 {offsets = [0, 128], sizes = [32, 128], strides = [1, 1]} : vector<32x384xf32> to vector<32x128xf32>
    %254 = arith.addf %252, %253 : vector<32x128xf32>
    %255 = arith.negf %254 : vector<32x128xf32>
    %256 = math.exp %255 : vector<32x128xf32>
    %cst_73 = arith.constant 1.000000e+00 : f32
    %257 = vector.broadcast %cst_73 : f32 to vector<32x128xf32>
    %258 = arith.addf %257, %256 : vector<32x128xf32>
    %259 = arith.divf %257, %258 : vector<32x128xf32>
    %260 = vector.extract_strided_slice %243 {offsets = [0, 256], sizes = [32, 128], strides = [1, 1]} : vector<32x384xf32> to vector<32x128xf32>
    %261 = vector.extract_strided_slice %240 {offsets = [0, 256], sizes = [32, 128], strides = [1, 1]} : vector<32x384xf32> to vector<32x128xf32>
    %262 = arith.addf %261, %21 : vector<32x128xf32>
    %263 = arith.mulf %251, %262 : vector<32x128xf32>
    %264 = arith.addf %260, %263 : vector<32x128xf32>
    %265 = math.tanh %264 : vector<32x128xf32>
    %cst_74 = arith.constant 1.000000e+00 : f32
    %266 = vector.broadcast %cst_74 : f32 to vector<32x128xf32>
    %267 = arith.subf %266, %259 : vector<32x128xf32>
    %268 = arith.mulf %267, %265 : vector<32x128xf32>
    %269 = arith.mulf %259, %234 : vector<32x128xf32>
    %270 = arith.addf %268, %269 : vector<32x128xf32>
    %271 = arith.index_cast %c6_i32 : i32 to index
    %c0_75 = arith.constant 0 : index
    %c0_76 = arith.constant 0 : index
    %272 = vector.load %arg14[%271, %c0_75, %c0_76] : memref<8x32x128xf32, #tpu.memory_space<vmem>>, vector<1x32x128xf32>
    %273 = vector.shape_cast %272 : vector<1x32x128xf32> to vector<32x128xf32>
    %274 = vector.shape_cast %270 : vector<32x128xf32> to vector<1x32x128xf32>
    tpu.vector_store %arg14[%271, %c0_75, %c0_76], %274 {strides = array<i32>} : memref<8x32x128xf32, #tpu.memory_space<vmem>>, vector<1x32x128xf32>,
    %c7_i32 = arith.constant 7 : i32
    %275 = arith.truncf %270 : vector<32x128xf32> to vector<32x128xbf16>
    %cst_77 = arith.constant dense<0.000000e+00> : vector<32x384xf32>
    %276 = tpu.matmul %275, %18, %cst_77 {dimension_numbers = #tpu.dot_dimension_numbers<[1], [0], [0], [1], [0, 0, 1, 1], [], []>} : vector<32x128xbf16>, vector<128x384xbf16>, vector<32x384xf32> -> vector<32x384xf32>
    %277 = arith.index_cast %c7_i32 : i32 to index
    %c0_78 = arith.constant 0 : index
    %c0_79 = arith.constant 0 : index
    %278 = vector.load %arg13[%277, %c0_78, %c0_79] : memref<8x32x384xf32, #tpu.memory_space<vmem>>, vector<1x32x384xf32>
    %279 = vector.shape_cast %278 : vector<1x32x384xf32> to vector<32x384xf32>
    %280 = vector.extract_strided_slice %279 {offsets = [0, 0], sizes = [32, 128], strides = [1, 1]} : vector<32x384xf32> to vector<32x128xf32>
    %281 = vector.extract_strided_slice %276 {offsets = [0, 0], sizes = [32, 128], strides = [1, 1]} : vector<32x384xf32> to vector<32x128xf32>
    %282 = arith.addf %280, %281 : vector<32x128xf32>
    %283 = arith.negf %282 : vector<32x128xf32>
    %284 = math.exp %283 : vector<32x128xf32>
    %cst_80 = arith.constant 1.000000e+00 : f32
    %285 = vector.broadcast %cst_80 : f32 to vector<32x128xf32>
    %286 = arith.addf %285, %284 : vector<32x128xf32>
    %287 = arith.divf %285, %286 : vector<32x128xf32>
    %288 = vector.extract_strided_slice %279 {offsets = [0, 128], sizes = [32, 128], strides = [1, 1]} : vector<32x384xf32> to vector<32x128xf32>
    %289 = vector.extract_strided_slice %276 {offsets = [0, 128], sizes = [32, 128], strides = [1, 1]} : vector<32x384xf32> to vector<32x128xf32>
    %290 = arith.addf %288, %289 : vector<32x128xf32>
    %291 = arith.negf %290 : vector<32x128xf32>
    %292 = math.exp %291 : vector<32x128xf32>
    %cst_81 = arith.constant 1.000000e+00 : f32
    %293 = vector.broadcast %cst_81 : f32 to vector<32x128xf32>
    %294 = arith.addf %293, %292 : vector<32x128xf32>
    %295 = arith.divf %293, %294 : vector<32x128xf32>
    %296 = vector.extract_strided_slice %279 {offsets = [0, 256], sizes = [32, 128], strides = [1, 1]} : vector<32x384xf32> to vector<32x128xf32>
    %297 = vector.extract_strided_slice %276 {offsets = [0, 256], sizes = [32, 128], strides = [1, 1]} : vector<32x384xf32> to vector<32x128xf32>
    %298 = arith.addf %297, %21 : vector<32x128xf32>
    %299 = arith.mulf %287, %298 : vector<32x128xf32>
    %300 = arith.addf %296, %299 : vector<32x128xf32>
    %301 = math.tanh %300 : vector<32x128xf32>
    %cst_82 = arith.constant 1.000000e+00 : f32
    %302 = vector.broadcast %cst_82 : f32 to vector<32x128xf32>
    %303 = arith.subf %302, %295 : vector<32x128xf32>
    %304 = arith.mulf %303, %301 : vector<32x128xf32>
    %305 = arith.mulf %295, %270 : vector<32x128xf32>
    %306 = arith.addf %304, %305 : vector<32x128xf32>
    %307 = arith.index_cast %c7_i32 : i32 to index
    %c0_83 = arith.constant 0 : index
    %c0_84 = arith.constant 0 : index
    %308 = vector.load %arg14[%307, %c0_83, %c0_84] : memref<8x32x128xf32, #tpu.memory_space<vmem>>, vector<1x32x128xf32>
    %309 = vector.shape_cast %308 : vector<1x32x128xf32> to vector<32x128xf32>
    %310 = vector.shape_cast %306 : vector<32x128xf32> to vector<1x32x128xf32>
    tpu.vector_store %arg14[%307, %c0_83, %c0_84], %310 {strides = array<i32>} : memref<8x32x128xf32, #tpu.memory_space<vmem>>, vector<1x32x128xf32>,
    %c8_i32 = arith.constant 8 : i32
    %c0_85 = arith.constant 0 : index
    %c0_86 = arith.constant 0 : index
    %311 = vector.load %arg12[%c0_85, %c0_86] : memref<32x128xf32, #tpu.memory_space<vmem>>, vector<32x128xf32>
    tpu.vector_store %arg12[%c0_85, %c0_86], %306 {strides = array<i32>} : memref<32x128xf32, #tpu.memory_space<vmem>>, vector<32x128xf32>,
    %c0_87 = arith.constant 0 : index
    %c0_88 = arith.constant 0 : index
    %c0_89 = arith.constant 0 : index
    %312 = vector.load %arg14[%c0_87, %c0_88, %c0_89] : memref<8x32x128xf32, #tpu.memory_space<vmem>>, vector<8x32x128xf32>
    %313 = vector.shape_cast %312 : vector<8x32x128xf32> to vector<256x128xf32>
    %314 = arith.truncf %313 : vector<256x128xf32> to vector<256x128xbf16>
    %c0_90 = arith.constant 0 : index
    %c0_91 = arith.constant 0 : index
    %315 = vector.load %arg9[%c0_90, %c0_91] : memref<128x128xbf16, #tpu.memory_space<vmem>>, vector<128x128xbf16>
    %cst_92 = arith.constant dense<0.000000e+00> : vector<256x128xf32>
    %316 = tpu.matmul %314, %315, %cst_92 {dimension_numbers = #tpu.dot_dimension_numbers<[1], [0], [0], [1], [0, 0, 1, 1], [], []>} : vector<256x128xbf16>, vector<128x128xbf16>, vector<256x128xf32> -> vector<256x128xf32>
    %c0_93 = arith.constant 0 : index
    %c0_94 = arith.constant 0 : index
    %317 = vector.load %arg10[%c0_93, %c0_94] : memref<1x128xf32, #tpu.memory_space<vmem>>, vector<1x128xf32>
    %318 = vector.broadcast %317 : vector<1x128xf32> to vector<256x128xf32>
    %319 = arith.addf %316, %318 : vector<256x128xf32>
    %320 = vector.shape_cast %319 : vector<256x128xf32> to vector<8x32x128xf32>
    %c0_95 = arith.constant 0 : index
    %c0_96 = arith.constant 0 : index
    %c0_97 = arith.constant 0 : index
    %321 = vector.load %arg11[%c0_95, %c0_96, %c0_97] : memref<8x32x128xf32, #tpu.memory_space<vmem>>, vector<8x32x128xf32>
    tpu.vector_store %arg11[%c0_95, %c0_96, %c0_97], %320 {strides = array<i32>} : memref<8x32x128xf32, #tpu.memory_space<vmem>>, vector<8x32x128xf32>,
    return
  }
  func.func @transform_0(%arg0: i32) -> (i32, i32, i32) {
    %c0_i32 = arith.constant 0 : i32
    %c0_i32_0 = arith.constant 0 : i32
    %c0_i32_1 = arith.constant 0 : i32
    return %c0_i32, %arg0, %c0_i32_0 : i32, i32, i32
  }
  func.func @transform_1(%arg0: i32) -> (i32, i32) {
    %c0_i32 = arith.constant 0 : i32
    %c0_i32_0 = arith.constant 0 : i32
    return %arg0, %c0_i32 : i32, i32
  }
  func.func @transform_2(%arg0: i32) -> (i32, i32) {
    %c0_i32 = arith.constant 0 : i32
    %c0_i32_0 = arith.constant 0 : i32
    %c0_i32_1 = arith.constant 0 : i32
    return %c0_i32, %c0_i32_0 : i32, i32
  }
  func.func @transform_3(%arg0: i32) -> (i32, i32) {
    %c0_i32 = arith.constant 0 : i32
    %c0_i32_0 = arith.constant 0 : i32
    %c0_i32_1 = arith.constant 0 : i32
    return %c0_i32, %c0_i32_0 : i32, i32
  }
  func.func @transform_4(%arg0: i32) -> (i32, i32) {
    %c0_i32 = arith.constant 0 : i32
    %c0_i32_0 = arith.constant 0 : i32
    %c0_i32_1 = arith.constant 0 : i32
    return %c0_i32, %c0_i32_0 : i32, i32
  }
  func.func @transform_5(%arg0: i32) -> (i32, i32) {
    %c0_i32 = arith.constant 0 : i32
    %c0_i32_0 = arith.constant 0 : i32
    %c0_i32_1 = arith.constant 0 : i32
    return %c0_i32, %c0_i32_0 : i32, i32
  }
  func.func @transform_6(%arg0: i32) -> (i32, i32) {
    %c0_i32 = arith.constant 0 : i32
    %c0_i32_0 = arith.constant 0 : i32
    %c0_i32_1 = arith.constant 0 : i32
    return %c0_i32, %c0_i32_0 : i32, i32
  }
  func.func @transform_7(%arg0: i32) -> (i32, i32) {
    %c0_i32 = arith.constant 0 : i32
    %c0_i32_0 = arith.constant 0 : i32
    %c0_i32_1 = arith.constant 0 : i32
    return %c0_i32, %c0_i32_0 : i32, i32
  }
  func.func @transform_8(%arg0: i32) -> (i32, i32) {
    %c0_i32 = arith.constant 0 : i32
    %c0_i32_0 = arith.constant 0 : i32
    %c0_i32_1 = arith.constant 0 : i32
    return %c0_i32, %c0_i32_0 : i32, i32
  }
  func.func @transform_9(%arg0: i32) -> (i32, i32) {
    %c0_i32 = arith.constant 0 : i32
    %c0_i32_0 = arith.constant 0 : i32
    %c0_i32_1 = arith.constant 0 : i32
    return %c0_i32, %c0_i32_0 : i32, i32
  }
  func.func @transform_10(%arg0: i32) -> (i32, i32, i32) {
    %c0_i32 = arith.constant 0 : i32
    %c0_i32_0 = arith.constant 0 : i32
    %c0_i32_1 = arith.constant 0 : i32
    return %c0_i32, %arg0, %c0_i32_0 : i32, i32, i32
  }
  func.func @transform_11(%arg0: i32) -> (i32, i32) {
    %c0_i32 = arith.constant 0 : i32
    %c0_i32_0 = arith.constant 0 : i32
    return %arg0, %c0_i32 : i32, i32
  }
}

</mosaic_0001>

<bundles_post_ra>
// kernel: tpu_custom_call.1
= control target key start
LH: loop header
LB: loop body
LE: loop exit
PB: predicated region body
PF: predicated region fallthrough
CT: control target
= control target key end

     0   :  { %17 = vsyncpa [#allocation5], 0  ;;  %s5803_s0 = inlined_call_operand.hbm [shape: f32[8,32,128], index: 0, kind: input, shape index: {}]   ;;  %s5804_s1 = inlined_call_operand.hbm [shape: f32[32,128], index: 1, kind: input, shape index: {}]   ;;  %s5805_s2 = inlined_call_operand.hbm [shape: bf16[128,128], index: 2, kind: input, shape index: {}]   ;;  %s5806_s3 = inlined_call_operand.vmem [shape: f32[1,128], index: 3, kind: input, shape index: {}]   ;;  %s5807_s4 = inlined_call_operand.hbm [shape: bf16[128,384], index: 4, kind: input, shape index: {}]   ;;  %s5808_s5 = inlined_call_operand.vmem [shape: f32[1,384], index: 5, kind: input, shape index: {}]   ;;  %s5809_s6 = inlined_call_operand.hbm [shape: bf16[128,384], index: 6, kind: input, shape index: {}]   ;;  %s5810_s7 = inlined_call_operand.vmem [shape: f32[1,128], index: 7, kind: input, shape index: {}]   ;;  %s5811_s8 = inlined_call_operand.hbm [shape: bf16[128,128], index: 8, kind: input, shape index: {}]   ;;  %s5812_s9 = inlined_call_operand.vmem [shape: f32[1,128], index: 9, kind: input, shape index: {}]   ;;  %s5813_s10 = inlined_call_operand.hbm [shape: f32[8,32,128], index: 10, kind: output, shape index: {0}]   ;;  %s5814_s11 = inlined_call_operand.hbm [shape: f32[32,128], index: 11, kind: output, shape index: {1}]  }
   0x1   :  { %18 = vsyncpa [#allocation8], 0 }
   0x2   :  { %19 = vsyncpa [#allocation11], 0 }
   0x3   :  { %20 = vsyncpa [#allocation14], 0 }
   0x4   :  { %21 = vsyncpa [#allocation6], 0 }
   0x5   :  { %22 = vsyncpa [#allocation17], 0  ;;  %s4647_s17 = smov [#allocation7]   ;;  %s4648_s19 = smov [#allocation10]  }
   0x6   :  { %s40_s18 = sshll.u32 %s4647_s17, 4  ;;  %s66_s20 = sshll.u32 %s4648_s19, 4  ;;  %s41_s18 = int_to_ptr.vmem [resolvable:$true] %s40_s18  ;;  %s4722_s20 = int_to_ptr.vmem [resolvable:$true] %s66_s20 }
   0x7   :  { %s4459_s23 = scalar_lea.hbm %s5804_s1, 512 }
   0x8   :  { %p4460_p0 = scmp.ne.s32.totalorder %s5804_s1, %s4459_s23  ;;  %p4463_p1 = scmp.lt.u32.totalorder %s4459_s23, %s5804_s1 }
   0xa   :  { %p4465_p2 = pnand %p4463_p1, %p4460_p0 }
   0xc   :  { %4468 = shalt.err (!%p4465_p2)
}
   0xd   :  { %s4469_s28 = scalar_lea.vmem %s41_s18, 512  ;;  %p4474_p4 = scmp.lt.s32.totalorder %s41_s18, %s41_s18 }
   0xe   :  { %p4470_p3 = scmp.ne.s32.totalorder %s41_s18, %s4469_s28  ;;  %p4475_p5 = scmp.lt.s32.totalorder %s4469_s28, %s4469_s28 }
  0x10   :  { %p4476_p6 = por %p4475_p5, %p4474_p4 }
  0x12   :  { %p4477_p7 = pnand %p4476_p6, %p4470_p3 }
  0x14   :  { %4480 = shalt.err (!%p4477_p7)
}
  0x15   :  { %s4649_s29 = smov 128   ;;  %s4650_s30 = smov 8  }
  0x16   :  { %46 = dma.hbm_to_vmem [thread:$0]  %s5804_s1, 512, %s41_s18, [#allocation8], %s4649_s29, %s4649_s29, %s4650_s30  }
  0x17   :  { %s4481_s16 = scalar_lea.hbm %s5807_s4, 3072 }
  0x18   :  { %p4482_p8 = scmp.ne.s32.totalorder %s5807_s4, %s4481_s16  ;;  %p4485_p9 = scmp.lt.u32.totalorder %s4481_s16, %s5807_s4 }
  0x1a   :  { %p4487_p10 = pnand %p4485_p9, %p4482_p8 }
  0x1c   :  { %4490 = shalt.err (!%p4487_p10)
}
  0x1d   :  { %s4491_s23 = scalar_lea.vmem %s4722_s20, 3072  ;;  %p4496_p12 = scmp.lt.s32.totalorder %s4722_s20, %s4722_s20 }
  0x1e   :  { %p4492_p11 = scmp.ne.s32.totalorder %s4722_s20, %s4491_s23  ;;  %p4497_p13 = scmp.lt.s32.totalorder %s4491_s23, %s4491_s23 }
  0x20   :  { %p4498_p0 = por %p4497_p13, %p4496_p12 }
  0x22   :  { %p4499_p1 = pnand %p4498_p0, %p4492_p11 }
  0x24   :  { %4502 = shalt.err (!%p4499_p1)
}
  0x25   :  { %s4651_s1 = smov 192   ;;  %s4652_s18 = smov 12  }
  0x26   :  { %72 = dma.hbm_to_vmem [thread:$0]  %s5807_s4, 3072, %s4722_s20, [#allocation11], %s4651_s1, %s4651_s1, %s4652_s18  }
  0x27   :  { %s4653_s26 = smov [#allocation4]   ;;  %s4654_s28 = smov [#allocation9]  }
  0x28   :  { %s28_s27 = sshll.u32 %s4653_s26, 4  ;;  %s52_s12 = sshll.u32 %s4654_s28, 4  ;;  %s29_s27 = int_to_ptr.vmem [resolvable:$true] %s28_s27  ;;  %s4759_s12 = int_to_ptr.vmem [resolvable:$true] %s52_s12 }
  0x29   :  { %s4503_s15 = scalar_lea.hbm %s5803_s0, 4096 }
  0x2a   :  { %p4504_p2 = scmp.ne.s32.totalorder %s5803_s0, %s4503_s15  ;;  %p4507_p3 = scmp.lt.u32.totalorder %s4503_s15, %s5803_s0 }
  0x2c   :  { %p4509_p4 = pnand %p4507_p3, %p4504_p2 }
  0x2e   :  { %4512 = shalt.err (!%p4509_p4)
}
  0x2f   :  { %s4513_s4 = scalar_lea.vmem %s29_s27, 4096  ;;  %p4518_p6 = scmp.lt.s32.totalorder %s29_s27, %s29_s27 }
  0x30   :  { %p4514_p5 = scmp.ne.s32.totalorder %s29_s27, %s4513_s4  ;;  %p4519_p7 = scmp.lt.s32.totalorder %s4513_s4, %s4513_s4 }
  0x32   :  { %p4520_p8 = por %p4519_p7, %p4518_p6 }
  0x34   :  { %p4521_p9 = pnand %p4520_p8, %p4514_p5 }
  0x36   :  { %4524 = shalt.err (!%p4521_p9)
}
  0x37   :  { %34 = dma.hbm_to_vmem [thread:$0]  %s5803_s0, 4096, %s29_s27, [#allocation5], %s4649_s29, %s4649_s29, %s4650_s30  }
  0x38   :  { %s4525_s25 = scalar_lea.hbm %s5805_s2, 1024 }
  0x39   :  { %p4526_p10 = scmp.ne.s32.totalorder %s5805_s2, %s4525_s25  ;;  %p4529_p11 = scmp.lt.u32.totalorder %s4525_s25, %s5805_s2 }
  0x3b   :  { %p4531_p12 = pnand %p4529_p11, %p4526_p10 }
  0x3d   :  { %4534 = shalt.err (!%p4531_p12)
}
  0x3e   :  { %s4535_s15 = scalar_lea.vmem %s4759_s12, 1024  ;;  %p4540_p0 = scmp.lt.s32.totalorder %s4759_s12, %s4759_s12 }
  0x3f   :  { %p4536_p13 = scmp.ne.s32.totalorder %s4759_s12, %s4535_s15  ;;  %p4541_p1 = scmp.lt.s32.totalorder %s4535_s15, %s4535_s15 }
  0x41   :  { %p4542_p2 = por %p4541_p1, %p4540_p0 }
  0x43   :  { %p4543_p3 = pnand %p4542_p2, %p4536_p13 }
  0x45   :  { %4546 = shalt.err (!%p4543_p3)
}
  0x46   :  { %s4655_s0 = smov 64   ;;  %s4656_s27 = smov 4  }
  0x47   :  { %58 = dma.hbm_to_vmem [thread:$0]  %s5805_s2, 1024, %s4759_s12, [#allocation8], %s4655_s0, %s4655_s0, %s4656_s27  }
  0x48   :  { %s4657_s19 = smov [#allocation12]   ;;  %s4658_s4 = smov [#allocation13]  }
  0x49   :  { %s80_s21 = sshll.u32 %s4657_s19, 4  ;;  %s94_s20 = sshll.u32 %s4658_s4, 4  ;;  %s81_s21 = int_to_ptr.vmem [resolvable:$true] %s80_s21  ;;  %s4796_s20 = int_to_ptr.vmem [resolvable:$true] %s94_s20 }
  0x4a   :  { %s4547_s24 = scalar_lea.hbm %s5809_s6, 3072 }
  0x4b   :  { %p4548_p4 = scmp.ne.s32.totalorder %s5809_s6, %s4547_s24  ;;  %p4551_p5 = scmp.lt.u32.totalorder %s4547_s24, %s5809_s6 }
  0x4d   :  { %p4553_p6 = pnand %p4551_p5, %p4548_p4 }
  0x4f   :  { %4556 = shalt.err (!%p4553_p6)
}
  0x50   :  { %s4557_s2 = scalar_lea.vmem %s81_s21, 3072  ;;  %p4562_p8 = scmp.lt.s32.totalorder %s81_s21, %s81_s21 }
  0x51   :  { %p4558_p7 = scmp.ne.s32.totalorder %s81_s21, %s4557_s2  ;;  %p4563_p9 = scmp.lt.s32.totalorder %s4557_s2, %s4557_s2 }
  0x53   :  { %p4564_p10 = por %p4563_p9, %p4562_p8 }
  0x55   :  { %p4565_p11 = pnand %p4564_p10, %p4558_p7 }
  0x57   :  { %4568 = shalt.err (!%p4565_p11)
}
  0x58   :  { %86 = dma.hbm_to_vmem [thread:$0]  %s5809_s6, 3072, %s81_s21, [#allocation11], %s4651_s1, %s4651_s1, %s4652_s18  }
  0x59   :  { %s4569_s17 = scalar_lea.hbm %s5811_s8, 1024 }
  0x5a   :  { %p4570_p12 = scmp.ne.s32.totalorder %s5811_s8, %s4569_s17  ;;  %p4573_p13 = scmp.lt.u32.totalorder %s4569_s17, %s5811_s8 }
  0x5c   :  { %p4575_p0 = pnand %p4573_p13, %p4570_p12 }
  0x5e   :  { %4578 = shalt.err (!%p4575_p0)
}
  0x5f   :  { %s4579_s24 = scalar_lea.vmem %s4796_s20, 1024  ;;  %p4584_p2 = scmp.lt.s32.totalorder %s4796_s20, %s4796_s20 }
  0x60   :  { %p4580_p1 = scmp.ne.s32.totalorder %s4796_s20, %s4579_s24  ;;  %p4585_p3 = scmp.lt.s32.totalorder %s4579_s24, %s4579_s24 }
  0x62   :  { %p4586_p4 = por %p4585_p3, %p4584_p2 }
  0x64   :  { %p4587_p5 = pnand %p4586_p4, %p4580_p1 }
  0x66   :  { %4590 = shalt.err (!%p4587_p5)
}
  0x67   :  { %100 = dma.hbm_to_vmem [thread:$0]  %s5811_s8, 1024, %s4796_s20, [#allocation14], %s4655_s0, %s4655_s0, %s4656_s27  }
  0x68   :  { %4635 = dma.done.wait [#allocation5], 4096  }
  0x69   :  { %4636 = vsyncadd [#allocation5], 4294963200 }
  0x6a   :  { %4637 = dma.done.wait [#allocation8], 1536  }
  0x6b   :  { %4638 = vsyncadd [#allocation8], 4294965760 }
  0x6c   :  { %4639 = dma.done.wait [#allocation11], 6144  }
  0x6d   :  { %4640 = vsyncadd [#allocation11], 4294961152 }
  0x6e   :  { %4641 = dma.done.wait [#allocation14], 1024  }
  0x6f   :  { %4642 = vsyncadd [#allocation14], 4294966272  ;;  %v4024_v0 = vld [vmem:[#allocation9] sm:$0xff]   ;;  %v4025_v1 = vld [vmem:[#allocation9 + $0x8] sm:$0xff]  }
  0x70   :  { %3561 = vmatprep.subr.bf16.mxu0 %v4024_v0  ;;  %3865 = vmatprep.subr.bf16.mxu1 %v4024_v0  ;;  %v4026_v2 = vld [vmem:[#allocation9 + $0x10] sm:$0xff]   ;;  %v4027_v3 = vld [vmem:[#allocation9 + $0x18] sm:$0xff]   ;;  %v122_v4 = vld [vmem:[#allocation4] sm:$0xff] }
  0x71   :  { %3562 = vmatpush3.bf16.msra.mxu0 %v4024_v0  ;;  %3873 = vmatpush3.bf16.msra.mxu1 %v4024_v0  ;;  %v123_v5 = vld [vmem:[#allocation4 + $0x8] sm:$0xff]  ;;  %v4028_v7 = vld [vmem:[#allocation9 + $0x20] sm:$0xff]   ;;  %v4030_v12 = vld [vmem:[#allocation9 + $0x30] sm:$0xff]  }
  0x72   :  { %3563 = vmatprep.subr.bf16.mxu0 %v4025_v1  ;;  %3866 = vmatprep.subr.bf16.mxu1 %v4025_v1  ;;  %v154_v6 = vpack.c.bf16 %v123_v5, %v122_v4  ;;  %v138_v8 = vld [vmem:[#allocation4 + $0x80] sm:$0xff]  ;;  %v139_v9 = vld [vmem:[#allocation4 + $0x88] sm:$0xff]  ;;  %v4031_v13 = vld [vmem:[#allocation9 + $0x38] sm:$0xff]  }
  0x73   :  { %v162_v10 = vpack.c.bf16 %v139_v9, %v138_v8  ;;  %v4029_v11 = vld [vmem:[#allocation9 + $0x28] sm:$0xff]   ;;  %v124_v14 = vld [vmem:[#allocation4 + $0x10] sm:$0xff]  ;;  %v125_v15 = vld [vmem:[#allocation4 + $0x18] sm:$0xff] }
  0x74   :  { %3577 = vmatprep.mubr.bf16.mxu0 %v154_v6  ;;  %v126_v16 = vld [vmem:[#allocation4 + $0x20] sm:$0xff]  ;;  %v127_v17 = vld [vmem:[#allocation4 + $0x28] sm:$0xff]  ;;  %v140_v18 = vld [vmem:[#allocation4 + $0x90] sm:$0xff]  ;;  %v155_v24 = vpack.c.bf16 %v125_v15, %v124_v14 }
  0x75   :  { %3564 = vmatpush3.bf16.msra.mxu0 %v4025_v1  ;;  %3874 = vmatpush3.bf16.msra.mxu1 %v4025_v1  ;;  %v141_v19 = vld [vmem:[#allocation4 + $0x98] sm:$0xff]  ;;  %v142_v20 = vld [vmem:[#allocation4 + $0xa0] sm:$0xff]  ;;  %v143_v21 = vld [vmem:[#allocation4 + $0xa8] sm:$0xff]  ;;  %v156_v25 = vpack.c.bf16 %v127_v17, %v126_v16  ;;  %v5815_v16 = vmov 0  }
  0x76   :  { %3565 = vmatprep.subr.bf16.mxu0 %v4026_v2  ;;  %3867 = vmatprep.subr.bf16.mxu1 %v4026_v2  ;;  %v4035_v22 = vld [vmem:[#allocation10 + $0x8] ss:$12 sps:$4 sm:$0xff]   ;;  %v4034_v23 = vld [vmem:[#allocation10 + $0x4] ss:$12 sps:$4 sm:$0xff]   ;;  %v163_v26 = vpack.c.bf16 %v141_v19, %v140_v18  ;;  %v4032_v27 = vld [vmem:[#allocation10] ss:$12 sps:$4 sm:$0xff]   ;;  %v164_v29 = vpack.c.bf16 %v143_v21, %v142_v20 }
  0x77   :  { %3593 = vmatprep.mubr.bf16.mxu1 %v162_v10  ;;  %v4038_v28 = vld [vmem:[#allocation10 + $0x1c] ss:$12 sps:$4 sm:$0xff]   ;;  %v4039_v30 = vld [vmem:[#allocation10 + $0x20] ss:$12 sps:$4 sm:$0xff]   ;;  %v128_v31 = vld [vmem:[#allocation4 + $0x30] sm:$0xff] }
  0x78   :  { %v129_v32 = vld [vmem:[#allocation4 + $0x38] sm:$0xff]  ;;  %v130_v33 = vld [vmem:[#allocation4 + $0x40] sm:$0xff]  ;;  %v131_v34 = vld [vmem:[#allocation4 + $0x48] sm:$0xff] }
  0x79   :  { %3566 = vmatpush3.bf16.msra.mxu0 %v4026_v2  ;;  %3875 = vmatpush3.bf16.msra.mxu1 %v4026_v2  ;;  %v144_v35 = vld [vmem:[#allocation4 + $0xb0] sm:$0xff]  ;;  %v145_v36 = vld [vmem:[#allocation4 + $0xb8] sm:$0xff]  ;;  %v146_v38 = vld [vmem:[#allocation4 + $0xc0] sm:$0xff]  ;;  %v157_v42 = vpack.c.bf16 %v129_v32, %v128_v31  ;;  %v158_v44 = vpack.c.bf16 %v131_v34, %v130_v33 }
  0x7a   :  { %3567 = vmatprep.subr.bf16.mxu0 %v4027_v3  ;;  %3868 = vmatprep.subr.bf16.mxu1 %v4027_v3  ;;  %v4036_v37 = vld [vmem:[#allocation10 + $0x18] ss:$12 sps:$4 sm:$0xff]   ;;  %v147_v39 = vld [vmem:[#allocation4 + $0xc8] sm:$0xff]  ;;  %v4042_v40 = vld [vmem:[#allocation10 + $0x34] ss:$12 sps:$4 sm:$0xff]   ;;  %v165_v45 = vpack.c.bf16 %v145_v36, %v144_v35 }
  0x7b   :  { %v4043_v41 = vld [vmem:[#allocation10 + $0x38] ss:$12 sps:$4 sm:$0xff]   ;;  %v4040_v43 = vld [vmem:[#allocation10 + $0x30] ss:$12 sps:$4 sm:$0xff]   ;;  %v166_v47 = vpack.c.bf16 %v147_v39, %v146_v38  ;;  %v135_v52 = vld [vmem:[#allocation4 + $0x68] sm:$0xff] }
  0x7c   :  { %v4046_v46 = vld [vmem:[#allocation10 + $0x4c] ss:$12 sps:$4 sm:$0xff]   ;;  %v4047_v48 = vld [vmem:[#allocation10 + $0x50] ss:$12 sps:$4 sm:$0xff]   ;;  %v134_v51 = vld [vmem:[#allocation4 + $0x60] sm:$0xff] }
  0x7d   :  { %3568 = vmatpush3.bf16.msra.mxu0 %v4027_v3  ;;  %3876 = vmatpush3.bf16.msra.mxu1 %v4027_v3  ;;  %v132_v49 = vld [vmem:[#allocation4 + $0x50] sm:$0xff]  ;;  %v133_v50 = vld [vmem:[#allocation4 + $0x58] sm:$0xff]  ;;  %v150_v56 = vld [vmem:[#allocation4 + $0xe0] sm:$0xff]  ;;  %v160_v62 = vpack.c.bf16 %v135_v52, %v134_v51 }
  0x7e   :  { %3569 = vmatprep.subr.bf16.mxu0 %v4028_v7  ;;  %3869 = vmatprep.subr.bf16.mxu1 %v4028_v7  ;;  %v148_v53 = vld [vmem:[#allocation4 + $0xd0] sm:$0xff]  ;;  %v149_v54 = vld [vmem:[#allocation4 + $0xd8] sm:$0xff]  ;;  %v151_v57 = vld [vmem:[#allocation4 + $0xe8] sm:$0xff]  ;;  %v159_v60 = vpack.c.bf16 %v133_v50, %v132_v49 }
  0x7f   :  { %v4044_v55 = vld [vmem:[#allocation10 + $0x48] ss:$12 sps:$4 sm:$0xff]   ;;  %v4050_v58 = vld [vmem:[#allocation10 + $0x64] ss:$12 sps:$4 sm:$0xff]   ;;  %v4048_v61 = vld [vmem:[#allocation10 + $0x60] ss:$12 sps:$4 sm:$0xff]   ;;  %v167_v63 = vpack.c.bf16 %v149_v54, %v148_v53  ;;  %v168_v1 = vpack.c.bf16 %v151_v57, %v150_v56 }
  0x80   :  { %v4051_v59 = vld [vmem:[#allocation10 + $0x68] ss:$12 sps:$4 sm:$0xff]   ;;  %v4055_v2 = vld [vmem:[#allocation10 + $0x80] ss:$12 sps:$4 sm:$0xff]   ;;  %v137_v4 = vld [vmem:[#allocation4 + $0x78] sm:$0xff] }
  0x81   :  { %3570 = vmatpush3.bf16.msra.mxu0 %v4028_v7  ;;  %3877 = vmatpush3.bf16.msra.mxu1 %v4028_v7  ;;  %v4054_v0 = vld [vmem:[#allocation10 + $0x7c] ss:$12 sps:$4 sm:$0xff]   ;;  %v136_v3 = vld [vmem:[#allocation4 + $0x70] sm:$0xff]  ;;  %v4052_v7 = vld [vmem:[#allocation10 + $0x78] ss:$12 sps:$4 sm:$0xff]  }
  0x82   :  { %3571 = vmatprep.subr.bf16.mxu0 %v4029_v11  ;;  %3870 = vmatprep.subr.bf16.mxu1 %v4029_v11  ;;  %v152_v5 = vld [vmem:[#allocation4 + $0xf0] sm:$0xff]  ;;  %v153_v6 = vld [vmem:[#allocation4 + $0xf8] sm:$0xff]  ;;  %v161_v8 = vpack.c.bf16 %v137_v4, %v136_v3  ;;  %v4843_v19 = vld [vmem:[%s5806_s3] ss:$0 sm:$0xff] }
  0x83   :  { %v169_v9 = vpack.c.bf16 %v153_v6, %v152_v5  ;;  %v4058_v10 = vld [vmem:[#allocation10 + $0x94] ss:$12 sps:$4 sm:$0xff]   ;;  %v4063_v15 = vld [vmem:[#allocation10 + $0xb0] ss:$12 sps:$4 sm:$0xff]  }
  0x84   :  { %v4060_v14 = vld [vmem:[#allocation10 + $0xa8] ss:$12 sps:$4 sm:$0xff]   ;;  %v4834_v17 = vld [vmem:[#allocation12 + $0x4] ss:$12 sps:$4 sm:$0xff]  }
  0x85   :  { %3572 = vmatpush3.bf16.msra.mxu0 %v4029_v11  ;;  %3878 = vmatpush3.bf16.msra.mxu1 %v4029_v11  ;;  %v4056_v11 = vld [vmem:[#allocation10 + $0x90] ss:$12 sps:$4 sm:$0xff]   ;;  %v4837_v18 = vld [vmem:[#allocation12 + $0x8] ss:$12 sps:$4 sm:$0xff]  }
  0x86   :  { %3573 = vmatprep.subr.bf16.mxu0 %v4030_v12  ;;  %3871 = vmatprep.subr.bf16.mxu1 %v4030_v12  ;;  %v4874_v3 = vld [vmem:[#allocation12 + $0x34] ss:$12 sps:$4 sm:$0xff]  }
  0x89   :  { %3574 = vmatpush3.bf16.msra.mxu0 %v4030_v12  ;;  %3879 = vmatpush3.bf16.msra.mxu1 %v4030_v12  ;;  %v4059_v12 = vld [vmem:[#allocation10 + $0x98] ss:$12 sps:$4 sm:$0xff]  }
  0x8a   :  { %3575 = vmatprep.subr.bf16.mxu0 %v4031_v13  ;;  %3872 = vmatprep.subr.bf16.mxu1 %v4031_v13 }
  0x8d   :  { %3576 = vmatpush3.bf16.msra.mxu0 %v4031_v13  ;;  %3880 = vmatpush3.bf16.msra.mxu1 %v4031_v13  ;;  %v4062_v13 = vld [vmem:[#allocation10 + $0xac] ss:$12 sps:$4 sm:$0xff]  }
  0x8e   :  { %3609 = vmatprep.subr.bf16.mxu0 %v4035_v22  ;;  %627 = vmatprep.subr.bf16.mxu1 %v4034_v23 }
  0x90   :  { %3578 = vmatmul.mubr.bf16.vlgmr.msra.gmra.mrb[0].mxu0 %v155_v24  ;;  %3594 = vmatmul.mubr.bf16.vlgmr.msra.gmra.mrb[0].mxu1 %v163_v26 }
  0x91   :  { %3581 = vmatprep.mubr.bf16.mxu0 %v156_v25  ;;  %3597 = vmatprep.mubr.bf16.mxu1 %v164_v29 }
  0x92   :  { %628 = vmatpush1.bf16.msra.mxu1 %v4032_v27  ;;  %3610 = vmatpush3.bf16.msra.mxu0 %v4035_v22 }
  0x93   :  { %629 = vmatprep.subr.bf16.mxu1 %v4038_v28  ;;  %3611 = vmatprep.subr.bf16.mxu0 %v4039_v30 }
  0x96   :  { %630 = vmatpush1.bf16.msra.mxu1 %v4036_v37  ;;  %3612 = vmatpush3.bf16.msra.mxu0 %v4039_v30 }
  0x97   :  { %631 = vmatprep.subr.bf16.mxu1 %v4042_v40  ;;  %3613 = vmatprep.subr.bf16.mxu0 %v4043_v41 }
  0x98   :  { %3582 = vmatmul.mubr.bf16.gmra.mrb[4].mxu0 %v157_v42  ;;  %3598 = vmatmul.mubr.bf16.gmra.mrb[4].mxu1 %v165_v45 }
  0x99   :  { %3585 = vmatprep.mubr.bf16.mxu0 %v158_v44  ;;  %3601 = vmatprep.mubr.bf16.mxu1 %v166_v47  ;;  %v4853_v44 = vld [vmem:[#allocation12] ss:$12 sps:$4 sm:$0xff]  }
  0x9a   :  { %632 = vmatpush1.bf16.msra.mxu1 %v4040_v43  ;;  %3614 = vmatpush3.bf16.msra.mxu0 %v4043_v41 }
  0x9b   :  { %633 = vmatprep.subr.bf16.mxu1 %v4046_v46  ;;  %3615 = vmatprep.subr.bf16.mxu0 %v4047_v48 }
  0x9e   :  { %634 = vmatpush1.bf16.msra.mxu1 %v4044_v55  ;;  %3616 = vmatpush3.bf16.msra.mxu0 %v4047_v48  ;;  %v4855_v48 = vld [vmem:[#allocation12 + $0x1c] ss:$12 sps:$4 sm:$0xff]  }
  0x9f   :  { %635 = vmatprep.subr.bf16.mxu1 %v4050_v58  ;;  %3617 = vmatprep.subr.bf16.mxu0 %v4051_v59  ;;  %v4864_v58 = vld [vmem:[#allocation12 + $0x20] ss:$12 sps:$4 sm:$0xff]  }
  0xa0   :  { %3586 = vmatmul.mubr.bf16.gmra.mrb[8].mxu0 %v159_v60  ;;  %3602 = vmatmul.mubr.bf16.gmra.mrb[8].mxu1 %v167_v63 }
  0xa1   :  { %3589 = vmatprep.mubr.bf16.mxu0 %v160_v62  ;;  %3605 = vmatprep.mubr.bf16.mxu1 %v168_v1  ;;  %v4868_v62 = vld [vmem:[#allocation12 + $0x18] ss:$12 sps:$4 sm:$0xff]  }
  0xa2   :  { %636 = vmatpush1.bf16.msra.mxu1 %v4048_v61  ;;  %3618 = vmatpush3.bf16.msra.mxu0 %v4051_v59 }
  0xa3   :  { %637 = vmatprep.subr.bf16.mxu1 %v4054_v0  ;;  %3619 = vmatprep.subr.bf16.mxu0 %v4055_v2 }
  0xa6   :  { %638 = vmatpush1.bf16.msra.mxu1 %v4052_v7  ;;  %3620 = vmatpush3.bf16.msra.mxu0 %v4055_v2 }
  0xa7   :  { %639 = vmatprep.subr.bf16.mxu1 %v4058_v10  ;;  %3621 = vmatprep.subr.bf16.mxu0 %v4059_v12 }
  0xa8   :  { %3590 = vmatmul.mubr.bf16.gmra.mrb[12].mxu0 %v161_v8  ;;  %3606 = vmatmul.mubr.bf16.gmra.mrb[12].mxu1 %v169_v9 }
  0xa9   :  { %659 = vmatprep.mubr.bf16.mxu1 %v5815_v16 }
  0xaa   :  { %640 = vmatpush1.bf16.msra.mxu1 %v4056_v11  ;;  %3622 = vmatpush3.bf16.msra.mxu0 %v4059_v12 }
  0xab   :  { %641 = vmatprep.subr.bf16.mxu1 %v4062_v13  ;;  %3623 = vmatprep.subr.bf16.mxu0 %v4063_v15 }
  0xae   :  { %642 = vmatpush1.bf16.msra.mxu1 %v4060_v14  ;;  %3624 = vmatpush3.bf16.msra.mxu0 %v4063_v15 }
  0xaf   :  { %1250 = vmatprep.subr.bf16.mxu1 %v4834_v17  ;;  %3657 = vmatprep.subr.bf16.mxu0 %v4837_v18 }
 0x163   :  { %v3579_v20 = vpop.f32.mrb[0].mxu0  ;;  %v3595_v23 = vpop.f32.mrb[0].mxu1 }
 0x164   :  { %v284_v21 = vadd.f32 %v3579_v20, %v4843_v19  ;;  %v275_v22 = vpop.f32.mrb[1].mxu0  ;;  %v348_v26 = vadd.f32 %v3595_v23, %v4843_v19  ;;  %v339_v27 = vpop.f32.mrb[1].mxu1  ;;  %v4884_v20 = vld [vmem:[#allocation12 + $0x30] ss:$12 sps:$4 sm:$0xff]  }
 0x165   :  { %v276_v24 = vadd.f32 %v4843_v19, %v275_v22  ;;  %v3580_v25 = vpop.f32.mrb[2].mxu0  ;;  %v340_v30 = vadd.f32 %v4843_v19, %v339_v27  ;;  %v3596_v31 = vpop.f32.mrb[2].mxu1  ;;  %v4888_v22 = vld [vmem:[#allocation12 + $0x38] ss:$12 sps:$4 sm:$0xff]  }
 0x166   :  { %v287_v28 = vadd.f32 %v3580_v25, %v4843_v19  ;;  %v278_v29 = vpop.f32.mrb[3].mxu0  ;;  %v420_v33 = vmax.f32 %v348_v26, 0.0  ;;  %v351_v34 = vadd.f32 %v3596_v31, %v4843_v19  ;;  %v342_v35 = vpop.f32.mrb[3].mxu1  ;;  %v404_v36 = vmax.f32 %v284_v21, 0.0  ;;  %v4891_v25 = vld [vmem:[#allocation12 + $0x4c] ss:$12 sps:$4 sm:$0xff]  }
 0x167   :  { %v279_v32 = vadd.f32 %v4843_v19, %v278_v29  ;;  %v418_v38 = vmax.f32 %v340_v30, 0.0  ;;  %v343_v39 = vadd.f32 %v4843_v19, %v342_v35  ;;  %v402_v40 = vmax.f32 %v276_v24, 0.0 }
 0x168   :  { %v405_v37 = vmax.f32 %v287_v28, 0.0  ;;  %v421_v42 = vmax.f32 %v351_v34, 0.0 }
 0x169   :  { %v403_v41 = vmax.f32 %v279_v32, 0.0  ;;  %v419_v45 = vmax.f32 %v343_v39, 0.0  ;;  %v4898_v32 = vld [vmem:[#allocation12 + $0x50] ss:$12 sps:$4 sm:$0xff]  }
 0x16a   :  { %v435_v43 = vpack.c.bf16 %v405_v37, %v404_v36  ;;  %v4857_v49 = vpack.c.bf16 %v421_v42, %v420_v33 }
 0x16b   :  { %v434_v46 = vpack.c.bf16 %v403_v41, %v402_v40  ;;  %v3583_v47 = vpop.f32.mrb[4].mxu0  ;;  %v4860_v52 = vpack.c.bf16 %v419_v45, %v418_v38  ;;  %v3599_v53 = vpop.f32.mrb[4].mxu1  ;;  %v4906_v40 = vld [vmem:[#allocation12 + $0x48] ss:$12 sps:$4 sm:$0xff]  }
 0x16c   :  { %v300_v50 = vadd.f32 %v3583_v47, %v4843_v19  ;;  %v291_v51 = vpop.f32.mrb[5].mxu0  ;;  %v364_v56 = vadd.f32 %v3599_v53, %v4843_v19  ;;  %v355_v57 = vpop.f32.mrb[5].mxu1 }
 0x16d   :  { %v292_v54 = vadd.f32 %v4843_v19, %v291_v51  ;;  %660 = vmatmul.mubr.bf16.vlgmr.msra.gmra.mrb[16].mxu1 %v434_v46  ;;  %3625 = vmatprep.mubr.bf16.mxu0 %v434_v46  ;;  %v3584_v55 = vpop.f32.mrb[6].mxu0  ;;  %v356_v63 = vadd.f32 %v4843_v19, %v355_v57  ;;  %v3600_v0 = vpop.f32.mrb[6].mxu1  ;;  %v4911_v46 = vld [vmem:[#allocation12 + $0x64] ss:$12 sps:$4 sm:$0xff]  }
 0x16e   :  { %v408_v59 = vmax.f32 %v300_v50, 0.0  ;;  %1251 = vmatpush1.bf16.msra.mxu1 %v4853_v44  ;;  %v303_v60 = vadd.f32 %v3584_v55, %v4843_v19  ;;  %3626 = vmatmul.mubr.bf16.vlgmr.msra.gmra.mrb[16].mxu0 %v435_v43  ;;  %v294_v61 = vpop.f32.mrb[7].mxu0  ;;  %v424_v4 = vmax.f32 %v364_v56, 0.0  ;;  %v367_v5 = vadd.f32 %v3600_v0, %v4843_v19  ;;  %v358_v6 = vpop.f32.mrb[7].mxu1 }
 0x16f   :  { %v406_v1 = vmax.f32 %v292_v54, 0.0  ;;  %v295_v2 = vadd.f32 %v4843_v19, %v294_v61  ;;  %669 = vmatprep.mubr.bf16.mxu1 %v5815_v16  ;;  %1252 = vmatprep.subr.bf16.mxu1 %v4855_v48  ;;  %v422_v8 = vmax.f32 %v356_v63, 0.0  ;;  %v359_v9 = vadd.f32 %v4843_v19, %v358_v6  ;;  %v4925_v61 = vld [vmem:[#allocation12 + $0x68] ss:$12 sps:$4 sm:$0xff]  }
 0x170   :  { %v409_v7 = vmax.f32 %v303_v60, 0.0  ;;  %3658 = vmatpush3.bf16.msra.mxu0 %v4837_v18  ;;  %v425_v11 = vmax.f32 %v367_v5, 0.0 }
 0x171   :  { %v407_v10 = vmax.f32 %v295_v2, 0.0  ;;  %3659 = vmatprep.subr.bf16.mxu0 %v4864_v58  ;;  %v423_v13 = vmax.f32 %v359_v9, 0.0  ;;  %v4937_v9 = vld [vmem:[#allocation12 + $0x80] ss:$12 sps:$4 sm:$0xff]  }
 0x172   :  { %v4880_v12 = vpack.c.bf16 %v409_v7, %v408_v59  ;;  %1253 = vmatpush1.bf16.msra.mxu1 %v4868_v62  ;;  %v4886_v21 = vpack.c.bf16 %v425_v11, %v424_v4  ;;  %v4921_v59 = vld [vmem:[#allocation12 + $0x60] ss:$12 sps:$4 sm:$0xff]  }
 0x173   :  { %v436_v14 = vpack.c.bf16 %v407_v10, %v406_v1  ;;  %v3587_v15 = vpop.f32.mrb[8].mxu0  ;;  %1254 = vmatprep.subr.bf16.mxu1 %v4874_v3  ;;  %v4893_v26 = vpack.c.bf16 %v423_v13, %v422_v8  ;;  %v3603_v27 = vpop.f32.mrb[8].mxu1  ;;  %v4929_v1 = vld [vmem:[#allocation12 + $0x7c] ss:$12 sps:$4 sm:$0xff]  }
 0x174   :  { %v316_v23 = vadd.f32 %v3587_v15, %v4843_v19  ;;  %v307_v24 = vpop.f32.mrb[9].mxu0  ;;  %3660 = vmatpush3.bf16.msra.mxu0 %v4864_v58  ;;  %v380_v30 = vadd.f32 %v3603_v27, %v4843_v19  ;;  %v371_v31 = vpop.f32.mrb[9].mxu1  ;;  %v4945_v27 = vld [vmem:[#allocation12 + $0x78] ss:$12 sps:$4 sm:$0xff]  }
 0x175   :  { %670 = vmatmul.mubr.bf16.gmra.mrb[20].mxu1 %v435_v43  ;;  %3629 = vmatprep.mubr.bf16.mxu0 %v436_v14  ;;  %v308_v28 = vadd.f32 %v4843_v19, %v307_v24  ;;  %v3588_v29 = vpop.f32.mrb[10].mxu0  ;;  %v372_v36 = vadd.f32 %v4843_v19, %v371_v31  ;;  %v3604_v37 = vpop.f32.mrb[10].mxu1 }
 0x176   :  { %3630 = vmatmul.mubr.bf16.gmra.mrb[20].mxu0 %v4880_v12  ;;  %v412_v33 = vmax.f32 %v316_v23, 0.0  ;;  %679 = vmatprep.mubr.bf16.mxu1 %v5815_v16  ;;  %v319_v34 = vadd.f32 %v3588_v29, %v4843_v19  ;;  %v310_v35 = vpop.f32.mrb[11].mxu0  ;;  %v428_v41 = vmax.f32 %v380_v30, 0.0  ;;  %v383_v42 = vadd.f32 %v3604_v37, %v4843_v19  ;;  %v374_v43 = vpop.f32.mrb[11].mxu1 }
 0x177   :  { %v410_v38 = vmax.f32 %v308_v28, 0.0  ;;  %v311_v39 = vadd.f32 %v4843_v19, %v310_v35  ;;  %1255 = vmatpush1.bf16.msra.mxu1 %v4884_v20  ;;  %3661 = vmatprep.subr.bf16.mxu0 %v4888_v22  ;;  %v426_v47 = vmax.f32 %v372_v36, 0.0  ;;  %v375_v50 = vadd.f32 %v4843_v19, %v374_v43 }
 0x178   :  { %v413_v45 = vmax.f32 %v319_v34, 0.0  ;;  %1256 = vmatprep.subr.bf16.mxu1 %v4891_v25  ;;  %3662 = vmatpush3.bf16.msra.mxu0 %v4888_v22  ;;  %v429_v53 = vmax.f32 %v383_v42, 0.0  ;;  %v4956_v42 = vld [vmem:[#allocation12 + $0x90] ss:$12 sps:$4 sm:$0xff]  }
 0x179   :  { %v411_v51 = vmax.f32 %v311_v39, 0.0  ;;  %3663 = vmatprep.subr.bf16.mxu0 %v4898_v32  ;;  %v427_v55 = vmax.f32 %v375_v50, 0.0  ;;  %v4970_v50 = vld [vmem:[#allocation12 + $0xb0] ss:$12 sps:$4 sm:$0xff]  }
 0x17a   :  { %v4916_v54 = vpack.c.bf16 %v413_v45, %v412_v33  ;;  %v4923_v60 = vpack.c.bf16 %v429_v53, %v428_v41  ;;  %v4950_v33 = vld [vmem:[#allocation12 + $0x94] ss:$12 sps:$4 sm:$0xff]   ;;  %v4997_v53 = vld [vmem:[#allocation7 + $0x8] sm:$0xff] }
 0x17b   :  { %v4918_v56 = vpack.c.bf16 %v411_v51, %v410_v38  ;;  %v3591_v57 = vpop.f32.mrb[12].mxu0  ;;  %1257 = vmatpush1.bf16.msra.mxu1 %v4906_v40  ;;  %v4931_v2 = vpack.c.bf16 %v427_v55, %v426_v47  ;;  %v3607_v4 = vpop.f32.mrb[12].mxu1  ;;  %v4966_v47 = vld [vmem:[#allocation12 + $0x98] ss:$12 sps:$4 sm:$0xff]   ;;  %v4974_v51 = vld [vmem:[#allocation12 + $0xa8] ss:$12 sps:$4 sm:$0xff]  }
 0x17c   :  { %v332_v63 = vadd.f32 %v3591_v57, %v4843_v19  ;;  %v323_v0 = vpop.f32.mrb[13].mxu0  ;;  %1258 = vmatprep.subr.bf16.mxu1 %v4911_v46  ;;  %3664 = vmatpush3.bf16.msra.mxu0 %v4898_v32  ;;  %v396_v7 = vadd.f32 %v3607_v4, %v4843_v19  ;;  %v387_v8 = vpop.f32.mrb[13].mxu1  ;;  %v5003_v55 = vld [vmem:[#allocation7 + $0x10] sm:$0xff] }
 0x17d   :  { %680 = vmatmul.mubr.bf16.gmra.mrb[24].mxu1 %v436_v14  ;;  %3633 = vmatprep.mubr.bf16.mxu0 %v4918_v56  ;;  %v324_v5 = vadd.f32 %v4843_v19, %v323_v0  ;;  %v3592_v6 = vpop.f32.mrb[14].mxu0  ;;  %v388_v14 = vadd.f32 %v4843_v19, %v387_v8  ;;  %v3608_v15 = vpop.f32.mrb[14].mxu1 }
 0x17e   :  { %689 = vmatprep.mubr.bf16.mxu1 %v5815_v16  ;;  %3634 = vmatmul.mubr.bf16.gmra.mrb[24].mxu0 %v4916_v54  ;;  %v416_v10 = vmax.f32 %v332_v63, 0.0  ;;  %v335_v11 = vadd.f32 %v3592_v6, %v4843_v19  ;;  %v326_v13 = vpop.f32.mrb[15].mxu0  ;;  %v432_v28 = vmax.f32 %v396_v7, 0.0  ;;  %v399_v29 = vadd.f32 %v3608_v15, %v4843_v19  ;;  %v390_v30 = vpop.f32.mrb[15].mxu1 }
 0x17f   :  { %v414_v23 = vmax.f32 %v324_v5, 0.0  ;;  %v327_v24 = vadd.f32 %v4843_v19, %v326_v13  ;;  %1259 = vmatpush1.bf16.msra.mxu1 %v4921_v59  ;;  %3665 = vmatprep.subr.bf16.mxu0 %v4925_v61  ;;  %v430_v34 = vmax.f32 %v388_v14, 0.0  ;;  %v391_v35 = vadd.f32 %v4843_v19, %v390_v30  ;;  %v4963_v19 = vld [vmem:[#allocation12 + $0xac] ss:$12 sps:$4 sm:$0xff]  }
 0x180   :  { %v417_v31 = vmax.f32 %v335_v11, 0.0  ;;  %1260 = vmatprep.subr.bf16.mxu1 %v4929_v1  ;;  %3666 = vmatpush3.bf16.msra.mxu0 %v4925_v61  ;;  %v433_v37 = vmax.f32 %v399_v29, 0.0 }
 0x181   :  { %v415_v36 = vmax.f32 %v327_v24, 0.0  ;;  %3667 = vmatprep.subr.bf16.mxu0 %v4937_v9  ;;  %v431_v39 = vmax.f32 %v391_v35, 0.0 }
 0x182   :  { %v441_v38 = vpack.c.bf16 %v417_v31, %v416_v10  ;;  %v4958_v43 = vpack.c.bf16 %v433_v37, %v432_v28 }
 0x183   :  { %v440_v41 = vpack.c.bf16 %v415_v36, %v414_v23  ;;  %1261 = vmatpush1.bf16.msra.mxu1 %v4945_v27  ;;  %v4961_v45 = vpack.c.bf16 %v431_v39, %v430_v34 }
 0x184   :  { %1262 = vmatprep.subr.bf16.mxu1 %v4950_v33  ;;  %3668 = vmatpush3.bf16.msra.mxu0 %v4937_v9 }
 0x185   :  { %690 = vmatmul.mubr.bf16.gmra.mrb[28].mxu1 %v4880_v12  ;;  %3637 = vmatprep.mubr.bf16.mxu0 %v440_v41  ;;  %v4995_v12 = vld [vmem:[#allocation7] sm:$0xff] }
 0x186   :  { %699 = vmatprep.mubr.bf16.mxu1 %v5815_v16  ;;  %3638 = vmatmul.mubr.bf16.gmra.mrb[28].mxu0 %v441_v38 }
 0x187   :  { %3641 = vmatprep.mubr.bf16.mxu0 %v4860_v52  ;;  %1263 = vmatpush1.bf16.msra.mxu1 %v4956_v42 }
 0x188   :  { %1264 = vmatprep.subr.bf16.mxu1 %v4963_v19  ;;  %3669 = vmatprep.subr.bf16.mxu0 %v4966_v47 }
 0x189   :  { %3670 = vmatpush3.bf16.msra.mxu0 %v4966_v47 }
 0x18a   :  { %3671 = vmatprep.subr.bf16.mxu0 %v4970_v50 }
 0x18b   :  { %1265 = vmatpush1.bf16.msra.mxu1 %v4974_v51 }
 0x18c   :  { %1458 = vmatprep.subr.bf16.mxu1 %v4834_v17 }
 0x18d   :  { %700 = vmatmul.mubr.bf16.gmra.mrb[32].mxu1 %v4918_v56  ;;  %3672 = vmatpush3.bf16.msra.mxu0 %v4970_v50  ;;  %v5005_v56 = vld [vmem:[#allocation7 + $0x18] sm:$0xff] }
 0x18e   :  { %709 = vmatprep.mubr.bf16.mxu1 %v5815_v16  ;;  %3642 = vmatmul.mubr.bf16.gmra.mrb[32].mxu0 %v4857_v49  ;;  %v1121_v57 = vpack.c.bf16 %v5005_v56, %v5003_v55 }
 0x18f   :  { %3645 = vmatprep.mubr.bf16.mxu0 %v4893_v26  ;;  %3677 = vmatprep.subr.bf16.mxu0 %v4837_v18 }
 0x195   :  { %710 = vmatmul.mubr.bf16.gmra.mrb[36].mxu1 %v4916_v54  ;;  %v1120_v54 = vpack.c.bf16 %v4997_v53, %v4995_v12 }
 0x196   :  { %719 = vmatprep.mubr.bf16.mxu1 %v5815_v16  ;;  %3646 = vmatmul.mubr.bf16.gmra.mrb[36].mxu0 %v4886_v21 }
 0x197   :  { %3649 = vmatprep.mubr.bf16.mxu0 %v4931_v2 }
 0x19d   :  { %720 = vmatmul.mubr.bf16.gmra.mrb[40].mxu1 %v440_v41 }
 0x19e   :  { %729 = vmatprep.mubr.bf16.mxu1 %v5815_v16  ;;  %3650 = vmatmul.mubr.bf16.gmra.mrb[40].mxu0 %v4923_v60 }
 0x19f   :  { %3653 = vmatprep.mubr.bf16.mxu0 %v4961_v45 }
 0x1a5   :  { %730 = vmatmul.mubr.bf16.gmra.mrb[44].mxu1 %v441_v38 }
 0x1a6   :  { %739 = vmatprep.mubr.bf16.mxu1 %v5815_v16  ;;  %3654 = vmatmul.mubr.bf16.gmra.mrb[44].mxu0 %v4958_v43 }
 0x1a7   :  { %3673 = vmatprep.mubr.bf16.mxu0 %v1120_v54 }
 0x1ad   :  { %740 = vmatmul.mubr.bf16.gmra.mrb[48].mxu1 %v4860_v52 }
 0x1ae   :  { %749 = vmatprep.mubr.bf16.mxu1 %v5815_v16  ;;  %3674 = vmatmul.mubr.bf16.vlgmr.msra.gmra.mrb[48].mxu0 %v1121_v57 }
 0x1af   :  { %3678 = vmatpush3.bf16.msra.mxu0 %v4837_v18 }
 0x1b0   :  { %3679 = vmatprep.subr.bf16.mxu0 %v4864_v58 }
 0x1b3   :  { %3680 = vmatpush3.bf16.msra.mxu0 %v4864_v58 }
 0x1b4   :  { %3681 = vmatprep.subr.bf16.mxu0 %v4888_v22 }
 0x1b5   :  { %750 = vmatmul.mubr.bf16.gmra.mrb[52].mxu1 %v4857_v49  ;;  %v484_v49 = vlaneseq }
 0x1b6   :  { %759 = vmatprep.mubr.bf16.mxu1 %v5815_v16 }
 0x1b7   :  { %3682 = vmatpush3.bf16.msra.mxu0 %v4888_v22  ;;  %v5059_v52 = vshrl.u32 %v484_v49, 7 }
 0x1b8   :  { %3683 = vmatprep.subr.bf16.mxu0 %v4898_v32 }
 0x1b9   :  { %v494_v63 = vsub.s32 2, %v5059_v52 }
 0x1bb   :  { %3684 = vmatpush3.bf16.msra.mxu0 %v4898_v32 }
 0x1bc   :  { %3685 = vmatprep.subr.bf16.mxu0 %v4925_v61 }
 0x1bd   :  { %760 = vmatmul.mubr.bf16.gmra.mrb[56].mxu1 %v4893_v26 }
 0x1be   :  { %769 = vmatprep.mubr.bf16.mxu1 %v5815_v16 }
 0x1bf   :  { %3686 = vmatpush3.bf16.msra.mxu0 %v4925_v61 }
 0x1c0   :  { %3687 = vmatprep.subr.bf16.mxu0 %v4937_v9 }
 0x1c3   :  { %3688 = vmatpush3.bf16.msra.mxu0 %v4937_v9 }
 0x1c4   :  { %3689 = vmatprep.subr.bf16.mxu0 %v4966_v47 }
 0x1c5   :  { %770 = vmatmul.mubr.bf16.gmra.mrb[60].mxu1 %v4886_v21 }
 0x1c6   :  { %779 = vmatprep.mubr.bf16.mxu1 %v5815_v16 }
 0x1c7   :  { %3690 = vmatpush3.bf16.msra.mxu0 %v4966_v47 }
 0x1c8   :  { %3691 = vmatprep.subr.bf16.mxu0 %v4970_v50 }
 0x1cb   :  { %3692 = vmatpush3.bf16.msra.mxu0 %v4970_v50 }
 0x1cc   :  { %3697 = vmatprep.subr.bf16.mxu0 %v4837_v18 }
 0x1cd   :  { %780 = vmatmul.mubr.bf16.gmra.mrb[64].mxu1 %v4931_v2  ;;  %v5073_v2 = vld [vmem:[%s5808_s5] sm:$0x7] }
 0x1ce   :  { %789 = vmatprep.mubr.bf16.mxu1 %v5815_v16  ;;  %v5076_v4 = vrot.slane %v5073_v2, %v494_v63 }
 0x1d5   :  { %790 = vmatmul.mubr.bf16.gmra.mrb[68].mxu1 %v4923_v60 }
 0x1d6   :  { %799 = vmatprep.mubr.bf16.mxu1 %v5815_v16 }
 0x1dd   :  { %800 = vmatmul.mubr.bf16.gmra.mrb[72].mxu1 %v4961_v45 }
 0x1de   :  { %809 = vmatprep.mubr.bf16.mxu1 %v5815_v16 }
 0x1e5   :  { %810 = vmatmul.mubr.bf16.gmra.mrb[76].mxu1 %v4958_v43 }
 0x1e6   :  { %1282 = vmatprep.mubr.bf16.mxu1 %v5815_v16 }
 0x1ed   :  { %1283 = vmatmul.mubr.bf16.vlgmr.msra.gmra.mrb[16].mxu1 %v1120_v54 }
 0x1ee   :  { %1292 = vmatprep.mubr.bf16.mxu1 %v5815_v16  ;;  %1459 = vmatpush1.bf16.msra.mxu1 %v4853_v44 }
 0x1ef   :  { %1460 = vmatprep.subr.bf16.mxu1 %v4855_v48 }
 0x1f2   :  { %1461 = vmatpush1.bf16.msra.mxu1 %v4868_v62 }
 0x1f3   :  { %1462 = vmatprep.subr.bf16.mxu1 %v4874_v3 }
 0x1f5   :  { %1293 = vmatmul.mubr.bf16.gmra.mrb[20].mxu1 %v1121_v57 }
 0x1f6   :  { %1463 = vmatpush1.bf16.msra.mxu1 %v4884_v20  ;;  %1490 = vmatprep.mubr.bf16.mxu1 %v5815_v16 }
 0x1f7   :  { %1464 = vmatprep.subr.bf16.mxu1 %v4891_v25 }
 0x1fa   :  { %1465 = vmatpush1.bf16.msra.mxu1 %v4906_v40 }
 0x1fb   :  { %1466 = vmatprep.subr.bf16.mxu1 %v4911_v46 }
 0x1fe   :  { %1467 = vmatpush1.bf16.msra.mxu1 %v4921_v59 }
 0x1ff   :  { %1468 = vmatprep.subr.bf16.mxu1 %v4929_v1 }
 0x202   :  { %1469 = vmatpush1.bf16.msra.mxu1 %v4945_v27 }
 0x203   :  { %1470 = vmatprep.subr.bf16.mxu1 %v4950_v33 }
 0x206   :  { %1471 = vmatpush1.bf16.msra.mxu1 %v4956_v42 }
 0x207   :  { %1472 = vmatprep.subr.bf16.mxu1 %v4963_v19 }
 0x20a   :  { %1473 = vmatpush1.bf16.msra.mxu1 %v4974_v51 }
 0x20b   :  { %1668 = vmatprep.subr.bf16.mxu1 %v4834_v17 }
 0x241   :  { %v5061_v21 = vpop.f32.mrb[16].mxu0 }
 0x242   :  { %v5063_v26 = vpop.f32.mrb[17].mxu0 }
 0x243   :  { %v5065_v60 = vpop.f32.mrb[18].mxu0 }
 0x244   :  { %v5068_v0 = vpop.f32.mrb[19].mxu0 }
 0x249   :  { %v3631_v5 = vpop.f32.mrb[20].mxu0 }
 0x24a   :  { %v5079_v6 = vadd.f32 %v3631_v5, %v5076_v4  ;;  %v870_v7 = vpop.f32.mrb[21].mxu0 }
 0x24b   :  { %v5082_v8 = vadd.f32 %v870_v7, %v5076_v4  ;;  %v3632_v10 = vpop.f32.mrb[22].mxu0 }
 0x24c   :  { %v5085_v11 = vadd.f32 %v3632_v10, %v5076_v4  ;;  %v873_v13 = vpop.f32.mrb[23].mxu0 }
 0x24d   :  { %v5088_v14 = vadd.f32 %v873_v13, %v5076_v4 }
 0x251   :  { %v3635_v15 = vpop.f32.mrb[24].mxu0 }
 0x252   :  { %v5091_v23 = vadd.f32 %v3635_v15, %v5076_v4  ;;  %v886_v24 = vpop.f32.mrb[25].mxu0 }
 0x253   :  { %v5094_v28 = vadd.f32 %v886_v24, %v5076_v4  ;;  %v3636_v29 = vpop.f32.mrb[26].mxu0 }
 0x254   :  { %v5097_v30 = vadd.f32 %v3636_v29, %v5076_v4  ;;  %v889_v31 = vpop.f32.mrb[27].mxu0 }
 0x255   :  { %v5100_v34 = vadd.f32 %v889_v31, %v5076_v4 }
 0x259   :  { %v3639_v35 = vpop.f32.mrb[28].mxu0 }
 0x25a   :  { %v5103_v36 = vadd.f32 %v3639_v35, %v5076_v4  ;;  %v902_v37 = vpop.f32.mrb[29].mxu0 }
 0x25b   :  { %v5106_v38 = vadd.f32 %v902_v37, %v5076_v4  ;;  %v3640_v39 = vpop.f32.mrb[30].mxu0 }
 0x25c   :  { %5817 = vst [vmem:[#allocation24_spill] sm:$0xff] %v5103_v36  ;;  %v5109_v41 = vadd.f32 %v3640_v39, %v5076_v4  ;;  %v905_v43 = vpop.f32.mrb[31].mxu0 }
 0x25d   :  { %5818 = vst [vmem:[#allocation25_spill] sm:$0xff] %v5106_v38  ;;  %v5112_v45 = vadd.f32 %v905_v43, %v5076_v4 }
 0x25e   :  { %5819 = vst [vmem:[#allocation26_spill] sm:$0xff] %v5109_v41 }
 0x25f   :  { %5820 = vst [vmem:[#allocation27_spill] sm:$0xff] %v5112_v45 }
 0x261   :  { %v3643_v54 = vpop.f32.mrb[32].mxu0 }
 0x262   :  { %v5115_v57 = vadd.f32 %v3643_v54, %v5076_v4  ;;  %v918_v49 = vpop.f32.mrb[33].mxu0 }
 0x263   :  { %v5118_v63 = vadd.f32 %v918_v49, %v5076_v4  ;;  %v3644_v5 = vpop.f32.mrb[34].mxu0 }
 0x264   :  { %5821 = vst [vmem:[#allocation28_spill] sm:$0xff] %v5115_v57  ;;  %v5121_v7 = vadd.f32 %v3644_v5, %v5076_v4  ;;  %v921_v10 = vpop.f32.mrb[35].mxu0 }
 0x265   :  { %5822 = vst [vmem:[#allocation29_spill] sm:$0xff] %v5118_v63  ;;  %v5124_v13 = vadd.f32 %v921_v10, %v5076_v4 }
 0x266   :  { %5823 = vst [vmem:[#allocation30_spill] sm:$0xff] %v5121_v7 }
 0x267   :  { %5824 = vst [vmem:[#allocation31_spill] sm:$0xff] %v5124_v13 }
 0x269   :  { %v3647_v15 = vpop.f32.mrb[36].mxu0 }
 0x26a   :  { %v5127_v24 = vadd.f32 %v3647_v15, %v5076_v4  ;;  %v934_v29 = vpop.f32.mrb[37].mxu0 }
 0x26b   :  { %v5130_v31 = vadd.f32 %v934_v29, %v5076_v4  ;;  %v3648_v35 = vpop.f32.mrb[38].mxu0 }
 0x26c   :  { %5825 = vst [vmem:[#allocation32_spill] sm:$0xff] %v5127_v24  ;;  %v5133_v37 = vadd.f32 %v3648_v35, %v5076_v4  ;;  %v937_v39 = vpop.f32.mrb[39].mxu0 }
 0x26d   :  { %5826 = vst [vmem:[#allocation33_spill] sm:$0xff] %v5130_v31  ;;  %v5136_v43 = vadd.f32 %v937_v39, %v5076_v4 }
 0x26e   :  { %5827 = vst [vmem:[#allocation34_spill] sm:$0xff] %v5133_v37 }
 0x26f   :  { %5828 = vst [vmem:[#allocation35_spill] sm:$0xff] %v5136_v43 }
 0x271   :  { %v3651_v54 = vpop.f32.mrb[40].mxu0 }
 0x272   :  { %v5139_v49 = vadd.f32 %v3651_v54, %v5076_v4  ;;  %v950_v5 = vpop.f32.mrb[41].mxu0 }
 0x273   :  { %v5142_v10 = vadd.f32 %v950_v5, %v5076_v4  ;;  %v3652_v15 = vpop.f32.mrb[42].mxu0 }
 0x274   :  { %5829 = vst [vmem:[#allocation36_spill] sm:$0xff] %v5139_v49  ;;  %v5145_v29 = vadd.f32 %v3652_v15, %v5076_v4  ;;  %v953_v16 = vpop.f32.mrb[43].mxu0 }
 0x275   :  { %5830 = vst [vmem:[#allocation37_spill] sm:$0xff] %v5142_v10  ;;  %v5148_v35 = vadd.f32 %v953_v16, %v5076_v4 }
 0x276   :  { %5831 = vst [vmem:[#allocation38_spill] sm:$0xff] %v5145_v29 }
 0x277   :  { %5832 = vst [vmem:[#allocation39_spill] sm:$0xff] %v5148_v35 }
 0x279   :  { %v3655_v37 = vpop.f32.mrb[44].mxu0 }
 0x27a   :  { %v5151_v39 = vadd.f32 %v3655_v37, %v5076_v4  ;;  %v966_v24 = vpop.f32.mrb[45].mxu0  ;;  %v486_v37 = vsub.s32 0, %v5059_v52 }
 0x27b   :  { %v5154_v54 = vadd.f32 %v966_v24, %v5076_v4  ;;  %v3656_v49 = vpop.f32.mrb[46].mxu0 }
 0x27c   :  { %5833 = vst [vmem:[#allocation40_spill] sm:$0xff] %v5151_v39  ;;  %v5157_v5 = vadd.f32 %v3656_v49, %v5076_v4  ;;  %v969_v10 = vpop.f32.mrb[47].mxu0  ;;  %v490_v39 = vsub.s32 1, %v5059_v52  ;;  %v5169_v24 = vrot.slane %v5073_v2, %v486_v37 }
 0x27d   :  { %5834 = vst [vmem:[#allocation41_spill] sm:$0xff] %v5154_v54  ;;  %v5160_v15 = vadd.f32 %v969_v10, %v5076_v4 }
 0x27e   :  { %5835 = vst [vmem:[#allocation42_spill] sm:$0xff] %v5157_v5  ;;  %v5172_v49 = vrot.slane %v5073_v2, %v490_v39 }
 0x27f   :  { %5836 = vst [vmem:[#allocation43_spill] sm:$0xff] %v5160_v15 }
 0x281   :  { %v5162_v29 = vpop.f32.mrb[48].mxu0 }
 0x282   :  { %v1337_v16 = vpop.f32.mrb[49].mxu0 }
 0x283   :  { %v5164_v35 = vpop.f32.mrb[50].mxu0 }
 0x284   :  { %v1340_v43 = vpop.f32.mrb[51].mxu0 }
 0x2c0   :  { %v1284_v54 = vpop.f32.mrb[16].mxu1 }
 0x2c1   :  { %v3881_v10 = vadd.f32 %v1284_v54, %v5169_v24  ;;  %v1286_v5 = vpop.f32.mrb[17].mxu1 }
 0x2c2   :  { %v1288_v15 = vpop.f32.mrb[18].mxu1  ;;  %v3882_v13 = vadd.f32 %v1286_v5, %v5172_v49 }
 0x2c3   :  { %v3336_v31 = vmul.f32 -1.442695, %v3881_v10  ;;  %v3883_v7 = vadd.f32 %v1288_v15, %v5169_v24  ;;  %v1290_v57 = vpop.f32.mrb[19].mxu1 }
 0x2c4   :  { %v3884_v52 = vadd.f32 %v1290_v57, %v5172_v49  ;;  %v3340_v37 = vmul.f32 -1.442695, %v3882_v13 }
 0x2c5   :  { %4104 = vpow2.f32 %v3336_v31  ;;  %v3337_v63 = vmul.f32 -1.442695, %v3883_v7 }
 0x2c6   :  { %v3341_v36 = vmul.f32 -1.442695, %v3884_v52 }
 0x2c7   :  { %4106 = vpow2.f32 %v3337_v63 }
 0x2c8   :  { %v1294_v41 = vpop.f32.mrb[20].mxu1  ;;  %4108 = vpow2.f32 %v3340_v37 }
 0x2c9   :  { %v3885_v2 = vadd.f32 %v1294_v41, %v5169_v24  ;;  %v1296_v39 = vpop.f32.mrb[21].mxu1 }
 0x2ca   :  { %v1298_v54 = vpop.f32.mrb[22].mxu1  ;;  %v3886_v10 = vadd.f32 %v1296_v39, %v5172_v49 }
 0x2cb   :  { %v3338_v45 = vmul.f32 -1.442695, %v3885_v2  ;;  %v3887_v15 = vadd.f32 %v1298_v54, %v5169_v24  ;;  %v1300_v38 = vpop.f32.mrb[23].mxu1 }
 0x2cc   :  { %v3888_v57 = vadd.f32 %v1300_v38, %v5172_v49  ;;  %v3342_v7 = vmul.f32 -1.442695, %v3886_v10 }
 0x2cd   :  { %4110 = vpow2.f32 %v3338_v45  ;;  %v3339_v31 = vmul.f32 -1.442695, %v3887_v15  ;;  %v5185_v45 = vld [vmem:[%s5810_s7] ss:$0 sm:$0xff] }
 0x2ce   :  { %4112 = vpow2.f32 %v3341_v36  ;;  %v3343_v52 = vmul.f32 -1.442695, %v3888_v57  ;;  %v1420_v10 = vadd.f32 %v5185_v45, %v1337_v16 }
 0x2cf   :  { %v4105_v63 = vpop.eup %4104  ;;  %4114 = vpow2.f32 %v3339_v31 }
 0x2d0   :  { %v1380_v13 = vadd.f32 1.0, %v4105_v63 }
 0x2d1   :  { %v4107_v41 = vpop.eup %4106 }
 0x2d2   :  { %4116 = vrcp.f32 %v1380_v13  ;;  %v1381_v5 = vadd.f32 1.0, %v4107_v41  ;;  %v4109_v2 = vpop.eup %4108  ;;  %v1421_v41 = vadd.f32 %v5185_v45, %v1340_v43  ;;  %v863_v43 = vadd.f32 %v5061_v21, %v5076_v4 }
 0x2d3   :  { %4118 = vpow2.f32 %v3342_v7  ;;  %v1408_v54 = vadd.f32 1.0, %v4109_v2  ;;  %v855_v7 = vadd.f32 %v5063_v26, %v5076_v4 }
 0x2d4   :  { %4120 = vrcp.f32 %v1381_v5 }
 0x2d5   :  { %4122 = vpow2.f32 %v3343_v52  ;;  %v858_v52 = vadd.f32 %v5068_v0, %v5076_v4  ;;  %v1423_v0 = vadd.f32 %v5164_v35, %v5185_v45 }
 0x2d7   :  { %v4111_v36 = vpop.eup %4110 }
 0x2d8   :  { %v4113_v37 = vpop.eup %4112  ;;  %v1382_v38 = vadd.f32 1.0, %v4111_v36 }
 0x2d9   :  { %v4115_v39 = vpop.eup %4114  ;;  %v1409_v31 = vadd.f32 1.0, %v4113_v37 }
 0x2da   :  { %4124 = vrcp.f32 %v1382_v38  ;;  %v1383_v15 = vadd.f32 1.0, %v4115_v39 }
 0x2dc   :  { %v4117_v57 = vpop.eup %4116  ;;  %4126 = vrcp.f32 %v1383_v15  ;;  %v1422_v15 = vadd.f32 %v5162_v29, %v5185_v45 }
 0x2dd   :  { %v4119_v63 = vpop.eup %4118  ;;  %4128 = vrcp.f32 %v1408_v54  ;;  %v1424_v13 = vmul.f32 %v4117_v57, %v1420_v10  ;;  %v866_v57 = vadd.f32 %v5065_v60, %v5076_v4 }
 0x2de   :  { %v4121_v5 = vpop.eup %4120  ;;  %4130 = vrcp.f32 %v1409_v31  ;;  %v1410_v38 = vadd.f32 1.0, %v4119_v63 }
 0x2df   :  { %v1428_v2 = vadd.f32 %v1424_v13, %v855_v7  ;;  %v1425_v16 = vmul.f32 %v4121_v5, %v1421_v41  ;;  %v4123_v36 = vpop.eup %4122 }
 0x2e0   :  { %v1411_v39 = vadd.f32 1.0, %v4123_v36 }
 0x2e1   :  { %4132 = vtanh.f32 %v1428_v2  ;;  %v1429_v37 = vadd.f32 %v1425_v16, %v858_v52 }
 0x2e3   :  { %4134 = vtanh.f32 %v1429_v37 }
 0x2e4   :  { %v4125_v26 = vpop.eup %4124  ;;  %4136 = vrcp.f32 %v1410_v38 }
 0x2e5   :  { %v1426_v54 = vmul.f32 %v4125_v26, %v1422_v15  ;;  %4138 = vrcp.f32 %v1411_v39 }
 0x2e6   :  { %v4127_v10 = vpop.eup %4126 }
 0x2e7   :  { %v4129_v31 = vpop.eup %4128  ;;  %v1430_v63 = vadd.f32 %v1426_v54, %v863_v43  ;;  %v1427_v7 = vmul.f32 %v4127_v10, %v1423_v0  ;;  %v5837_v0 = vmov 0  }
 0x2e8   :  { %v4131_v13 = vpop.eup %4130  ;;  %v1436_v41 = vsub.f32 1.0, %v4129_v31  ;;  %v1444_v21 = vmul.f32 %v4129_v31, %v4995_v12 }
 0x2e9   :  { %4140 = vtanh.f32 %v1430_v63  ;;  %v1431_v29 = vadd.f32 %v1427_v7, %v866_v57  ;;  %v1437_v52 = vsub.f32 1.0, %v4131_v13  ;;  %v1445_v35 = vmul.f32 %v4131_v13, %v4997_v53 }
 0x2eb   :  { %v4133_v5 = vpop.eup %4132  ;;  %4142 = vtanh.f32 %v1431_v29 }
 0x2ec   :  { %v1440_v2 = vmul.f32 %v4133_v5, %v1436_v41 }
 0x2ed   :  { %v4135_v16 = vpop.eup %4134 }
 0x2ee   :  { %v1441_v36 = vmul.f32 %v4135_v16, %v1437_v52  ;;  %v5203_v38 = vadd.f32 %v1444_v21, %v1440_v2  ;;  %v4137_v60 = vpop.eup %4136 }
 0x2ef   :  { %v4139_v37 = vpop.eup %4138  ;;  %v1438_v15 = vsub.f32 1.0, %v4137_v60  ;;  %v1446_v53 = vmul.f32 %v4137_v60, %v5003_v55 }
 0x2f0   :  { %v5205_v4 = vadd.f32 %v1445_v35, %v1441_v36  ;;  %v1439_v12 = vsub.f32 1.0, %v4139_v37  ;;  %v1447_v31 = vmul.f32 %v4139_v37, %v5005_v56 }
 0x2f2   :  { %v5209_v39 = vpack.c.bf16 %v5205_v4, %v5203_v38 }
 0x2f3   :  { %v4141_v26 = vpop.eup %4140 }
 0x2f4   :  { %1491 = vmatmul.mubr.bf16.vlgmr.msra.gmra.mrb[24].mxu1 %v5209_v39  ;;  %3693 = vmatprep.mubr.bf16.mxu0 %v5209_v39  ;;  %v1442_v43 = vmul.f32 %v4141_v26, %v1438_v15 }
 0x2f5   :  { %v4143_v54 = vpop.eup %4142  ;;  %1500 = vmatprep.mubr.bf16.mxu1 %v5837_v0  ;;  %1669 = vmatpush1.bf16.msra.mxu1 %v4853_v44 }
 0x2f6   :  { %v1443_v10 = vmul.f32 %v4143_v54, %v1439_v12  ;;  %v5217_v57 = vadd.f32 %v1446_v53, %v1442_v43  ;;  %1670 = vmatprep.subr.bf16.mxu1 %v4855_v48 }
 0x2f8   :  { %v5220_v63 = vadd.f32 %v1447_v31, %v1443_v10 }
 0x2f9   :  { %1671 = vmatpush1.bf16.msra.mxu1 %v4868_v62 }
 0x2fa   :  { %v5225_v7 = vpack.c.bf16 %v5220_v63, %v5217_v57  ;;  %1672 = vmatprep.subr.bf16.mxu1 %v4874_v3 }
 0x2fc   :  { %1501 = vmatmul.mubr.bf16.gmra.mrb[28].mxu1 %v5225_v7  ;;  %3694 = vmatmul.mubr.bf16.vlgmr.msra.gmra.mrb[52].mxu0 %v5225_v7 }
 0x2fd   :  { %1673 = vmatpush1.bf16.msra.mxu1 %v4884_v20  ;;  %3698 = vmatpush3.bf16.msra.mxu0 %v4837_v18 }
 0x2fe   :  { %1674 = vmatprep.subr.bf16.mxu1 %v4891_v25  ;;  %3699 = vmatprep.subr.bf16.mxu0 %v4864_v58 }
 0x2ff   :  { %1700 = vmatprep.mubr.bf16.mxu1 %v5837_v0 }
 0x301   :  { %1675 = vmatpush1.bf16.msra.mxu1 %v4906_v40  ;;  %3700 = vmatpush3.bf16.msra.mxu0 %v4864_v58 }
 0x302   :  { %1676 = vmatprep.subr.bf16.mxu1 %v4911_v46  ;;  %3701 = vmatprep.subr.bf16.mxu0 %v4888_v22 }
 0x305   :  { %1677 = vmatpush1.bf16.msra.mxu1 %v4921_v59  ;;  %3702 = vmatpush3.bf16.msra.mxu0 %v4888_v22 }
 0x306   :  { %1678 = vmatprep.subr.bf16.mxu1 %v4929_v1  ;;  %3703 = vmatprep.subr.bf16.mxu0 %v4898_v32 }
 0x309   :  { %1679 = vmatpush1.bf16.msra.mxu1 %v4945_v27  ;;  %3704 = vmatpush3.bf16.msra.mxu0 %v4898_v32 }
 0x30a   :  { %1680 = vmatprep.subr.bf16.mxu1 %v4950_v33  ;;  %3705 = vmatprep.subr.bf16.mxu0 %v4925_v61 }
 0x30d   :  { %1681 = vmatpush1.bf16.msra.mxu1 %v4956_v42  ;;  %3706 = vmatpush3.bf16.msra.mxu0 %v4925_v61 }
 0x30e   :  { %1682 = vmatprep.subr.bf16.mxu1 %v4963_v19  ;;  %3707 = vmatprep.subr.bf16.mxu0 %v4937_v9 }
 0x311   :  { %1683 = vmatpush1.bf16.msra.mxu1 %v4974_v51  ;;  %3708 = vmatpush3.bf16.msra.mxu0 %v4937_v9 }
 0x312   :  { %3709 = vmatprep.subr.bf16.mxu0 %v4966_v47  ;;  %1878 = vmatprep.subr.bf16.mxu1 %v4834_v17 }
 0x315   :  { %3710 = vmatpush3.bf16.msra.mxu0 %v4966_v47 }
 0x316   :  { %3711 = vmatprep.subr.bf16.mxu0 %v4970_v50 }
 0x319   :  { %3712 = vmatpush3.bf16.msra.mxu0 %v4970_v50 }
 0x31a   :  { %3717 = vmatprep.subr.bf16.mxu0 %v4837_v18 }
 0x3c7   :  { %v1492_v44 = vpop.f32.mrb[24].mxu1 }
 0x3c8   :  { %v3889_v48 = vadd.f32 %v1492_v44, %v5169_v24  ;;  %v1494_v58 = vpop.f32.mrb[25].mxu1 }
 0x3c9   :  { %v1496_v62 = vpop.f32.mrb[26].mxu1  ;;  %v3890_v25 = vadd.f32 %v1494_v58, %v5172_v49 }
 0x3ca   :  { %v3344_v3 = vmul.f32 -1.442695, %v3889_v48  ;;  %v3891_v20 = vadd.f32 %v1496_v62, %v5169_v24  ;;  %v1498_v22 = vpop.f32.mrb[27].mxu1 }
 0x3cb   :  { %v3892_v32 = vadd.f32 %v1498_v22, %v5172_v49  ;;  %v3348_v55 = vmul.f32 -1.442695, %v3890_v25 }
 0x3cc   :  { %4144 = vpow2.f32 %v3344_v3  ;;  %v3345_v17 = vmul.f32 -1.442695, %v3891_v20 }
 0x3cd   :  { %v3349_v5 = vmul.f32 -1.442695, %v3892_v32 }
 0x3ce   :  { %4146 = vpow2.f32 %v3345_v17 }
 0x3cf   :  { %v1502_v56 = vpop.f32.mrb[28].mxu1  ;;  %v3695_v13 = vpop.f32.mrb[52].mxu0  ;;  %4148 = vpow2.f32 %v3348_v55 }
 0x3d0   :  { %v3893_v18 = vadd.f32 %v1502_v56, %v5169_v24  ;;  %v1504_v29 = vpop.f32.mrb[29].mxu1  ;;  %v1545_v41 = vpop.f32.mrb[53].mxu0 }
 0x3d1   :  { %v1506_v21 = vpop.f32.mrb[30].mxu1  ;;  %v3696_v52 = vpop.f32.mrb[54].mxu0  ;;  %v3894_v16 = vadd.f32 %v1504_v29, %v5172_v49  ;;  %v1629_v25 = vadd.f32 %v5185_v45, %v1545_v41 }
 0x3d2   :  { %v3346_v2 = vmul.f32 -1.442695, %v3893_v18  ;;  %v3895_v35 = vadd.f32 %v1506_v21, %v5169_v24  ;;  %v1508_v36 = vpop.f32.mrb[31].mxu1  ;;  %v1548_v60 = vpop.f32.mrb[55].mxu0 }
 0x3d3   :  { %v3896_v15 = vadd.f32 %v1508_v36, %v5172_v49  ;;  %v3350_v12 = vmul.f32 -1.442695, %v3894_v16  ;;  %v1630_v56 = vadd.f32 %v5185_v45, %v1548_v60 }
 0x3d4   :  { %4150 = vpow2.f32 %v3346_v2  ;;  %v3347_v37 = vmul.f32 -1.442695, %v3895_v35  ;;  %v1631_v35 = vadd.f32 %v3695_v13, %v5185_v45 }
 0x3d5   :  { %4152 = vpow2.f32 %v3349_v5  ;;  %v3351_v10 = vmul.f32 -1.442695, %v3896_v15  ;;  %v1632_v15 = vadd.f32 %v3696_v52, %v5185_v45 }
 0x3d6   :  { %v4145_v26 = vpop.eup %4144  ;;  %4154 = vpow2.f32 %v3347_v37 }
 0x3d7   :  { %v1589_v43 = vadd.f32 1.0, %v4145_v26 }
 0x3d8   :  { %v4147_v53 = vpop.eup %4146 }
 0x3d9   :  { %4156 = vrcp.f32 %v1589_v43  ;;  %v1590_v54 = vadd.f32 1.0, %v4147_v53  ;;  %v4149_v31 = vpop.eup %4148 }
 0x3da   :  { %4158 = vpow2.f32 %v3350_v12  ;;  %v1617_v3 = vadd.f32 1.0, %v4149_v31 }
 0x3db   :  { %4160 = vrcp.f32 %v1590_v54 }
 0x3dc   :  { %4162 = vpow2.f32 %v3351_v10 }
 0x3de   :  { %v4151_v44 = vpop.eup %4150 }
 0x3df   :  { %v4153_v48 = vpop.eup %4152  ;;  %v1591_v58 = vadd.f32 1.0, %v4151_v44 }
 0x3e0   :  { %v4155_v62 = vpop.eup %4154  ;;  %v1618_v22 = vadd.f32 1.0, %v4153_v48 }
 0x3e1   :  { %4164 = vrcp.f32 %v1591_v58  ;;  %v1592_v20 = vadd.f32 1.0, %v4155_v62 }
 0x3e3   :  { %v4157_v17 = vpop.eup %4156  ;;  %4166 = vrcp.f32 %v1592_v20 }
 0x3e4   :  { %v4159_v32 = vpop.eup %4158  ;;  %4168 = vrcp.f32 %v1617_v3  ;;  %v1633_v55 = vmul.f32 %v4157_v17, %v1629_v25 }
 0x3e5   :  { %v4161_v18 = vpop.eup %4160  ;;  %4170 = vrcp.f32 %v1618_v22  ;;  %v1619_v2 = vadd.f32 1.0, %v4159_v32  ;;  %v5289_v32 = vld [vmem:[#allocation12] ss:$12 sps:$4 sm:$0xff]  }
 0x3e6   :  { %v1637_v29 = vadd.f32 %v1633_v55, %v5082_v8  ;;  %v1634_v5 = vmul.f32 %v4161_v18, %v1630_v56  ;;  %v4163_v21 = vpop.eup %4162 }
 0x3e7   :  { %v1620_v41 = vadd.f32 1.0, %v4163_v21  ;;  %v5300_v21 = vld [vmem:[#allocation12 + $0x18] ss:$12 sps:$4 sm:$0xff]  }
 0x3e8   :  { %4172 = vtanh.f32 %v1637_v29  ;;  %v1638_v16 = vadd.f32 %v1634_v5, %v5088_v14  ;;  %v5295_v29 = vld [vmem:[#allocation12 + $0x1c] ss:$12 sps:$4 sm:$0xff]  }
 0x3ea   :  { %4174 = vtanh.f32 %v1638_v16  ;;  %v5315_v16 = vld [vmem:[#allocation12 + $0x8] ss:$12 sps:$4 sm:$0xff]  }
 0x3eb   :  { %v4165_v36 = vpop.eup %4164  ;;  %4176 = vrcp.f32 %v1619_v2  ;;  %v5307_v2 = vld [vmem:[#allocation12 + $0x34] ss:$12 sps:$4 sm:$0xff]  }
 0x3ec   :  { %v1635_v37 = vmul.f32 %v4165_v36, %v1631_v35  ;;  %4178 = vrcp.f32 %v1620_v41  ;;  %v5318_v35 = vld [vmem:[#allocation12 + $0x4c] ss:$12 sps:$4 sm:$0xff]  }
 0x3ed   :  { %v4167_v60 = vpop.eup %4166  ;;  %v5321_v41 = vld [vmem:[#allocation12 + $0x20] ss:$12 sps:$4 sm:$0xff]   ;;  %v5328_v36 = vld [vmem:[#allocation12 + $0x38] ss:$12 sps:$4 sm:$0xff]  }
 0x3ee   :  { %v4169_v26 = vpop.eup %4168  ;;  %v1639_v12 = vadd.f32 %v1635_v37, %v5079_v6  ;;  %v1636_v8 = vmul.f32 %v4167_v60, %v1632_v15  ;;  %v5334_v37 = vld [vmem:[#allocation12 + $0x50] ss:$12 sps:$4 sm:$0xff]  }
 0x3ef   :  { %v4171_v43 = vpop.eup %4170  ;;  %v1645_v14 = vsub.f32 1.0, %v4169_v26  ;;  %v1653_v13 = vmul.f32 %v4169_v26, %v5203_v38 }
 0x3f0   :  { %4180 = vtanh.f32 %v1639_v12  ;;  %v1640_v53 = vadd.f32 %v1636_v8, %v5085_v11  ;;  %v1646_v10 = vsub.f32 1.0, %v4171_v43  ;;  %v1654_v52 = vmul.f32 %v4171_v43, %v5205_v4 }
 0x3f2   :  { %v4173_v54 = vpop.eup %4172  ;;  %4182 = vtanh.f32 %v1640_v53 }
 0x3f3   :  { %v1649_v31 = vmul.f32 %v4173_v54, %v1645_v14 }
 0x3f4   :  { %v4175_v44 = vpop.eup %4174 }
 0x3f5   :  { %v1650_v48 = vmul.f32 %v4175_v44, %v1646_v10  ;;  %v5277_v58 = vadd.f32 %v1653_v13, %v1649_v31  ;;  %v4177_v6 = vpop.eup %4176 }
 0x3f6   :  { %v4179_v3 = vpop.eup %4178  ;;  %v1647_v20 = vsub.f32 1.0, %v4177_v6  ;;  %v1655_v4 = vmul.f32 %v4177_v6, %v5217_v57 }
 0x3f7   :  { %v5279_v62 = vadd.f32 %v1654_v52, %v1650_v48  ;;  %v1648_v38 = vsub.f32 1.0, %v4179_v3  ;;  %v1656_v56 = vmul.f32 %v4179_v3, %v5220_v63  ;;  %v5312_v63 = vld [vmem:[#allocation12 + $0x30] ss:$12 sps:$4 sm:$0xff]  }
 0x3f9   :  { %v5283_v11 = vpack.c.bf16 %v5279_v62, %v5277_v58 }
 0x3fa   :  { %v4181_v22 = vpop.eup %4180 }
 0x3fb   :  { %1701 = vmatmul.mubr.bf16.vlgmr.msra.gmra.mrb[32].mxu1 %v5283_v11  ;;  %3713 = vmatprep.mubr.bf16.mxu0 %v5283_v11  ;;  %v1651_v25 = vmul.f32 %v4181_v22, %v1647_v20 }
 0x3fc   :  { %v4183_v17 = vpop.eup %4182  ;;  %1710 = vmatprep.mubr.bf16.mxu1 %v5837_v0  ;;  %1879 = vmatpush1.bf16.msra.mxu1 %v5289_v32 }
 0x3fd   :  { %v1652_v55 = vmul.f32 %v4183_v17, %v1648_v38  ;;  %v5293_v18 = vadd.f32 %v1655_v4, %v1651_v25  ;;  %1880 = vmatprep.subr.bf16.mxu1 %v5295_v29 }
 0x3ff   :  { %v5298_v5 = vadd.f32 %v1656_v56, %v1652_v55 }
 0x400   :  { %1881 = vmatpush1.bf16.msra.mxu1 %v5300_v21 }
 0x401   :  { %v5305_v57 = vpack.c.bf16 %v5298_v5, %v5293_v18  ;;  %1882 = vmatprep.subr.bf16.mxu1 %v5307_v2 }
 0x403   :  { %1711 = vmatmul.mubr.bf16.gmra.mrb[36].mxu1 %v5305_v57  ;;  %3714 = vmatmul.mubr.bf16.vlgmr.msra.gmra.mrb[56].mxu0 %v5305_v57 }
 0x404   :  { %1883 = vmatpush1.bf16.msra.mxu1 %v5312_v63  ;;  %3718 = vmatpush3.bf16.msra.mxu0 %v5315_v16 }
 0x405   :  { %1884 = vmatprep.subr.bf16.mxu1 %v5318_v35  ;;  %3719 = vmatprep.subr.bf16.mxu0 %v5321_v41 }
 0x406   :  { %1910 = vmatprep.mubr.bf16.mxu1 %v5837_v0 }
 0x408   :  { %1885 = vmatpush1.bf16.msra.mxu1 %v4906_v40  ;;  %3720 = vmatpush3.bf16.msra.mxu0 %v5321_v41  ;;  %v5348_v40 = vld [vmem:[#allocation12 + $0x4] ss:$12 sps:$4 sm:$0xff]  }
 0x409   :  { %1886 = vmatprep.subr.bf16.mxu1 %v4911_v46  ;;  %3721 = vmatprep.subr.bf16.mxu0 %v5328_v36 }
 0x40c   :  { %1887 = vmatpush1.bf16.msra.mxu1 %v4921_v59  ;;  %3722 = vmatpush3.bf16.msra.mxu0 %v5328_v36 }
 0x40d   :  { %1888 = vmatprep.subr.bf16.mxu1 %v4929_v1  ;;  %3723 = vmatprep.subr.bf16.mxu0 %v5334_v37 }
 0x410   :  { %1889 = vmatpush1.bf16.msra.mxu1 %v4945_v27  ;;  %3724 = vmatpush3.bf16.msra.mxu0 %v5334_v37 }
 0x411   :  { %1890 = vmatprep.subr.bf16.mxu1 %v4950_v33  ;;  %3725 = vmatprep.subr.bf16.mxu0 %v4925_v61 }
 0x414   :  { %1891 = vmatpush1.bf16.msra.mxu1 %v4956_v42  ;;  %3726 = vmatpush3.bf16.msra.mxu0 %v4925_v61 }
 0x415   :  { %1892 = vmatprep.subr.bf16.mxu1 %v4963_v19  ;;  %3727 = vmatprep.subr.bf16.mxu0 %v4937_v9 }
 0x418   :  { %1893 = vmatpush1.bf16.msra.mxu1 %v4974_v51  ;;  %3728 = vmatpush3.bf16.msra.mxu0 %v4937_v9 }
 0x419   :  { %3729 = vmatprep.subr.bf16.mxu0 %v4966_v47  ;;  %2088 = vmatprep.subr.bf16.mxu1 %v5348_v40 }
 0x41c   :  { %3730 = vmatpush3.bf16.msra.mxu0 %v4966_v47 }
 0x41d   :  { %3731 = vmatprep.subr.bf16.mxu0 %v4970_v50 }
 0x420   :  { %3732 = vmatpush3.bf16.msra.mxu0 %v4970_v50 }
 0x421   :  { %3737 = vmatprep.subr.bf16.mxu0 %v5315_v16 }
 0x4ce   :  { %v1702_v46 = vpop.f32.mrb[32].mxu1 }
 0x4cf   :  { %v3897_v59 = vadd.f32 %v1702_v46, %v5169_v24  ;;  %v1704_v61 = vpop.f32.mrb[33].mxu1 }
 0x4d0   :  { %v1706_v1 = vpop.f32.mrb[34].mxu1  ;;  %v3898_v42 = vadd.f32 %v1704_v61, %v5172_v49 }
 0x4d1   :  { %v3352_v9 = vmul.f32 -1.442695, %v3897_v59  ;;  %v3899_v27 = vadd.f32 %v1706_v1, %v5169_v24  ;;  %v1708_v33 = vpop.f32.mrb[35].mxu1 }
 0x4d2   :  { %v3900_v47 = vadd.f32 %v1708_v33, %v5172_v49  ;;  %v3356_v51 = vmul.f32 -1.442695, %v3898_v42 }
 0x4d3   :  { %4184 = vpow2.f32 %v3352_v9  ;;  %v3353_v19 = vmul.f32 -1.442695, %v3899_v27 }
 0x4d4   :  { %v3357_v8 = vmul.f32 -1.442695, %v3900_v47 }
 0x4d5   :  { %4186 = vpow2.f32 %v3353_v19 }
 0x4d6   :  { %v1712_v50 = vpop.f32.mrb[36].mxu1  ;;  %v3715_v15 = vpop.f32.mrb[56].mxu0  ;;  %4188 = vpow2.f32 %v3356_v51 }
 0x4d7   :  { %v3901_v60 = vadd.f32 %v1712_v50, %v5169_v24  ;;  %v1714_v26 = vpop.f32.mrb[37].mxu1  ;;  %v1755_v12 = vpop.f32.mrb[57].mxu0 }
 0x4d8   :  { %v1716_v43 = vpop.f32.mrb[38].mxu1  ;;  %v3716_v53 = vpop.f32.mrb[58].mxu0  ;;  %v3902_v54 = vadd.f32 %v1714_v26, %v5172_v49  ;;  %v1839_v1 = vadd.f32 %v5185_v45, %v1755_v12 }
 0x4d9   :  { %v3354_v14 = vmul.f32 -1.442695, %v3901_v60  ;;  %v3903_v13 = vadd.f32 %v1716_v43, %v5169_v24  ;;  %v1718_v10 = vpop.f32.mrb[39].mxu1  ;;  %v1758_v31 = vpop.f32.mrb[59].mxu0 }
 0x4da   :  { %v3904_v52 = vadd.f32 %v1718_v10, %v5172_v49  ;;  %v3358_v6 = vmul.f32 -1.442695, %v3902_v54  ;;  %v1840_v42 = vadd.f32 %v5185_v45, %v1758_v31  ;;  %v1842_v54 = vadd.f32 %v3716_v53, %v5185_v45 }
 0x4db   :  { %4190 = vpow2.f32 %v3354_v14  ;;  %v3355_v44 = vmul.f32 -1.442695, %v3903_v13 }
 0x4dc   :  { %4192 = vpow2.f32 %v3357_v8  ;;  %v3359_v38 = vmul.f32 -1.442695, %v3904_v52  ;;  %v1841_v8 = vadd.f32 %v3715_v15, %v5185_v45 }
 0x4dd   :  { %v4185_v48 = vpop.eup %4184  ;;  %4194 = vpow2.f32 %v3355_v44 }
 0x4de   :  { %v1799_v3 = vadd.f32 1.0, %v4185_v48 }
 0x4df   :  { %v4187_v20 = vpop.eup %4186 }
 0x4e0   :  { %4196 = vrcp.f32 %v1799_v3  ;;  %v1800_v22 = vadd.f32 1.0, %v4187_v20  ;;  %v4189_v25 = vpop.eup %4188 }
 0x4e1   :  { %4198 = vpow2.f32 %v3358_v6  ;;  %v1827_v46 = vadd.f32 1.0, %v4189_v25 }
 0x4e2   :  { %4200 = vrcp.f32 %v1800_v22 }
 0x4e3   :  { %4202 = vpow2.f32 %v3359_v38 }
 0x4e5   :  { %v4191_v4 = vpop.eup %4190 }
 0x4e6   :  { %v4193_v17 = vpop.eup %4192  ;;  %v1801_v55 = vadd.f32 1.0, %v4191_v4 }
 0x4e7   :  { %v4195_v56 = vpop.eup %4194  ;;  %v1828_v61 = vadd.f32 1.0, %v4193_v17 }
 0x4e8   :  { %4204 = vrcp.f32 %v1801_v55  ;;  %v1802_v59 = vadd.f32 1.0, %v4195_v56 }
 0x4ea   :  { %v4197_v9 = vpop.eup %4196  ;;  %4206 = vrcp.f32 %v1802_v59 }
 0x4eb   :  { %v4199_v27 = vpop.eup %4198  ;;  %4208 = vrcp.f32 %v1827_v46  ;;  %v1843_v33 = vmul.f32 %v4197_v9, %v1839_v1 }
 0x4ec   :  { %v4201_v19 = vpop.eup %4200  ;;  %4210 = vrcp.f32 %v1828_v61  ;;  %v1829_v60 = vadd.f32 1.0, %v4199_v27 }
 0x4ed   :  { %v1847_v47 = vadd.f32 %v1843_v33, %v5094_v28  ;;  %v1844_v51 = vmul.f32 %v4201_v19, %v1840_v42  ;;  %v4203_v50 = vpop.eup %4202  ;;  %v5413_v33 = vld [vmem:[#allocation12 + $0x60] ss:$12 sps:$4 sm:$0xff]   ;;  %v5417_v42 = vld [vmem:[#allocation12 + $0x7c] ss:$12 sps:$4 sm:$0xff]   ;;  %v5421_v19 = vld [vmem:[#allocation12 + $0x78] ss:$12 sps:$4 sm:$0xff]  }
 0x4ee   :  { %v1830_v12 = vadd.f32 1.0, %v4203_v50  ;;  %v5431_v50 = vld [vmem:[#allocation12 + $0x90] ss:$12 sps:$4 sm:$0xff]  }
 0x4ef   :  { %4212 = vtanh.f32 %v1847_v47  ;;  %v1848_v26 = vadd.f32 %v1844_v51, %v5100_v34  ;;  %v5425_v47 = vld [vmem:[#allocation12 + $0x94] ss:$12 sps:$4 sm:$0xff]  }
 0x4f0   :  { %v5428_v51 = vld [vmem:[#allocation12 + $0x68] ss:$12 sps:$4 sm:$0xff]  }
 0x4f1   :  { %4214 = vtanh.f32 %v1848_v26  ;;  %v5438_v26 = vld [vmem:[#allocation12 + $0x80] ss:$12 sps:$4 sm:$0xff]  }
 0x4f2   :  { %v4205_v43 = vpop.eup %4204  ;;  %4216 = vrcp.f32 %v1829_v60  ;;  %v5435_v60 = vld [vmem:[#allocation12 + $0xac] ss:$12 sps:$4 sm:$0xff]  }
 0x4f3   :  { %v1845_v14 = vmul.f32 %v4205_v43, %v1841_v8  ;;  %4218 = vrcp.f32 %v1830_v12  ;;  %v5441_v8 = vld [vmem:[#allocation12 + $0xa8] ss:$12 sps:$4 sm:$0xff]   ;;  %v5445_v12 = vld [vmem:[#allocation12 + $0x98] ss:$12 sps:$4 sm:$0xff]   ;;  %v5450_v43 = vld [vmem:[#allocation12 + $0xb0] ss:$12 sps:$4 sm:$0xff]  }
 0x4f4   :  { %v4207_v13 = vpop.eup %4206 }
 0x4f5   :  { %v4209_v10 = vpop.eup %4208  ;;  %v1849_v31 = vadd.f32 %v1845_v14, %v5091_v23  ;;  %v1846_v28 = vmul.f32 %v4207_v13, %v1842_v54 }
 0x4f6   :  { %v4211_v44 = vpop.eup %4210  ;;  %v1855_v34 = vsub.f32 1.0, %v4209_v10  ;;  %v1863_v15 = vmul.f32 %v4209_v10, %v5277_v58 }
 0x4f7   :  { %4220 = vtanh.f32 %v1849_v31  ;;  %v1850_v52 = vadd.f32 %v1846_v28, %v5097_v30  ;;  %v1856_v6 = vsub.f32 1.0, %v4211_v44  ;;  %v1864_v53 = vmul.f32 %v4211_v44, %v5279_v62 }
 0x4f9   :  { %v4213_v48 = vpop.eup %4212  ;;  %4222 = vtanh.f32 %v1850_v52 }
 0x4fa   :  { %v1859_v3 = vmul.f32 %v4213_v48, %v1855_v34 }
 0x4fb   :  { %v4215_v20 = vpop.eup %4214 }
 0x4fc   :  { %v1860_v22 = vmul.f32 %v4215_v20, %v1856_v6  ;;  %v5373_v38 = vadd.f32 %v1863_v15, %v1859_v3  ;;  %v4217_v23 = vpop.eup %4216 }
 0x4fd   :  { %v4219_v4 = vpop.eup %4218  ;;  %v1857_v17 = vsub.f32 1.0, %v4217_v23  ;;  %v1865_v62 = vmul.f32 %v4217_v23, %v5293_v18  ;;  %v5405_v18 = vld [vmem:[#allocation12 + $0x48] ss:$12 sps:$4 sm:$0xff]  }
 0x4fe   :  { %v5375_v25 = vadd.f32 %v1864_v53, %v1860_v22  ;;  %v1858_v58 = vsub.f32 1.0, %v4219_v4  ;;  %v1866_v61 = vmul.f32 %v4219_v4, %v5298_v5  ;;  %v5409_v5 = vld [vmem:[#allocation12 + $0x64] ss:$12 sps:$4 sm:$0xff]  }
 0x500   :  { %v5379_v30 = vpack.c.bf16 %v5375_v25, %v5373_v38 }
 0x501   :  { %v4221_v55 = vpop.eup %4220 }
 0x502   :  { %1911 = vmatmul.mubr.bf16.vlgmr.msra.gmra.mrb[40].mxu1 %v5379_v30  ;;  %3733 = vmatprep.mubr.bf16.mxu0 %v5379_v30  ;;  %v1861_v56 = vmul.f32 %v4221_v55, %v1857_v17 }
 0x503   :  { %v4223_v46 = vpop.eup %4222  ;;  %1920 = vmatprep.mubr.bf16.mxu1 %v5837_v0  ;;  %2089 = vmatpush1.bf16.msra.mxu1 %v5289_v32 }
 0x504   :  { %v1862_v59 = vmul.f32 %v4223_v46, %v1858_v58  ;;  %v5387_v1 = vadd.f32 %v1865_v62, %v1861_v56  ;;  %2090 = vmatprep.subr.bf16.mxu1 %v5295_v29 }
 0x506   :  { %v5390_v9 = vadd.f32 %v1866_v61, %v1862_v59 }
 0x507   :  { %2091 = vmatpush1.bf16.msra.mxu1 %v5300_v21 }
 0x508   :  { %v5395_v27 = vpack.c.bf16 %v5390_v9, %v5387_v1  ;;  %2092 = vmatprep.subr.bf16.mxu1 %v5307_v2 }
 0x50a   :  { %1921 = vmatmul.mubr.bf16.gmra.mrb[44].mxu1 %v5395_v27  ;;  %3734 = vmatmul.mubr.bf16.vlgmr.msra.gmra.mrb[60].mxu0 %v5395_v27 }
 0x50b   :  { %2093 = vmatpush1.bf16.msra.mxu1 %v5312_v63  ;;  %3738 = vmatpush3.bf16.msra.mxu0 %v5315_v16 }
 0x50c   :  { %2094 = vmatprep.subr.bf16.mxu1 %v5318_v35  ;;  %3739 = vmatprep.subr.bf16.mxu0 %v5321_v41 }
 0x50d   :  { %2120 = vmatprep.mubr.bf16.mxu1 %v5837_v0 }
 0x50f   :  { %2095 = vmatpush1.bf16.msra.mxu1 %v5405_v18  ;;  %3740 = vmatpush3.bf16.msra.mxu0 %v5321_v41 }
 0x510   :  { %2096 = vmatprep.subr.bf16.mxu1 %v5409_v5  ;;  %3741 = vmatprep.subr.bf16.mxu0 %v5328_v36 }
 0x513   :  { %2097 = vmatpush1.bf16.msra.mxu1 %v5413_v33  ;;  %3742 = vmatpush3.bf16.msra.mxu0 %v5328_v36 }
 0x514   :  { %2098 = vmatprep.subr.bf16.mxu1 %v5417_v42  ;;  %3743 = vmatprep.subr.bf16.mxu0 %v5334_v37 }
 0x517   :  { %2099 = vmatpush1.bf16.msra.mxu1 %v5421_v19  ;;  %3744 = vmatpush3.bf16.msra.mxu0 %v5334_v37 }
 0x518   :  { %2100 = vmatprep.subr.bf16.mxu1 %v5425_v47  ;;  %3745 = vmatprep.subr.bf16.mxu0 %v5428_v51 }
 0x51b   :  { %2101 = vmatpush1.bf16.msra.mxu1 %v5431_v50  ;;  %3746 = vmatpush3.bf16.msra.mxu0 %v5428_v51 }
 0x51c   :  { %2102 = vmatprep.subr.bf16.mxu1 %v5435_v60  ;;  %3747 = vmatprep.subr.bf16.mxu0 %v5438_v26 }
 0x51f   :  { %2103 = vmatpush1.bf16.msra.mxu1 %v5441_v8  ;;  %3748 = vmatpush3.bf16.msra.mxu0 %v5438_v26 }
 0x520   :  { %3749 = vmatprep.subr.bf16.mxu0 %v5445_v12  ;;  %2298 = vmatprep.subr.bf16.mxu1 %v5348_v40 }
 0x523   :  { %3750 = vmatpush3.bf16.msra.mxu0 %v5445_v12 }
 0x524   :  { %3751 = vmatprep.subr.bf16.mxu0 %v5450_v43 }
 0x527   :  { %3752 = vmatpush3.bf16.msra.mxu0 %v5450_v43 }
 0x528   :  { %3757 = vmatprep.subr.bf16.mxu0 %v5315_v16 }
 0x5d5   :  { %v1912_v14 = vpop.f32.mrb[40].mxu1 }
 0x5d6   :  { %v3905_v54 = vadd.f32 %v1912_v14, %v5169_v24  ;;  %v1914_v13 = vpop.f32.mrb[41].mxu1 }
 0x5d7   :  { %v1916_v10 = vpop.f32.mrb[42].mxu1  ;;  %v3906_v52 = vadd.f32 %v1914_v13, %v5172_v49 }
 0x5d8   :  { %v3360_v31 = vmul.f32 -1.442695, %v3905_v54  ;;  %v3907_v28 = vadd.f32 %v1916_v10, %v5169_v24  ;;  %v1918_v44 = vpop.f32.mrb[43].mxu1 }
 0x5d9   :  { %v3908_v48 = vadd.f32 %v1918_v44, %v5172_v49  ;;  %v3364_v15 = vmul.f32 -1.442695, %v3906_v52 }
 0x5da   :  { %4224 = vpow2.f32 %v3360_v31  ;;  %v3361_v34 = vmul.f32 -1.442695, %v3907_v28 }
 0x5db   :  { %v3365_v23 = vmul.f32 -1.442695, %v3908_v48 }
 0x5dc   :  { %4226 = vpow2.f32 %v3361_v34 }
 0x5dd   :  { %v1922_v6 = vpop.f32.mrb[44].mxu1  ;;  %v3735_v3 = vpop.f32.mrb[60].mxu0  ;;  %4228 = vpow2.f32 %v3364_v15 }
 0x5de   :  { %v3909_v20 = vadd.f32 %v1922_v6, %v5169_v24  ;;  %v1924_v53 = vpop.f32.mrb[45].mxu1  ;;  %v1965_v22 = vpop.f32.mrb[61].mxu0 }
 0x5df   :  { %v1926_v4 = vpop.f32.mrb[46].mxu1  ;;  %v3736_v17 = vpop.f32.mrb[62].mxu0  ;;  %v3910_v58 = vadd.f32 %v1924_v53, %v5172_v49 }
 0x5e0   :  { %v3362_v55 = vmul.f32 -1.442695, %v3909_v20  ;;  %v3911_v56 = vadd.f32 %v1926_v4, %v5169_v24  ;;  %v1928_v62 = vpop.f32.mrb[47].mxu1  ;;  %v1968_v46 = vpop.f32.mrb[63].mxu0 }
 0x5e1   :  { %v3912_v61 = vadd.f32 %v1928_v62, %v5172_v49  ;;  %v3366_v54 = vmul.f32 -1.442695, %v3910_v58 }
 0x5e2   :  { %4230 = vpow2.f32 %v3362_v55  ;;  %v3363_v59 = vmul.f32 -1.442695, %v3911_v56  ;;  %v2050_v56 = vadd.f32 %v5185_v45, %v1968_v46 }
 0x5e3   :  { %4232 = vpow2.f32 %v3365_v23  ;;  %v3367_v28 = vmul.f32 -1.442695, %v3912_v61  ;;  %v2049_v23 = vadd.f32 %v5185_v45, %v1965_v22 }
 0x5e4   :  { %v4225_v14 = vpop.eup %4224  ;;  %4234 = vpow2.f32 %v3363_v59  ;;  %v5838_v59 = vld [vmem:[#allocation25_spill] sm:$0xff] }
 0x5e5   :  { %v2009_v13 = vadd.f32 1.0, %v4225_v14 }
 0x5e6   :  { %v4227_v10 = vpop.eup %4226 }
 0x5e7   :  { %4236 = vrcp.f32 %v2009_v13  ;;  %v2010_v31 = vadd.f32 1.0, %v4227_v10  ;;  %v4229_v44 = vpop.eup %4228  ;;  %v5839_v10 = vld [vmem:[#allocation27_spill] sm:$0xff] }
 0x5e8   :  { %4238 = vpow2.f32 %v3366_v54  ;;  %v2037_v6 = vadd.f32 1.0, %v4229_v44 }
 0x5e9   :  { %4240 = vrcp.f32 %v2010_v31 }
 0x5ea   :  { %4242 = vpow2.f32 %v3367_v28  ;;  %v2051_v28 = vadd.f32 %v3735_v3, %v5185_v45 }
 0x5ec   :  { %v4231_v52 = vpop.eup %4230 }
 0x5ed   :  { %v4233_v34 = vpop.eup %4232  ;;  %v2011_v48 = vadd.f32 1.0, %v4231_v52 }
 0x5ee   :  { %v4235_v15 = vpop.eup %4234  ;;  %v2038_v53 = vadd.f32 1.0, %v4233_v34  ;;  %v2052_v34 = vadd.f32 %v3736_v17, %v5185_v45 }
 0x5ef   :  { %4244 = vrcp.f32 %v2011_v48  ;;  %v2012_v20 = vadd.f32 1.0, %v4235_v15  ;;  %v5840_v15 = vld [vmem:[#allocation24_spill] sm:$0xff] }
 0x5f1   :  { %v4237_v4 = vpop.eup %4236  ;;  %4246 = vrcp.f32 %v2012_v20 }
 0x5f2   :  { %v4239_v55 = vpop.eup %4238  ;;  %4248 = vrcp.f32 %v2037_v6  ;;  %v2053_v58 = vmul.f32 %v4237_v4, %v2049_v23  ;;  %v5841_v23 = vld [vmem:[#allocation26_spill] sm:$0xff] }
 0x5f3   :  { %v4241_v62 = vpop.eup %4240  ;;  %4250 = vrcp.f32 %v2038_v53  ;;  %v2039_v13 = vadd.f32 1.0, %v4239_v55 }
 0x5f4   :  { %v2057_v61 = vadd.f32 %v2053_v58, %v5838_v59  ;;  %v2054_v14 = vmul.f32 %v4241_v62, %v2050_v56  ;;  %v4243_v54 = vpop.eup %4242 }
 0x5f5   :  { %v2040_v22 = vadd.f32 1.0, %v4243_v54 }
 0x5f6   :  { %4252 = vtanh.f32 %v2057_v61  ;;  %v2058_v31 = vadd.f32 %v2054_v14, %v5839_v10 }
 0x5f8   :  { %4254 = vtanh.f32 %v2058_v31 }
 0x5f9   :  { %v4245_v44 = vpop.eup %4244  ;;  %4256 = vrcp.f32 %v2039_v13 }
 0x5fa   :  { %v2055_v52 = vmul.f32 %v4245_v44, %v2051_v28  ;;  %4258 = vrcp.f32 %v2040_v22 }
 0x5fb   :  { %v4247_v46 = vpop.eup %4246 }
 0x5fc   :  { %v4249_v48 = vpop.eup %4248  ;;  %v2059_v6 = vadd.f32 %v2055_v52, %v5840_v15  ;;  %v2056_v20 = vmul.f32 %v4247_v46, %v2052_v34 }
 0x5fd   :  { %v4251_v53 = vpop.eup %4250  ;;  %v2065_v55 = vsub.f32 1.0, %v4249_v48  ;;  %v2073_v3 = vmul.f32 %v4249_v48, %v5373_v38 }
 0x5fe   :  { %4260 = vtanh.f32 %v2059_v6  ;;  %v2060_v4 = vadd.f32 %v2056_v20, %v5841_v23  ;;  %v2066_v56 = vsub.f32 1.0, %v4251_v53  ;;  %v2074_v45 = vmul.f32 %v4251_v53, %v5375_v25 }
 0x600   :  { %v4253_v58 = vpop.eup %4252  ;;  %4262 = vtanh.f32 %v2060_v4 }
 0x601   :  { %v2069_v62 = vmul.f32 %v4253_v58, %v2065_v55 }
 0x602   :  { %v4255_v59 = vpop.eup %4254 }
 0x603   :  { %v2070_v17 = vmul.f32 %v4255_v59, %v2066_v56  ;;  %v5473_v61 = vadd.f32 %v2073_v3, %v2069_v62  ;;  %v4257_v14 = vpop.eup %4256 }
 0x604   :  { %v4259_v13 = vpop.eup %4258  ;;  %v2067_v31 = vsub.f32 1.0, %v4257_v14  ;;  %v2075_v25 = vmul.f32 %v4257_v14, %v5387_v1 }
 0x605   :  { %v5475_v54 = vadd.f32 %v2074_v45, %v2070_v17  ;;  %v2068_v38 = vsub.f32 1.0, %v4259_v13  ;;  %v2076_v34 = vmul.f32 %v4259_v13, %v5390_v9 }
 0x607   :  { %v5479_v10 = vpack.c.bf16 %v5475_v54, %v5473_v61 }
 0x608   :  { %v4261_v28 = vpop.eup %4260 }
 0x609   :  { %2121 = vmatmul.mubr.bf16.vlgmr.msra.gmra.mrb[48].mxu1 %v5479_v10  ;;  %3753 = vmatprep.mubr.bf16.mxu0 %v5479_v10  ;;  %v2071_v22 = vmul.f32 %v4261_v28, %v2067_v31 }
 0x60a   :  { %v4263_v44 = vpop.eup %4262  ;;  %2130 = vmatprep.mubr.bf16.mxu1 %v5837_v0  ;;  %2299 = vmatpush1.bf16.msra.mxu1 %v5289_v32 }
 0x60b   :  { %v2072_v52 = vmul.f32 %v4263_v44, %v2068_v38  ;;  %v5487_v46 = vadd.f32 %v2075_v25, %v2071_v22  ;;  %2300 = vmatprep.subr.bf16.mxu1 %v5295_v29 }
 0x60d   :  { %v5490_v48 = vadd.f32 %v2076_v34, %v2072_v52 }
 0x60e   :  { %2301 = vmatpush1.bf16.msra.mxu1 %v5300_v21 }
 0x60f   :  { %v5495_v15 = vpack.c.bf16 %v5490_v48, %v5487_v46  ;;  %2302 = vmatprep.subr.bf16.mxu1 %v5307_v2 }
 0x611   :  { %2131 = vmatmul.mubr.bf16.gmra.mrb[52].mxu1 %v5495_v15  ;;  %3754 = vmatmul.mubr.bf16.vlgmr.msra.gmra.mrb[64].mxu0 %v5495_v15 }
 0x612   :  { %2303 = vmatpush1.bf16.msra.mxu1 %v5312_v63  ;;  %3758 = vmatpush3.bf16.msra.mxu0 %v5315_v16 }
 0x613   :  { %2304 = vmatprep.subr.bf16.mxu1 %v5318_v35  ;;  %3759 = vmatprep.subr.bf16.mxu0 %v5321_v41 }
 0x614   :  { %2330 = vmatprep.mubr.bf16.mxu1 %v5837_v0 }
 0x616   :  { %2305 = vmatpush1.bf16.msra.mxu1 %v5405_v18  ;;  %3760 = vmatpush3.bf16.msra.mxu0 %v5321_v41 }
 0x617   :  { %2306 = vmatprep.subr.bf16.mxu1 %v5409_v5  ;;  %3761 = vmatprep.subr.bf16.mxu0 %v5328_v36 }
 0x61a   :  { %2307 = vmatpush1.bf16.msra.mxu1 %v5413_v33  ;;  %3762 = vmatpush3.bf16.msra.mxu0 %v5328_v36 }
 0x61b   :  { %2308 = vmatprep.subr.bf16.mxu1 %v5417_v42  ;;  %3763 = vmatprep.subr.bf16.mxu0 %v5334_v37 }
 0x61e   :  { %2309 = vmatpush1.bf16.msra.mxu1 %v5421_v19  ;;  %3764 = vmatpush3.bf16.msra.mxu0 %v5334_v37 }
 0x61f   :  { %2310 = vmatprep.subr.bf16.mxu1 %v5425_v47  ;;  %3765 = vmatprep.subr.bf16.mxu0 %v5428_v51 }
 0x622   :  { %2311 = vmatpush1.bf16.msra.mxu1 %v5431_v50  ;;  %3766 = vmatpush3.bf16.msra.mxu0 %v5428_v51 }
 0x623   :  { %2312 = vmatprep.subr.bf16.mxu1 %v5435_v60  ;;  %3767 = vmatprep.subr.bf16.mxu0 %v5438_v26 }
 0x626   :  { %2313 = vmatpush1.bf16.msra.mxu1 %v5441_v8  ;;  %3768 = vmatpush3.bf16.msra.mxu0 %v5438_v26 }
 0x627   :  { %3769 = vmatprep.subr.bf16.mxu0 %v5445_v12  ;;  %2508 = vmatprep.subr.bf16.mxu1 %v5348_v40 }
 0x62a   :  { %3770 = vmatpush3.bf16.msra.mxu0 %v5445_v12 }
 0x62b   :  { %3771 = vmatprep.subr.bf16.mxu0 %v5450_v43 }
 0x62e   :  { %3772 = vmatpush3.bf16.msra.mxu0 %v5450_v43 }
 0x62f   :  { %3777 = vmatprep.subr.bf16.mxu0 %v5315_v16 }
 0x6dc   :  { %v2122_v1 = vpop.f32.mrb[48].mxu1 }
 0x6dd   :  { %v3913_v9 = vadd.f32 %v2122_v1, %v5169_v24  ;;  %v2124_v6 = vpop.f32.mrb[49].mxu1 }
 0x6de   :  { %v2126_v20 = vpop.f32.mrb[50].mxu1  ;;  %v3914_v55 = vadd.f32 %v2124_v6, %v5172_v49 }
 0x6df   :  { %v3368_v53 = vmul.f32 -1.442695, %v3913_v9  ;;  %v3915_v23 = vadd.f32 %v2126_v20, %v5169_v24  ;;  %v2128_v4 = vpop.f32.mrb[51].mxu1 }
 0x6e0   :  { %v3916_v3 = vadd.f32 %v2128_v4, %v5172_v49  ;;  %v3372_v56 = vmul.f32 -1.442695, %v3914_v55 }
 0x6e1   :  { %4264 = vpow2.f32 %v3368_v53  ;;  %v3369_v58 = vmul.f32 -1.442695, %v3915_v23 }
 0x6e2   :  { %v3373_v13 = vmul.f32 -1.442695, %v3916_v3 }
 0x6e3   :  { %4266 = vpow2.f32 %v3369_v58 }
 0x6e4   :  { %v2132_v62 = vpop.f32.mrb[52].mxu1  ;;  %v3755_v59 = vpop.f32.mrb[64].mxu0  ;;  %4268 = vpow2.f32 %v3372_v56 }
 0x6e5   :  { %v3917_v45 = vadd.f32 %v2132_v62, %v5169_v24  ;;  %v2134_v17 = vpop.f32.mrb[53].mxu1  ;;  %v2175_v14 = vpop.f32.mrb[65].mxu0 }
 0x6e6   :  { %v2136_v31 = vpop.f32.mrb[54].mxu1  ;;  %v3756_v28 = vpop.f32.mrb[66].mxu0  ;;  %v3918_v22 = vadd.f32 %v2134_v17, %v5172_v49 }
 0x6e7   :  { %v3370_v38 = vmul.f32 -1.442695, %v3917_v45  ;;  %v3919_v25 = vadd.f32 %v2136_v31, %v5169_v24  ;;  %v2138_v44 = vpop.f32.mrb[55].mxu1  ;;  %v2178_v52 = vpop.f32.mrb[67].mxu0  ;;  %v5540_v31 = vld [vmem:[%s5810_s7] ss:$0 sm:$0xff] }
 0x6e8   :  { %v3920_v1 = vadd.f32 %v2138_v44, %v5172_v49  ;;  %v3374_v6 = vmul.f32 -1.442695, %v3918_v22 }
 0x6e9   :  { %4270 = vpow2.f32 %v3370_v38  ;;  %v3371_v34 = vmul.f32 -1.442695, %v3919_v25  ;;  %v2259_v38 = vadd.f32 %v5540_v31, %v2175_v14 }
 0x6ea   :  { %4272 = vpow2.f32 %v3373_v13  ;;  %v3375_v4 = vmul.f32 -1.442695, %v3920_v1 }
 0x6eb   :  { %v4265_v9 = vpop.eup %4264  ;;  %4274 = vpow2.f32 %v3371_v34  ;;  %v2260_v34 = vadd.f32 %v5540_v31, %v2178_v52 }
 0x6ec   :  { %v2219_v20 = vadd.f32 1.0, %v4265_v9  ;;  %v5842_v9 = vld [vmem:[#allocation29_spill] sm:$0xff] }
 0x6ed   :  { %v4267_v53 = vpop.eup %4266 }
 0x6ee   :  { %4276 = vrcp.f32 %v2219_v20  ;;  %v2220_v23 = vadd.f32 1.0, %v4267_v53  ;;  %v4269_v55 = vpop.eup %4268 }
 0x6ef   :  { %4278 = vpow2.f32 %v3374_v6  ;;  %v2247_v45 = vadd.f32 1.0, %v4269_v55 }
 0x6f0   :  { %4280 = vrcp.f32 %v2220_v23 }
 0x6f1   :  { %4282 = vpow2.f32 %v3375_v4  ;;  %v5843_v4 = vld [vmem:[#allocation31_spill] sm:$0xff] }
 0x6f3   :  { %v4271_v58 = vpop.eup %4270 }
 0x6f4   :  { %v4273_v3 = vpop.eup %4272  ;;  %v2221_v56 = vadd.f32 1.0, %v4271_v58  ;;  %v2261_v58 = vadd.f32 %v5540_v31, %v3755_v59 }
 0x6f5   :  { %v4275_v62 = vpop.eup %4274  ;;  %v2248_v13 = vadd.f32 1.0, %v4273_v3 }
 0x6f6   :  { %4284 = vrcp.f32 %v2221_v56  ;;  %v2222_v17 = vadd.f32 1.0, %v4275_v62  ;;  %v2262_v62 = vadd.f32 %v5540_v31, %v3756_v28 }
 0x6f8   :  { %v4277_v22 = vpop.eup %4276  ;;  %4286 = vrcp.f32 %v2222_v17  ;;  %v5844_v17 = vld [vmem:[#allocation28_spill] sm:$0xff] }
 0x6f9   :  { %v4279_v25 = vpop.eup %4278  ;;  %4288 = vrcp.f32 %v2247_v45  ;;  %v2263_v44 = vmul.f32 %v4277_v22, %v2259_v38 }
 0x6fa   :  { %v4281_v1 = vpop.eup %4280  ;;  %4290 = vrcp.f32 %v2248_v13  ;;  %v2249_v23 = vadd.f32 1.0, %v4279_v25  ;;  %v5845_v25 = vld [vmem:[#allocation30_spill] sm:$0xff] }
 0x6fb   :  { %v2267_v6 = vadd.f32 %v2263_v44, %v5842_v9  ;;  %v2264_v20 = vmul.f32 %v4281_v1, %v2260_v34  ;;  %v4283_v53 = vpop.eup %4282 }
 0x6fc   :  { %v2250_v14 = vadd.f32 1.0, %v4283_v53 }
 0x6fd   :  { %4292 = vtanh.f32 %v2267_v6  ;;  %v2268_v55 = vadd.f32 %v2264_v20, %v5843_v4 }
 0x6ff   :  { %4294 = vtanh.f32 %v2268_v55 }
 0x700   :  { %v4285_v3 = vpop.eup %4284  ;;  %4296 = vrcp.f32 %v2249_v23 }
 0x701   :  { %v2265_v56 = vmul.f32 %v4285_v3, %v2261_v58  ;;  %4298 = vrcp.f32 %v2250_v14 }
 0x702   :  { %v4287_v52 = vpop.eup %4286 }
 0x703   :  { %v4289_v45 = vpop.eup %4288  ;;  %v2269_v13 = vadd.f32 %v2265_v56, %v5844_v17  ;;  %v2266_v38 = vmul.f32 %v4287_v52, %v2262_v62 }
 0x704   :  { %v4291_v22 = vpop.eup %4290  ;;  %v2275_v34 = vsub.f32 1.0, %v4289_v45  ;;  %v2283_v59 = vmul.f32 %v4289_v45, %v5473_v61 }
 0x705   :  { %4300 = vtanh.f32 %v2269_v13  ;;  %v2270_v44 = vadd.f32 %v2266_v38, %v5845_v25  ;;  %v2276_v9 = vsub.f32 1.0, %v4291_v22  ;;  %v2284_v28 = vmul.f32 %v4291_v22, %v5475_v54 }
 0x707   :  { %v4293_v1 = vpop.eup %4292  ;;  %4302 = vtanh.f32 %v2270_v44 }
 0x708   :  { %v2279_v6 = vmul.f32 %v4293_v1, %v2275_v34 }
 0x709   :  { %v4295_v20 = vpop.eup %4294 }
 0x70a   :  { %v2280_v53 = vmul.f32 %v4295_v20, %v2276_v9  ;;  %v5552_v23 = vadd.f32 %v2283_v59, %v2279_v6  ;;  %v4297_v4 = vpop.eup %4296 }
 0x70b   :  { %v4299_v58 = vpop.eup %4298  ;;  %v2277_v3 = vsub.f32 1.0, %v4297_v4  ;;  %v2285_v54 = vmul.f32 %v4297_v4, %v5487_v46 }
 0x70c   :  { %v5554_v55 = vadd.f32 %v2284_v28, %v2280_v53  ;;  %v2278_v61 = vsub.f32 1.0, %v4299_v58  ;;  %v2286_v17 = vmul.f32 %v4299_v58, %v5490_v48 }
 0x70e   :  { %v5558_v14 = vpack.c.bf16 %v5554_v55, %v5552_v23 }
 0x70f   :  { %v4301_v56 = vpop.eup %4300 }
 0x710   :  { %2331 = vmatmul.mubr.bf16.vlgmr.msra.gmra.mrb[56].mxu1 %v5558_v14  ;;  %3773 = vmatprep.mubr.bf16.mxu0 %v5558_v14  ;;  %v2281_v62 = vmul.f32 %v4301_v56, %v2277_v3 }
 0x711   :  { %v4303_v52 = vpop.eup %4302  ;;  %2340 = vmatprep.mubr.bf16.mxu1 %v5837_v0  ;;  %2509 = vmatpush1.bf16.msra.mxu1 %v5289_v32 }
 0x712   :  { %v2282_v45 = vmul.f32 %v4303_v52, %v2278_v61  ;;  %v5566_v13 = vadd.f32 %v2285_v54, %v2281_v62  ;;  %2510 = vmatprep.subr.bf16.mxu1 %v5295_v29 }
 0x714   :  { %v5569_v38 = vadd.f32 %v2286_v17, %v2282_v45 }
 0x715   :  { %2511 = vmatpush1.bf16.msra.mxu1 %v5300_v21 }
 0x716   :  { %v5574_v22 = vpack.c.bf16 %v5569_v38, %v5566_v13  ;;  %2512 = vmatprep.subr.bf16.mxu1 %v5307_v2 }
 0x718   :  { %2341 = vmatmul.mubr.bf16.gmra.mrb[60].mxu1 %v5574_v22  ;;  %3774 = vmatmul.mubr.bf16.vlgmr.msra.gmra.mrb[68].mxu0 %v5574_v22 }
 0x719   :  { %2513 = vmatpush1.bf16.msra.mxu1 %v5312_v63  ;;  %3778 = vmatpush3.bf16.msra.mxu0 %v5315_v16 }
 0x71a   :  { %2514 = vmatprep.subr.bf16.mxu1 %v5318_v35  ;;  %3779 = vmatprep.subr.bf16.mxu0 %v5321_v41 }
 0x71b   :  { %2540 = vmatprep.mubr.bf16.mxu1 %v5837_v0 }
 0x71d   :  { %2515 = vmatpush1.bf16.msra.mxu1 %v5405_v18  ;;  %3780 = vmatpush3.bf16.msra.mxu0 %v5321_v41 }
 0x71e   :  { %2516 = vmatprep.subr.bf16.mxu1 %v5409_v5  ;;  %3781 = vmatprep.subr.bf16.mxu0 %v5328_v36 }
 0x721   :  { %2517 = vmatpush1.bf16.msra.mxu1 %v5413_v33  ;;  %3782 = vmatpush3.bf16.msra.mxu0 %v5328_v36 }
 0x722   :  { %2518 = vmatprep.subr.bf16.mxu1 %v5417_v42  ;;  %3783 = vmatprep.subr.bf16.mxu0 %v5334_v37 }
 0x725   :  { %2519 = vmatpush1.bf16.msra.mxu1 %v5421_v19  ;;  %3784 = vmatpush3.bf16.msra.mxu0 %v5334_v37 }
 0x726   :  { %2520 = vmatprep.subr.bf16.mxu1 %v5425_v47  ;;  %3785 = vmatprep.subr.bf16.mxu0 %v5428_v51 }
 0x729   :  { %2521 = vmatpush1.bf16.msra.mxu1 %v5431_v50  ;;  %3786 = vmatpush3.bf16.msra.mxu0 %v5428_v51 }
 0x72a   :  { %2522 = vmatprep.subr.bf16.mxu1 %v5435_v60  ;;  %3787 = vmatprep.subr.bf16.mxu0 %v5438_v26 }
 0x72d   :  { %2523 = vmatpush1.bf16.msra.mxu1 %v5441_v8  ;;  %3788 = vmatpush3.bf16.msra.mxu0 %v5438_v26 }
 0x72e   :  { %3789 = vmatprep.subr.bf16.mxu0 %v5445_v12  ;;  %2718 = vmatprep.subr.bf16.mxu1 %v5348_v40 }
 0x731   :  { %3790 = vmatpush3.bf16.msra.mxu0 %v5445_v12 }
 0x732   :  { %3791 = vmatprep.subr.bf16.mxu0 %v5450_v43 }
 0x735   :  { %3792 = vmatpush3.bf16.msra.mxu0 %v5450_v43 }
 0x736   :  { %3797 = vmatprep.subr.bf16.mxu0 %v5315_v16 }
 0x7e3   :  { %v2332_v32 = vpop.f32.mrb[56].mxu1 }
 0x7e4   :  { %v3921_v29 = vadd.f32 %v2332_v32, %v5169_v24  ;;  %v2334_v21 = vpop.f32.mrb[57].mxu1 }
 0x7e5   :  { %v2336_v2 = vpop.f32.mrb[58].mxu1  ;;  %v3922_v36 = vadd.f32 %v2334_v21, %v5172_v49 }
 0x7e6   :  { %v3376_v63 = vmul.f32 -1.442695, %v3921_v29  ;;  %v3923_v35 = vadd.f32 %v2336_v2, %v5169_v24  ;;  %v2338_v41 = vpop.f32.mrb[59].mxu1 }
 0x7e7   :  { %v3924_v40 = vadd.f32 %v2338_v41, %v5172_v49  ;;  %v3380_v46 = vmul.f32 -1.442695, %v3922_v36 }
 0x7e8   :  { %4304 = vpow2.f32 %v3376_v63  ;;  %v3377_v37 = vmul.f32 -1.442695, %v3923_v35 }
 0x7e9   :  { %v3381_v1 = vmul.f32 -1.442695, %v3924_v40 }
 0x7ea   :  { %4306 = vpow2.f32 %v3377_v37 }
 0x7eb   :  { %v2342_v48 = vpop.f32.mrb[60].mxu1  ;;  %v3775_v25 = vpop.f32.mrb[68].mxu0  ;;  %4308 = vpow2.f32 %v3380_v46 }
 0x7ec   :  { %v3925_v16 = vadd.f32 %v2342_v48, %v5169_v24  ;;  %v2344_v44 = vpop.f32.mrb[61].mxu1  ;;  %v2385_v34 = vpop.f32.mrb[69].mxu0 }
 0x7ed   :  { %v2346_v59 = vpop.f32.mrb[62].mxu1  ;;  %v3776_v9 = vpop.f32.mrb[70].mxu0  ;;  %v3926_v20 = vadd.f32 %v2344_v44, %v5172_v49  ;;  %v2469_v36 = vadd.f32 %v5540_v31, %v2385_v34  ;;  %v5846_v44 = vld [vmem:[#allocation33_spill] sm:$0xff] }
 0x7ee   :  { %v3378_v6 = vmul.f32 -1.442695, %v3925_v16  ;;  %v3927_v28 = vadd.f32 %v2346_v59, %v5169_v24  ;;  %v2348_v53 = vpop.f32.mrb[63].mxu1  ;;  %v2388_v4 = vpop.f32.mrb[71].mxu0 }
 0x7ef   :  { %v3928_v3 = vadd.f32 %v2348_v53, %v5172_v49  ;;  %v3382_v61 = vmul.f32 -1.442695, %v3926_v20  ;;  %v2470_v48 = vadd.f32 %v5540_v31, %v2388_v4 }
 0x7f0   :  { %4310 = vpow2.f32 %v3378_v6  ;;  %v3379_v58 = vmul.f32 -1.442695, %v3927_v28  ;;  %v5847_v28 = vld [vmem:[#allocation35_spill] sm:$0xff] }
 0x7f1   :  { %4312 = vpow2.f32 %v3381_v1  ;;  %v3383_v45 = vmul.f32 -1.442695, %v3928_v3 }
 0x7f2   :  { %v4305_v56 = vpop.eup %4304  ;;  %4314 = vpow2.f32 %v3379_v58  ;;  %v2471_v58 = vadd.f32 %v5540_v31, %v3775_v25 }
 0x7f3   :  { %v2429_v62 = vadd.f32 1.0, %v4305_v56 }
 0x7f4   :  { %v4307_v54 = vpop.eup %4306 }
 0x7f5   :  { %4316 = vrcp.f32 %v2429_v62  ;;  %v2430_v52 = vadd.f32 1.0, %v4307_v54  ;;  %v4309_v17 = vpop.eup %4308  ;;  %v5848_v54 = vld [vmem:[#allocation32_spill] sm:$0xff] }
 0x7f6   :  { %4318 = vpow2.f32 %v3382_v61  ;;  %v2457_v63 = vadd.f32 1.0, %v4309_v17  ;;  %v2472_v61 = vadd.f32 %v5540_v31, %v3776_v9 }
 0x7f7   :  { %4320 = vrcp.f32 %v2430_v52 }
 0x7f8   :  { %4322 = vpow2.f32 %v3383_v45 }
 0x7fa   :  { %v4311_v32 = vpop.eup %4310 }
 0x7fb   :  { %v4313_v29 = vpop.eup %4312  ;;  %v2431_v21 = vadd.f32 1.0, %v4311_v32  ;;  %v5849_v32 = vld [vmem:[#allocation34_spill] sm:$0xff] }
 0x7fc   :  { %v4315_v2 = vpop.eup %4314  ;;  %v2458_v41 = vadd.f32 1.0, %v4313_v29 }
 0x7fd   :  { %4324 = vrcp.f32 %v2431_v21  ;;  %v2432_v35 = vadd.f32 1.0, %v4315_v2 }
 0x7ff   :  { %v4317_v37 = vpop.eup %4316  ;;  %4326 = vrcp.f32 %v2432_v35 }
 0x800   :  { %v4319_v40 = vpop.eup %4318  ;;  %4328 = vrcp.f32 %v2457_v63  ;;  %v2473_v46 = vmul.f32 %v4317_v37, %v2469_v36 }
 0x801   :  { %v4321_v16 = vpop.eup %4320  ;;  %4330 = vrcp.f32 %v2458_v41  ;;  %v2459_v20 = vadd.f32 1.0, %v4319_v40 }
 0x802   :  { %v2477_v1 = vadd.f32 %v2473_v46, %v5846_v44  ;;  %v2474_v59 = vmul.f32 %v4321_v16, %v2470_v48  ;;  %v4323_v6 = vpop.eup %4322 }
 0x803   :  { %v2460_v34 = vadd.f32 1.0, %v4323_v6 }
 0x804   :  { %4332 = vtanh.f32 %v2477_v1  ;;  %v2478_v53 = vadd.f32 %v2474_v59, %v5847_v28 }
 0x806   :  { %4334 = vtanh.f32 %v2478_v53 }
 0x807   :  { %v4325_v3 = vpop.eup %4324  ;;  %4336 = vrcp.f32 %v2459_v20  ;;  %v4449_v20 = vld [vmem:[#allocation12] ss:$12 sps:$4 sm:$0xff]  }
 0x808   :  { %v2475_v56 = vmul.f32 %v4325_v3, %v2471_v58  ;;  %4338 = vrcp.f32 %v2460_v34  ;;  %v4450_v34 = vld [vmem:[#allocation12 + $0x1c] ss:$12 sps:$4 sm:$0xff]  }
 0x809   :  { %v4327_v4 = vpop.eup %4326 }
 0x80a   :  { %v4329_v62 = vpop.eup %4328  ;;  %v2479_v52 = vadd.f32 %v2475_v56, %v5848_v54  ;;  %v2476_v45 = vmul.f32 %v4327_v4, %v2472_v61  ;;  %v4451_v56 = vld [vmem:[#allocation12 + $0x18] ss:$12 sps:$4 sm:$0xff]   ;;  %v4453_v4 = vld [vmem:[#allocation12 + $0x8] ss:$12 sps:$4 sm:$0xff]  }
 0x80b   :  { %v4331_v17 = vpop.eup %4330  ;;  %v2485_v21 = vsub.f32 1.0, %v4329_v62  ;;  %v2493_v25 = vmul.f32 %v4329_v62, %v5552_v23  ;;  %v4455_v62 = vld [vmem:[#allocation12 + $0x20] ss:$12 sps:$4 sm:$0xff]  }
 0x80c   :  { %4340 = vtanh.f32 %v2479_v52  ;;  %v2480_v29 = vadd.f32 %v2476_v45, %v5849_v32  ;;  %v2486_v63 = vsub.f32 1.0, %v4331_v17  ;;  %v2494_v9 = vmul.f32 %v4331_v17, %v5554_v55  ;;  %v4456_v54 = vld [vmem:[#allocation12 + $0x4c] ss:$12 sps:$4 sm:$0xff]   ;;  %v4458_v45 = vld [vmem:[#allocation12 + $0x50] ss:$12 sps:$4 sm:$0xff]  }
 0x80d   :  { %v4457_v52 = vld [vmem:[#allocation12 + $0x38] ss:$12 sps:$4 sm:$0xff]  }
 0x80e   :  { %v4333_v2 = vpop.eup %4332  ;;  %4342 = vtanh.f32 %v2480_v29 }
 0x80f   :  { %v2489_v35 = vmul.f32 %v4333_v2, %v2485_v21 }
 0x810   :  { %v4335_v41 = vpop.eup %4334 }
 0x811   :  { %v2490_v36 = vmul.f32 %v4335_v41, %v2486_v63  ;;  %v5626_v37 = vadd.f32 %v2493_v25, %v2489_v35  ;;  %v4337_v40 = vpop.eup %4336 }
 0x812   :  { %v4339_v48 = vpop.eup %4338  ;;  %v2487_v44 = vsub.f32 1.0, %v4337_v40  ;;  %v2495_v55 = vmul.f32 %v4337_v40, %v5566_v13  ;;  %v4452_v13 = vld [vmem:[#allocation12 + $0x34] ss:$12 sps:$4 sm:$0xff]  }
 0x813   :  { %v5628_v46 = vadd.f32 %v2494_v9, %v2490_v36  ;;  %v2488_v23 = vsub.f32 1.0, %v4339_v48  ;;  %v2496_v53 = vmul.f32 %v4339_v48, %v5569_v38  ;;  %v4454_v38 = vld [vmem:[#allocation12 + $0x30] ss:$12 sps:$4 sm:$0xff]  }
 0x815   :  { %v5632_v16 = vpack.c.bf16 %v5628_v46, %v5626_v37 }
 0x816   :  { %v4341_v1 = vpop.eup %4340 }
 0x817   :  { %2541 = vmatmul.mubr.bf16.vlgmr.msra.gmra.mrb[64].mxu1 %v5632_v16  ;;  %3793 = vmatprep.mubr.bf16.mxu0 %v5632_v16  ;;  %v2491_v59 = vmul.f32 %v4341_v1, %v2487_v44 }
 0x818   :  { %v4343_v6 = vpop.eup %4342  ;;  %2550 = vmatprep.mubr.bf16.mxu1 %v5837_v0  ;;  %2719 = vmatpush1.bf16.msra.mxu1 %v4449_v20 }
 0x819   :  { %v2492_v28 = vmul.f32 %v4343_v6, %v2488_v23  ;;  %v5639_v58 = vadd.f32 %v2495_v55, %v2491_v59  ;;  %2720 = vmatprep.subr.bf16.mxu1 %v4450_v34 }
 0x81b   :  { %v5641_v3 = vadd.f32 %v2496_v53, %v2492_v28 }
 0x81c   :  { %2721 = vmatpush1.bf16.msra.mxu1 %v4451_v56 }
 0x81d   :  { %v5645_v61 = vpack.c.bf16 %v5641_v3, %v5639_v58  ;;  %2722 = vmatprep.subr.bf16.mxu1 %v4452_v13 }
 0x81f   :  { %2551 = vmatmul.mubr.bf16.gmra.mrb[68].mxu1 %v5645_v61  ;;  %3794 = vmatmul.mubr.bf16.vlgmr.msra.gmra.mrb[72].mxu0 %v5645_v61 }
 0x820   :  { %3798 = vmatpush3.bf16.msra.mxu0 %v4453_v4  ;;  %2723 = vmatpush1.bf16.msra.mxu1 %v4454_v38 }
 0x821   :  { %3799 = vmatprep.subr.bf16.mxu0 %v4455_v62  ;;  %2724 = vmatprep.subr.bf16.mxu1 %v4456_v54 }
 0x822   :  { %2750 = vmatprep.mubr.bf16.mxu1 %v5837_v0 }
 0x824   :  { %3800 = vmatpush3.bf16.msra.mxu0 %v4455_v62  ;;  %2725 = vmatpush1.bf16.msra.mxu1 %v5405_v18  ;;  %v5667_v18 = vld [vmem:[#allocation13] sm:$0xff]  }
 0x825   :  { %3801 = vmatprep.subr.bf16.mxu0 %v4457_v52  ;;  %2726 = vmatprep.subr.bf16.mxu1 %v5409_v5 }
 0x828   :  { %3802 = vmatpush3.bf16.msra.mxu0 %v4457_v52  ;;  %2727 = vmatpush1.bf16.msra.mxu1 %v5413_v33 }
 0x829   :  { %3803 = vmatprep.subr.bf16.mxu0 %v4458_v45  ;;  %2728 = vmatprep.subr.bf16.mxu1 %v5417_v42 }
 0x82c   :  { %3804 = vmatpush3.bf16.msra.mxu0 %v4458_v45  ;;  %2729 = vmatpush1.bf16.msra.mxu1 %v5421_v19 }
 0x82d   :  { %3805 = vmatprep.subr.bf16.mxu0 %v5428_v51  ;;  %2730 = vmatprep.subr.bf16.mxu1 %v5425_v47 }
 0x830   :  { %3806 = vmatpush3.bf16.msra.mxu0 %v5428_v51  ;;  %2731 = vmatpush1.bf16.msra.mxu1 %v5431_v50 }
 0x831   :  { %3807 = vmatprep.subr.bf16.mxu0 %v5438_v26  ;;  %2732 = vmatprep.subr.bf16.mxu1 %v5435_v60 }
 0x834   :  { %3808 = vmatpush3.bf16.msra.mxu0 %v5438_v26  ;;  %2733 = vmatpush1.bf16.msra.mxu1 %v5441_v8 }
 0x835   :  { %3809 = vmatprep.subr.bf16.mxu0 %v5445_v12 }
 0x838   :  { %3810 = vmatpush3.bf16.msra.mxu0 %v5445_v12 }
 0x839   :  { %3811 = vmatprep.subr.bf16.mxu0 %v5450_v43 }
 0x83c   :  { %3812 = vmatpush3.bf16.msra.mxu0 %v5450_v43 }
 0x83d   :  { %3817 = vmatprep.subr.bf16.mxu0 %v5667_v18 }
 0x8ea   :  { %v2542_v5 = vpop.f32.mrb[64].mxu1 }
 0x8eb   :  { %v3929_v33 = vadd.f32 %v2542_v5, %v5169_v24  ;;  %v2544_v42 = vpop.f32.mrb[65].mxu1 }
 0x8ec   :  { %v2546_v19 = vpop.f32.mrb[66].mxu1  ;;  %v3930_v60 = vadd.f32 %v2544_v42, %v5172_v49 }
 0x8ed   :  { %v3384_v47 = vmul.f32 -1.442695, %v3929_v33  ;;  %v3931_v51 = vadd.f32 %v2546_v19, %v5169_v24  ;;  %v2548_v50 = vpop.f32.mrb[67].mxu1  ;;  %v5850_v19 = vld [vmem:[#allocation37_spill] sm:$0xff] }
 0x8ee   :  { %v3932_v8 = vadd.f32 %v2548_v50, %v5172_v49  ;;  %v3388_v12 = vmul.f32 -1.442695, %v3930_v60 }
 0x8ef   :  { %4344 = vpow2.f32 %v3384_v47  ;;  %v3385_v26 = vmul.f32 -1.442695, %v3931_v51 }
 0x8f0   :  { %v3389_v2 = vmul.f32 -1.442695, %v3932_v8 }
 0x8f1   :  { %4346 = vpow2.f32 %v3385_v26  ;;  %v5851_v26 = vld [vmem:[#allocation39_spill] sm:$0xff] }
 0x8f2   :  { %v2552_v43 = vpop.f32.mrb[68].mxu1  ;;  %v3795_v17 = vpop.f32.mrb[72].mxu0  ;;  %4348 = vpow2.f32 %v3388_v12 }
 0x8f3   :  { %v3933_v32 = vadd.f32 %v2552_v43, %v5169_v24  ;;  %v2554_v29 = vpop.f32.mrb[69].mxu1  ;;  %v2595_v21 = vpop.f32.mrb[73].mxu0  ;;  %v2681_v12 = vadd.f32 %v5540_v31, %v3795_v17 }
 0x8f4   :  { %v2556_v25 = vpop.f32.mrb[70].mxu1  ;;  %v3796_v63 = vpop.f32.mrb[74].mxu0  ;;  %v3934_v41 = vadd.f32 %v2554_v29, %v5172_v49  ;;  %v2679_v54 = vadd.f32 %v5540_v31, %v2595_v21 }
 0x8f5   :  { %v3386_v35 = vmul.f32 -1.442695, %v3933_v32  ;;  %v3935_v9 = vadd.f32 %v2556_v25, %v5169_v24  ;;  %v2558_v36 = vpop.f32.mrb[71].mxu1  ;;  %v2598_v40 = vpop.f32.mrb[75].mxu0  ;;  %v2682_v21 = vadd.f32 %v5540_v31, %v3796_v63 }
 0x8f6   :  { %v3936_v44 = vadd.f32 %v2558_v36, %v5172_v49  ;;  %v3390_v23 = vmul.f32 -1.442695, %v3934_v41  ;;  %v2680_v33 = vadd.f32 %v5540_v31, %v2598_v40  ;;  %v5853_v40 = vld [vmem:[#allocation38_spill] sm:$0xff] }
 0x8f7   :  { %4350 = vpow2.f32 %v3386_v35  ;;  %v3387_v48 = vmul.f32 -1.442695, %v3935_v9  ;;  %v5852_v35 = vld [vmem:[#allocation36_spill] sm:$0xff] }
 0x8f8   :  { %4352 = vpow2.f32 %v3389_v2  ;;  %v3391_v20 = vmul.f32 -1.442695, %v3936_v44 }
 0x8f9   :  { %v4345_v1 = vpop.eup %4344  ;;  %4354 = vpow2.f32 %v3387_v48 }
 0x8fa   :  { %v2639_v59 = vadd.f32 1.0, %v4345_v1 }
 0x8fb   :  { %v4347_v55 = vpop.eup %4346 }
 0x8fc   :  { %4356 = vrcp.f32 %v2639_v59  ;;  %v2640_v6 = vadd.f32 1.0, %v4347_v55  ;;  %v4349_v28 = vpop.eup %4348 }
 0x8fd   :  { %4358 = vpow2.f32 %v3390_v23  ;;  %v2667_v4 = vadd.f32 1.0, %v4349_v28 }
 0x8fe   :  { %4360 = vrcp.f32 %v2640_v6 }
 0x8ff   :  { %4362 = vpow2.f32 %v3391_v20 }
 0x901   :  { %v4351_v53 = vpop.eup %4350 }
 0x902   :  { %v4353_v34 = vpop.eup %4352  ;;  %v2641_v56 = vadd.f32 1.0, %v4351_v53 }
 0x903   :  { %v4355_v13 = vpop.eup %4354  ;;  %v2668_v62 = vadd.f32 1.0, %v4353_v34 }
 0x904   :  { %4364 = vrcp.f32 %v2641_v56  ;;  %v2642_v38 = vadd.f32 1.0, %v4355_v13 }
 0x906   :  { %v4357_v52 = vpop.eup %4356  ;;  %4366 = vrcp.f32 %v2642_v38 }
 0x907   :  { %v4359_v45 = vpop.eup %4358  ;;  %4368 = vrcp.f32 %v2667_v4  ;;  %v2683_v5 = vmul.f32 %v4357_v52, %v2679_v54 }
 0x908   :  { %v4361_v42 = vpop.eup %4360  ;;  %4370 = vrcp.f32 %v2668_v62  ;;  %v2669_v60 = vadd.f32 1.0, %v4359_v45 }
 0x909   :  { %v2687_v47 = vadd.f32 %v2683_v5, %v5850_v19  ;;  %v2684_v51 = vmul.f32 %v4361_v42, %v2680_v33  ;;  %v4363_v50 = vpop.eup %4362  ;;  %v4097_v42 = vld [vmem:[#allocation13 + $0x8] sm:$0xff]  }
 0x90a   :  { %v2670_v43 = vadd.f32 1.0, %v4363_v50  ;;  %v4101_v19 = vld [vmem:[#allocation13 + $0x28] sm:$0xff]  }
 0x90b   :  { %4372 = vtanh.f32 %v2687_v47  ;;  %v2688_v8 = vadd.f32 %v2684_v51, %v5851_v26  ;;  %v4102_v47 = vld [vmem:[#allocation13 + $0x30] sm:$0xff]   ;;  %v4103_v51 = vld [vmem:[#allocation13 + $0x38] sm:$0xff]  }
 0x90d   :  { %4374 = vtanh.f32 %v2688_v8 }
 0x90e   :  { %v4365_v32 = vpop.eup %4364  ;;  %4376 = vrcp.f32 %v2669_v60 }
 0x90f   :  { %v2685_v29 = vmul.f32 %v4365_v32, %v2681_v12  ;;  %4378 = vrcp.f32 %v2670_v43 }
 0x910   :  { %v4367_v2 = vpop.eup %4366 }
 0x911   :  { %v4369_v25 = vpop.eup %4368  ;;  %v2689_v41 = vadd.f32 %v2685_v29, %v5852_v35  ;;  %v2686_v9 = vmul.f32 %v4367_v2, %v2682_v21 }
 0x912   :  { %v4371_v36 = vpop.eup %4370  ;;  %v2695_v44 = vsub.f32 1.0, %v4369_v25  ;;  %v2703_v17 = vmul.f32 %v4369_v25, %v5626_v37 }
 0x913   :  { %4380 = vtanh.f32 %v2689_v41  ;;  %v2690_v48 = vadd.f32 %v2686_v9, %v5853_v40  ;;  %v2696_v23 = vsub.f32 1.0, %v4371_v36  ;;  %v2704_v63 = vmul.f32 %v4371_v36, %v5628_v46 }
 0x915   :  { %v4373_v1 = vpop.eup %4372  ;;  %4382 = vtanh.f32 %v2690_v48 }
 0x916   :  { %v2699_v59 = vmul.f32 %v4373_v1, %v2695_v44 }
 0x917   :  { %v4375_v55 = vpop.eup %4374 }
 0x918   :  { %v2700_v6 = vmul.f32 %v4375_v55, %v2696_v23  ;;  %v5688_v20 = vadd.f32 %v2703_v17, %v2699_v59  ;;  %v4377_v28 = vpop.eup %4376 }
 0x919   :  { %v4379_v34 = vpop.eup %4378  ;;  %v2697_v13 = vsub.f32 1.0, %v4377_v28  ;;  %v2705_v62 = vmul.f32 %v4377_v28, %v5639_v58  ;;  %v4098_v58 = vld [vmem:[#allocation13 + $0x10] sm:$0xff]  }
 0x91a   :  { %v5690_v53 = vadd.f32 %v2704_v63, %v2700_v6  ;;  %v2698_v37 = vsub.f32 1.0, %v4379_v34  ;;  %v2706_v52 = vmul.f32 %v4379_v34, %v5641_v3  ;;  %v4100_v3 = vld [vmem:[#allocation13 + $0x20] sm:$0xff]  }
 0x91c   :  { %v2716_v56 = vpack.c.bf16 %v5690_v53, %v5688_v20 }
 0x91d   :  { %v4381_v4 = vpop.eup %4380 }
 0x91e   :  { %2751 = vmatmul.mubr.bf16.vlgmr.msra.gmra.mrb[72].mxu1 %v2716_v56  ;;  %3813 = vmatprep.mubr.bf16.mxu0 %v2716_v56  ;;  %v2701_v38 = vmul.f32 %v4381_v4, %v2697_v13 }
 0x91f   :  { %v4383_v54 = vpop.eup %4382  ;;  %2760 = vmatprep.mubr.bf16.mxu1 %v5837_v0  ;;  %v4099_v0 = vld [vmem:[#allocation13 + $0x18] sm:$0xff]  }
 0x920   :  { %v2702_v46 = vmul.f32 %v4383_v54, %v2698_v37  ;;  %v5697_v45 = vadd.f32 %v2705_v62, %v2701_v38  ;;  %v5854_v38 = vld [vmem:[#allocation41_spill] sm:$0xff] }
 0x922   :  { %v5699_v5 = vadd.f32 %v2706_v52, %v2702_v46 }
 0x924   :  { %v2717_v33 = vpack.c.bf16 %v5699_v5, %v5697_v45 }
 0x926   :  { %2761 = vmatmul.mubr.bf16.gmra.mrb[76].mxu1 %v2717_v33  ;;  %3814 = vmatmul.mubr.bf16.vlgmr.msra.gmra.mrb[76].mxu0 %v2717_v33 }
 0x927   :  { %3818 = vmatpush3.bf16.msra.mxu0 %v5667_v18  ;;  %3833 = vmatprep.mubr.bf16.mxu0 %v5209_v39 }
 0x928   :  { %3819 = vmatprep.subr.bf16.mxu0 %v4097_v42 }
 0x92b   :  { %3820 = vmatpush3.bf16.msra.mxu0 %v4097_v42 }
 0x92c   :  { %3821 = vmatprep.subr.bf16.mxu0 %v4098_v58 }
 0x92f   :  { %3822 = vmatpush3.bf16.msra.mxu0 %v4098_v58 }
 0x930   :  { %3823 = vmatprep.subr.bf16.mxu0 %v4099_v0 }
 0x933   :  { %3824 = vmatpush3.bf16.msra.mxu0 %v4099_v0 }
 0x934   :  { %3825 = vmatprep.subr.bf16.mxu0 %v4100_v3 }
 0x937   :  { %3826 = vmatpush3.bf16.msra.mxu0 %v4100_v3 }
 0x938   :  { %3827 = vmatprep.subr.bf16.mxu0 %v4101_v19 }
 0x93b   :  { %3828 = vmatpush3.bf16.msra.mxu0 %v4101_v19 }
 0x93c   :  { %3829 = vmatprep.subr.bf16.mxu0 %v4102_v47 }
 0x93f   :  { %3830 = vmatpush3.bf16.msra.mxu0 %v4102_v47 }
 0x940   :  { %3831 = vmatprep.subr.bf16.mxu0 %v4103_v51 }
 0x943   :  { %3832 = vmatpush3.bf16.msra.mxu0 %v4103_v51 }
 0x946   :  { %3834 = vmatmul.mubr.bf16.vlgmr.msra.gmra.mrb[80].mxu0 %v5225_v7 }
 0x947   :  { %3837 = vmatprep.mubr.bf16.mxu0 %v5283_v11 }
 0x94e   :  { %3838 = vmatmul.mubr.bf16.gmra.mrb[84].mxu0 %v5305_v57 }
 0x94f   :  { %3841 = vmatprep.mubr.bf16.mxu0 %v5379_v30 }
 0x956   :  { %3842 = vmatmul.mubr.bf16.gmra.mrb[88].mxu0 %v5395_v27 }
 0x957   :  { %3845 = vmatprep.mubr.bf16.mxu0 %v5479_v10 }
 0x95e   :  { %3846 = vmatmul.mubr.bf16.gmra.mrb[92].mxu0 %v5495_v15 }
 0x95f   :  { %3849 = vmatprep.mubr.bf16.mxu0 %v5558_v14 }
 0x966   :  { %3850 = vmatmul.mubr.bf16.gmra.mrb[96].mxu0 %v5574_v22 }
 0x967   :  { %3853 = vmatprep.mubr.bf16.mxu0 %v5632_v16 }
 0x96e   :  { %3854 = vmatmul.mubr.bf16.gmra.mrb[100].mxu0 %v5645_v61 }
 0x96f   :  { %3857 = vmatprep.mubr.bf16.mxu0 %v2716_v56 }
 0x976   :  { %3858 = vmatmul.mubr.bf16.gmra.mrb[104].mxu0 %v2717_v33  ;;  %v5855_v33 = vld [vmem:[#allocation43_spill] sm:$0xff] }
 0x9f1   :  { %v2752_v39 = vpop.f32.mrb[72].mxu1 }
 0x9f2   :  { %v3937_v7 = vadd.f32 %v2752_v39, %v5169_v24  ;;  %v2754_v11 = vpop.f32.mrb[73].mxu1  ;;  %v5733_v39 = vld [vmem:[%s5812_s9] ss:$0 sm:$0xff]  ;;  %s4660_s9 = smov [#allocation16]  }
 0x9f3   :  { %v2756_v57 = vpop.f32.mrb[74].mxu1  ;;  %v3938_v15 = vadd.f32 %v2754_v11, %v5172_v49  ;;  %v5856_v11 = vld [vmem:[#allocation40_spill] sm:$0xff]  ;;  %s3259_s26 = sshll.u32 %s4660_s9, 4  ;;  %s3260_s26 = int_to_ptr.vmem [resolvable:$true] %s3259_s26 }
 0x9f4   :  { %v3392_v30 = vmul.f32 -1.442695, %v3937_v7  ;;  %v3939_v27 = vadd.f32 %v2756_v57, %v5169_v24  ;;  %v2758_v10 = vpop.f32.mrb[75].mxu1  ;;  %s4591_s28 = scalar_lea.vmem %s3260_s26, 512  ;;  %p4596_p7 = scmp.lt.s32.totalorder %s3260_s26, %s3260_s26 }
 0x9f5   :  { %v3940_v22 = vadd.f32 %v2758_v10, %v5172_v49  ;;  %v3396_v16 = vmul.f32 -1.442695, %v3938_v15  ;;  %v5857_v15 = vld [vmem:[#allocation42_spill] sm:$0xff]  ;;  %p4592_p6 = scmp.ne.s32.totalorder %s3260_s26, %s4591_s28  ;;  %p4597_p8 = scmp.lt.s32.totalorder %s4591_s28, %s4591_s28 }
 0x9f6   :  { %4384 = vpow2.f32 %v3392_v30  ;;  %v3393_v14 = vmul.f32 -1.442695, %v3939_v27 }
 0x9f7   :  { %v3397_v8 = vmul.f32 -1.442695, %v3940_v22  ;;  %p4598_p9 = por %p4597_p8, %p4596_p7 }
 0x9f8   :  { %4386 = vpow2.f32 %v3393_v14 }
 0x9f9   :  { %v2762_v61 = vpop.f32.mrb[76].mxu1  ;;  %v3815_v18 = vpop.f32.mrb[76].mxu0  ;;  %4388 = vpow2.f32 %v3396_v16  ;;  %p4599_p10 = pnand %p4598_p9, %p4592_p6 }
 0x9fa   :  { %v3941_v50 = vadd.f32 %v2762_v61, %v5169_v24  ;;  %v2764_v60 = vpop.f32.mrb[77].mxu1  ;;  %v2805_v26 = vpop.f32.mrb[77].mxu0  ;;  %v2891_v58 = vadd.f32 %v5540_v31, %v3815_v18 }
 0x9fb   :  { %v2766_v12 = vpop.f32.mrb[78].mxu1  ;;  %v3816_v43 = vpop.f32.mrb[78].mxu0  ;;  %v3942_v29 = vadd.f32 %v2764_v60, %v5172_v49  ;;  %v2889_v28 = vadd.f32 %v5540_v31, %v2805_v26 }
 0x9fc   :  { %v3394_v32 = vmul.f32 -1.442695, %v3941_v50  ;;  %v3943_v21 = vadd.f32 %v2766_v12, %v5169_v24  ;;  %v2768_v2 = vpop.f32.mrb[79].mxu1  ;;  %v2808_v25 = vpop.f32.mrb[79].mxu0  ;;  %v2892_v47 = vadd.f32 %v5540_v31, %v3816_v43 }
 0x9fd   :  { %v3944_v41 = vadd.f32 %v2768_v2, %v5172_v49  ;;  %v3398_v36 = vmul.f32 -1.442695, %v3942_v29  ;;  %v2890_v4 = vadd.f32 %v5540_v31, %v2808_v25 }
 0x9fe   :  { %4390 = vpow2.f32 %v3394_v32  ;;  %v3395_v35 = vmul.f32 -1.442695, %v3943_v21 }
 0x9ff   :  { %4392 = vpow2.f32 %v3397_v8  ;;  %v3399_v1 = vmul.f32 -1.442695, %v3944_v41 }
 0xa00   :  { %v4385_v9 = vpop.eup %4384  ;;  %4394 = vpow2.f32 %v3395_v35 }
 0xa01   :  { %v2849_v40 = vadd.f32 1.0, %v4385_v9 }
 0xa02   :  { %v4387_v48 = vpop.eup %4386 }
 0xa03   :  { %4396 = vrcp.f32 %v2849_v40  ;;  %v2850_v44 = vadd.f32 1.0, %v4387_v48  ;;  %v4389_v17 = vpop.eup %4388 }
 0xa04   :  { %4398 = vpow2.f32 %v3398_v36  ;;  %v2877_v63 = vadd.f32 1.0, %v4389_v17 }
 0xa05   :  { %4400 = vrcp.f32 %v2850_v44 }
 0xa06   :  { %4402 = vpow2.f32 %v3399_v1 }
 0xa08   :  { %v4391_v24 = vpop.eup %4390 }
 0xa09   :  { %v4393_v23 = vpop.eup %4392  ;;  %v2851_v59 = vadd.f32 1.0, %v4391_v24 }
 0xa0a   :  { %v4395_v55 = vpop.eup %4394  ;;  %v2878_v49 = vadd.f32 1.0, %v4393_v23 }
 0xa0b   :  { %4404 = vrcp.f32 %v2851_v59  ;;  %v2852_v6 = vadd.f32 1.0, %v4395_v55 }
 0xa0d   :  { %v4397_v34 = vpop.eup %4396  ;;  %4406 = vrcp.f32 %v2852_v6 }
 0xa0e   :  { %v4399_v56 = vpop.eup %4398  ;;  %4408 = vrcp.f32 %v2877_v63  ;;  %v2893_v13 = vmul.f32 %v4397_v34, %v2889_v28 }
 0xa0f   :  { %v4401_v37 = vpop.eup %4400  ;;  %4410 = vrcp.f32 %v2878_v49  ;;  %v2879_v52 = vadd.f32 1.0, %v4399_v56 }
 0xa10   :  { %v2897_v62 = vadd.f32 %v2893_v13, %v5854_v38  ;;  %v2894_v54 = vmul.f32 %v4401_v37, %v2890_v4  ;;  %v4403_v46 = vpop.eup %4402 }
 0xa11   :  { %v2880_v0 = vadd.f32 1.0, %v4403_v46 }
 0xa12   :  { %4412 = vtanh.f32 %v2897_v62  ;;  %v2898_v42 = vadd.f32 %v2894_v54, %v5855_v33 }
 0xa14   :  { %4414 = vtanh.f32 %v2898_v42 }
 0xa15   :  { %v4405_v3 = vpop.eup %4404  ;;  %4416 = vrcp.f32 %v2879_v52 }
 0xa16   :  { %v2895_v19 = vmul.f32 %v4405_v3, %v2891_v58  ;;  %4418 = vrcp.f32 %v2880_v0 }
 0xa17   :  { %v4407_v51 = vpop.eup %4406 }
 0xa18   :  { %v4409_v7 = vpop.eup %4408  ;;  %v2899_v57 = vadd.f32 %v2895_v19, %v5856_v11  ;;  %v2896_v30 = vmul.f32 %v4407_v51, %v2892_v47 }
 0xa19   :  { %v3835_v27 = vpop.f32.mrb[80].mxu0  ;;  %v4411_v10 = vpop.eup %4410  ;;  %v2905_v18 = vsub.f32 1.0, %v4409_v7  ;;  %v2913_v32 = vmul.f32 %v4409_v7, %v5688_v20 }
 0xa1a   :  { %4420 = vtanh.f32 %v2899_v57  ;;  %v2900_v14 = vadd.f32 %v2896_v30, %v5857_v15  ;;  %v3092_v22 = vadd.f32 %v3835_v27, %v5733_v39  ;;  %v3083_v16 = vpop.f32.mrb[81].mxu0  ;;  %v2906_v12 = vsub.f32 1.0, %v4411_v10 }
 0xa1b   :  { %v3084_v31 = vadd.f32 %v5733_v39, %v3083_v16  ;;  %v3836_v61 = vpop.f32.mrb[82].mxu0  ;;  %v2914_v2 = vmul.f32 %v4411_v10, %v5690_v53 }
 0xa1c   :  { %v4413_v50 = vpop.eup %4412  ;;  %4422 = vtanh.f32 %v2900_v14  ;;  %3212 = vst [vmem:[#allocation15 + $0x10] sm:$0xff] %v3092_v22  ;;  %v3095_v60 = vadd.f32 %v3836_v61, %v5733_v39  ;;  %v3086_v26 = vpop.f32.mrb[83].mxu0 }
 0xa1d   :  { %3210 = vst [vmem:[#allocation15] sm:$0xff] %v3084_v31  ;;  %v3087_v8 = vadd.f32 %v5733_v39, %v3086_v26  ;;  %v2909_v43 = vmul.f32 %v4413_v50, %v2905_v18 }
 0xa1e   :  { %v4415_v29 = vpop.eup %4414  ;;  %3213 = vst [vmem:[#allocation15 + $0x18] sm:$0xff] %v3095_v60 }
 0xa1f   :  { %3211 = vst [vmem:[#allocation15 + $0x8] sm:$0xff] %v3087_v8  ;;  %v2910_v21 = vmul.f32 %v4415_v29, %v2906_v12  ;;  %v2917_v25 = vadd.f32 %v2913_v32, %v2909_v43  ;;  %v4417_v35 = vpop.eup %4416 }
 0xa20   :  { %v4419_v36 = vpop.eup %4418  ;;  %v2907_v17 = vsub.f32 1.0, %v4417_v35  ;;  %v2915_v6 = vmul.f32 %v4417_v35, %v5697_v45 }
 0xa21   :  { %v3839_v41 = vpop.f32.mrb[84].mxu0  ;;  %v2918_v9 = vadd.f32 %v2914_v2, %v2910_v21  ;;  %2926 = vst [vmem:[#allocation16] sm:$0xff] %v2917_v25  ;;  %v2908_v55 = vsub.f32 1.0, %v4419_v36  ;;  %v2916_v34 = vmul.f32 %v4419_v36, %v5699_v5 }
 0xa22   :  { %v3108_v40 = vadd.f32 %v3839_v41, %v5733_v39  ;;  %v3099_v48 = vpop.f32.mrb[85].mxu0 }
 0xa23   :  { %v3100_v44 = vadd.f32 %v5733_v39, %v3099_v48  ;;  %v3840_v1 = vpop.f32.mrb[86].mxu0  ;;  %2927 = vst [vmem:[#allocation16 + $0x8] sm:$0xff] %v2918_v9  ;;  %v2976_v20 = vpack.c.bf16 %v2918_v9, %v2917_v25 }
 0xa24   :  { %v4421_v24 = vpop.eup %4420  ;;  %3216 = vst [vmem:[#allocation15 + $0x30] sm:$0xff] %v3108_v40  ;;  %v3111_v23 = vadd.f32 %v3840_v1, %v5733_v39  ;;  %v3102_v53 = vpop.f32.mrb[87].mxu0 }
 0xa25   :  { %3214 = vst [vmem:[#allocation15 + $0x20] sm:$0xff] %v3100_v44  ;;  %v3103_v59 = vadd.f32 %v5733_v39, %v3102_v53  ;;  %3861 = vmatprep.mubr.bf16.mxu0 %v2976_v20  ;;  %v2911_v63 = vmul.f32 %v4421_v24, %v2907_v17 }
 0xa26   :  { %v4423_v49 = vpop.eup %4422  ;;  %3217 = vst [vmem:[#allocation15 + $0x38] sm:$0xff] %v3111_v23 }
 0xa27   :  { %3215 = vst [vmem:[#allocation15 + $0x28] sm:$0xff] %v3103_v59  ;;  %v2912_v28 = vmul.f32 %v4423_v49, %v2908_v55  ;;  %v2919_v56 = vadd.f32 %v2915_v6, %v2911_v63 }
 0xa29   :  { %v3843_v13 = vpop.f32.mrb[88].mxu0  ;;  %v2920_v4 = vadd.f32 %v2916_v34, %v2912_v28  ;;  %2928 = vst [vmem:[#allocation16 + $0x10] sm:$0xff] %v2919_v56 }
 0xa2a   :  { %v3124_v37 = vadd.f32 %v3843_v13, %v5733_v39  ;;  %v3115_v38 = vpop.f32.mrb[89].mxu0 }
 0xa2b   :  { %v3116_v62 = vadd.f32 %v5733_v39, %v3115_v38  ;;  %v3844_v54 = vpop.f32.mrb[90].mxu0  ;;  %2929 = vst [vmem:[#allocation16 + $0x18] sm:$0xff] %v2920_v4  ;;  %v2977_v46 = vpack.c.bf16 %v2920_v4, %v2919_v56 }
 0xa2c   :  { %3220 = vst [vmem:[#allocation15 + $0x50] sm:$0xff] %v3124_v37  ;;  %v3127_v45 = vadd.f32 %v3844_v54, %v5733_v39  ;;  %v3118_v52 = vpop.f32.mrb[91].mxu0 }
 0xa2d   :  { %3218 = vst [vmem:[#allocation15 + $0x40] sm:$0xff] %v3116_v62  ;;  %v3119_v33 = vadd.f32 %v5733_v39, %v3118_v52  ;;  %3862 = vmatmul.mubr.bf16.gmra.mrb[108].mxu0 %v2977_v46 }
 0xa2e   :  { %3221 = vst [vmem:[#allocation15 + $0x58] sm:$0xff] %v3127_v45 }
 0xa2f   :  { %3219 = vst [vmem:[#allocation15 + $0x48] sm:$0xff] %v3119_v33 }
 0xa31   :  { %v3847_v5 = vpop.f32.mrb[92].mxu0 }
 0xa32   :  { %v3140_v42 = vadd.f32 %v3847_v5, %v5733_v39  ;;  %v3131_v58 = vpop.f32.mrb[93].mxu0 }
 0xa33   :  { %v3132_v0 = vadd.f32 %v5733_v39, %v3131_v58  ;;  %v3848_v3 = vpop.f32.mrb[94].mxu0 }
 0xa34   :  { %3224 = vst [vmem:[#allocation15 + $0x70] sm:$0xff] %v3140_v42  ;;  %v3143_v19 = vadd.f32 %v3848_v3, %v5733_v39  ;;  %v3134_v47 = vpop.f32.mrb[95].mxu0 }
 0xa35   :  { %3222 = vst [vmem:[#allocation15 + $0x60] sm:$0xff] %v3132_v0  ;;  %v3135_v51 = vadd.f32 %v5733_v39, %v3134_v47 }
 0xa36   :  { %3225 = vst [vmem:[#allocation15 + $0x78] sm:$0xff] %v3143_v19 }
 0xa37   :  { %3223 = vst [vmem:[#allocation15 + $0x68] sm:$0xff] %v3135_v51 }
 0xa39   :  { %v3851_v7 = vpop.f32.mrb[96].mxu0 }
 0xa3a   :  { %v3156_v11 = vadd.f32 %v3851_v7, %v5733_v39  ;;  %v3147_v57 = vpop.f32.mrb[97].mxu0 }
 0xa3b   :  { %v3148_v30 = vadd.f32 %v5733_v39, %v3147_v57  ;;  %v3852_v27 = vpop.f32.mrb[98].mxu0 }
 0xa3c   :  { %3228 = vst [vmem:[#allocation15 + $0x90] sm:$0xff] %v3156_v11  ;;  %v3159_v10 = vadd.f32 %v3852_v27, %v5733_v39  ;;  %v3150_v15 = vpop.f32.mrb[99].mxu0 }
 0xa3d   :  { %3226 = vst [vmem:[#allocation15 + $0x80] sm:$0xff] %v3148_v30  ;;  %v3151_v14 = vadd.f32 %v5733_v39, %v3150_v15 }
 0xa3e   :  { %3229 = vst [vmem:[#allocation15 + $0x98] sm:$0xff] %v3159_v10 }
 0xa3f   :  { %3227 = vst [vmem:[#allocation15 + $0x88] sm:$0xff] %v3151_v14 }
 0xa41   :  { %v3855_v22 = vpop.f32.mrb[100].mxu0 }
 0xa42   :  { %v3172_v16 = vadd.f32 %v3855_v22, %v5733_v39  ;;  %v3163_v31 = vpop.f32.mrb[101].mxu0 }
 0xa43   :  { %v3164_v61 = vadd.f32 %v5733_v39, %v3163_v31  ;;  %v3856_v18 = vpop.f32.mrb[102].mxu0 }
 0xa44   :  { %3232 = vst [vmem:[#allocation15 + $0xb0] sm:$0xff] %v3172_v16  ;;  %v3175_v50 = vadd.f32 %v3856_v18, %v5733_v39  ;;  %v3166_v60 = vpop.f32.mrb[103].mxu0 }
 0xa45   :  { %3230 = vst [vmem:[#allocation15 + $0xa0] sm:$0xff] %v3164_v61  ;;  %v3167_v26 = vadd.f32 %v5733_v39, %v3166_v60 }
 0xa46   :  { %3233 = vst [vmem:[#allocation15 + $0xb8] sm:$0xff] %v3175_v50 }
 0xa47   :  { %3231 = vst [vmem:[#allocation15 + $0xa8] sm:$0xff] %v3167_v26 }
 0xa49   :  { %v3859_v8 = vpop.f32.mrb[104].mxu0 }
 0xa4a   :  { %v3188_v12 = vadd.f32 %v3859_v8, %v5733_v39  ;;  %v3179_v43 = vpop.f32.mrb[105].mxu0 }
 0xa4b   :  { %v3180_v32 = vadd.f32 %v5733_v39, %v3179_v43  ;;  %v3860_v29 = vpop.f32.mrb[106].mxu0 }
 0xa4c   :  { %3236 = vst [vmem:[#allocation15 + $0xd0] sm:$0xff] %v3188_v12  ;;  %v3191_v21 = vadd.f32 %v3860_v29, %v5733_v39  ;;  %v3182_v2 = vpop.f32.mrb[107].mxu0 }
 0xa4d   :  { %3234 = vst [vmem:[#allocation15 + $0xc0] sm:$0xff] %v3180_v32  ;;  %v3183_v25 = vadd.f32 %v5733_v39, %v3182_v2 }
 0xa4e   :  { %3237 = vst [vmem:[#allocation15 + $0xd8] sm:$0xff] %v3191_v21 }
 0xa4f   :  { %3235 = vst [vmem:[#allocation15 + $0xc8] sm:$0xff] %v3183_v25 }
 0xa50   :  { %4602 = shalt.err (!%p4599_p10)
}
 0xa51   :  { %s4603_s12 = scalar_lea.hbm %s5814_s11, 512 }
 0xa52   :  { %p4604_p11 = scmp.ne.s32.totalorder %s5814_s11, %s4603_s12  ;;  %p4607_p12 = scmp.lt.u32.totalorder %s4603_s12, %s5814_s11 }
 0xa54   :  { %p4609_p13 = pnand %p4607_p12, %p4604_p11 }
 0xa56   :  { %4612 = shalt.err (!%p4609_p13)
}
 0xa57   :  { %3265 = dma.vmem_to_hbm [thread:$0]  %s3260_s26, 512, %s5814_s11, [#allocation17], %s4649_s29, %s4649_s29, %s4650_s30  }
 0xa58   :  { %s4661_s22 = smov [#allocation15]  }
 0xa59   :  { %s3247_s23 = sshll.u32 %s4661_s22, 4  ;;  %s3248_s23 = int_to_ptr.vmem [resolvable:$true] %s3247_s23 }
 0xa5a   :  { %s4613_s11 = scalar_lea.vmem %s3248_s23, 4096  ;;  %p4618_p1 = scmp.lt.s32.totalorder %s3248_s23, %s3248_s23 }
 0xa5b   :  { %p4614_p0 = scmp.ne.s32.totalorder %s3248_s23, %s4613_s11  ;;  %p4619_p2 = scmp.lt.s32.totalorder %s4613_s11, %s4613_s11 }
 0xa5d   :  { %p4620_p3 = por %p4619_p2, %p4618_p1 }
 0xa5f   :  { %p4621_p4 = pnand %p4620_p3, %p4614_p0 }
 0xb00   :  { %v3863_v35 = vpop.f32.mrb[108].mxu0 }
 0xb01   :  { %v3204_v41 = vadd.f32 %v3863_v35, %v5733_v39  ;;  %v3195_v9 = vpop.f32.mrb[109].mxu0 }
 0xb02   :  { %v3196_v36 = vadd.f32 %v5733_v39, %v3195_v9  ;;  %v3864_v40 = vpop.f32.mrb[110].mxu0 }
 0xb03   :  { %3240 = vst [vmem:[#allocation15 + $0xf0] sm:$0xff] %v3204_v41  ;;  %v3207_v48 = vadd.f32 %v3864_v40, %v5733_v39  ;;  %v3198_v44 = vpop.f32.mrb[111].mxu0 }
 0xb04   :  { %3238 = vst [vmem:[#allocation15 + $0xe0] sm:$0xff] %v3196_v36  ;;  %v3199_v1 = vadd.f32 %v5733_v39, %v3198_v44 }
 0xb05   :  { %3241 = vst [vmem:[#allocation15 + $0xf8] sm:$0xff] %v3207_v48 }
 0xb06   :  { %3239 = vst [vmem:[#allocation15 + $0xe8] sm:$0xff] %v3199_v1 }
 0xb07   :  { %4624 = shalt.err (!%p4621_p4)
}
 0xb08   :  { %s4625_s1 = scalar_lea.hbm %s5813_s10, 4096 }
 0xb09   :  { %p4626_p5 = scmp.ne.s32.totalorder %s5813_s10, %s4625_s1  ;;  %p4629_p6 = scmp.lt.u32.totalorder %s4625_s1, %s5813_s10 }
 0xb0b   :  { %p4631_p7 = pnand %p4629_p6, %p4626_p5 }
 0xb0d   :  { %4634 = shalt.err (!%p4631_p7)
}
 0xb0e   :  { %3253 = dma.vmem_to_hbm [thread:$0]  %s3248_s23, 4096, %s5813_s10, [#allocation6], %s4649_s29, %s4649_s29, %s4650_s30  }
 0xb0f   :  { %4643 = dma.done.wait [#allocation6], 4096  }
 0xb10   :  { %4644 = vsyncadd [#allocation6], 4294963200 }
 0xb11   :  { %4645 = dma.done.wait [#allocation17], 512  }
 0xb12   :  { %4646 = vsyncadd [#allocation17], 4294966784 }
 0xb13   :  { %3272 = vsyncpa [#allocation5], 1 }
 0xb14   :  { %3273 = vsyncpa [#allocation8], 1 }
 0xb15   :  { %3274 = vsyncpa [#allocation11], 1 }
 0xb16   :  { %3275 = vsyncpa [#allocation14], 1 }
 0xb17   :  { %3276 = vsyncpa [#allocation6], 1 }
 0xb18   :  { %3277 = vsyncpa [#allocation17], 1 }

</bundles_post_ra>
